<compile_context>
chip_gen: v6e
topology: v6e:2x2x1
jax: 0.10.0
libtpu: 0.0.40
codegen_flags: <defaults>
</compile_context>

<pallas_src>
import functools

import jax
import jax.numpy as jnp
from jax.experimental import pallas as pl
from jax.experimental.pallas import tpu as pltpu


# ----------------------------- fused decoder kernel -----------------------------

def _decoder_kernel(x_ref, src_ref, tmask_ref, smask_ref,
                    sa_wqkv_ref, sa_bqkv_ref, sa_wp_ref, sa_bp_ref,
                    ln1_g_ref, ln1_b_ref,
                    ja_wqkv_ref, ja_bqkv_ref, ja_wp_ref, ja_bp_ref,
                    ln2_g_ref, ln2_b_ref,
                    w1_ref, b1_ref, w2_ref, b2_ref,
                    ln3_g_ref, ln3_b_ref,
                    fc_w_ref, fc_b_ref,
                    out_ref,
                    *, n_blocks, n_heads, head_dim, inv_scale):
    f32 = jnp.float32
    bf16 = jnp.bfloat16
    H, Dh = n_heads, head_dim
    D = H * Dh

    x = x_ref[0]                          # (Lt, D) f32 activations (residual stream)
    src_b = src_ref[0].astype(bf16)       # (Ls, D) bf16 matmul operand
    tmask = tmask_ref[...][0, 0]          # (Lt, Lt)
    smask = smask_ref[...][0, 0]          # (1, Ls)

    def mm(a, b):                         # bf16 MXU matmul, f32 accumulation
        return jnp.dot(a.astype(bf16), b.astype(bf16), preferred_element_type=f32)

    def attend(q_in_b, kv_in_b, mask2d, wqkv_ref, bqkv_ref, wp_ref, bp_ref):
        """Multi-head attention with the output projection fused into the epilogue."""
        Lq = q_in_b.shape[0]
        acc = jnp.zeros((Lq, D), f32)
        for h in range(H):                                   # static unroll, H small
            # per-head projections (weights packed (3H, D, Dh) = [q | k | v] x heads)
            q = jnp.dot(q_in_b, wqkv_ref[h], preferred_element_type=f32) + bqkv_ref[h]
            k = jnp.dot(kv_in_b, wqkv_ref[H + h], preferred_element_type=f32) + bqkv_ref[H + h]
            v = jnp.dot(kv_in_b, wqkv_ref[2 * H + h], preferred_element_type=f32) + bqkv_ref[2 * H + h]
            q = q * inv_scale                                # fold 1/scale into q
            # scores: contract the head dims directly (no k.T materialization)
            s = jax.lax.dot_general(q.astype(bf16), k.astype(bf16),
                                    (((1,), (1,)), ((), ())),
                                    preferred_element_type=f32)      # (Lq, Lk)
            s = jnp.where(mask2d == 0.0, -1e20, s)           # masked_fill(mask==0, -1e20)
            m = jnp.max(s, axis=-1, keepdims=True)
            e = jnp.exp(s - m)                               # unnormalized softmax
            l = jnp.sum(e, axis=-1, keepdims=True)
            o = jax.lax.dot_general(e.astype(bf16), v.astype(bf16),
                                    (((1,), (0,)), ((), ())),
                                    preferred_element_type=f32)      # (Lq, Dh)
            o = o * pl.reciprocal(l, approx=True)            # EUP reciprocal after PV
            # fused output projection: head h multiplies rows h*Dh:(h+1)*Dh of Wp
            acc = acc + jnp.dot(o.astype(bf16), wp_ref[h], preferred_element_type=f32)
        return acc + bp_ref[...]

    def add_ln(res, y, g_ref, b_ref):                        # LayerNorm(res + y), eps=1e-5
        t = res + y
        mu = jnp.mean(t, axis=-1, keepdims=True)
        d = t - mu
        var = jnp.mean(d * d, axis=-1, keepdims=True)
        return d * jax.lax.rsqrt(var + 1e-5) * g_ref[...] + b_ref[...]

    # ModuleList([DecoderLayer(...)] * n_blocks) shares ONE layer's params -> the whole
    # stack lives inside this kernel as a static unroll.
    for _ in range(n_blocks):
        xb = x.astype(bf16)
        sa = attend(xb, xb, tmask, sa_wqkv_ref, sa_bqkv_ref, sa_wp_ref, sa_bp_ref)
        x = add_ln(x, sa, ln1_g_ref, ln1_b_ref)

        xb = x.astype(bf16)
        ja = attend(xb, src_b, smask, ja_wqkv_ref, ja_bqkv_ref, ja_wp_ref, ja_bp_ref)
        x = add_ln(x, ja, ln2_g_ref, ln2_b_ref)

        h1 = jnp.maximum(mm(x, w1_ref[...]) + b1_ref[...], 0.0)   # Linear + ReLU (dropout=id)
        ff = mm(h1, w2_ref[...]) + b2_ref[...]
        x = add_ln(x, ff, ln3_g_ref, ln3_b_ref)

    # final vocab projection; output lane-padded to a multiple of 128 -> unmasked stores
    out_ref[0] = mm(x, fc_w_ref[...]) + fc_b_ref[...]


# ----------------------------- wrapper / param packing -----------------------------

def _pack_attention(p, n_heads, head_dim):
    """Pack (D,D) q/k/v/proj weights into head-major layouts consumed by the kernel."""
    D = n_heads * head_dim

    def w_heads(w):   # (D, D) -> (H, D, Dh): head h uses output cols h*Dh:(h+1)*Dh
        return jnp.transpose(w.reshape(D, n_heads, head_dim), (1, 0, 2))

    def b_heads(b):   # (D,) -> (H, 1, Dh)
        return b.reshape(n_heads, 1, head_dim)

    wqkv = jnp.concatenate([w_heads(p["wq"]), w_heads(p["wk"]), w_heads(p["wv"])],
                           axis=0).astype(jnp.bfloat16)                # (3H, D, Dh)
    bqkv = jnp.concatenate([b_heads(p["bq"]), b_heads(p["bk"]), b_heads(p["bv"])],
                           axis=0).astype(jnp.float32)                 # (3H, 1, Dh)
    wp = p["wp"].reshape(n_heads, head_dim, D).astype(jnp.bfloat16)    # (H, Dh, D)
    bp = p["bp"].reshape(1, D).astype(jnp.float32)
    return wqkv, bqkv, wp, bp


def decoder_forward(trg_tokens, src, trg_mask, src_mask, params, n_blocks, n_heads):
    N, Lt = trg_tokens.shape
    Ls = src.shape[1]
    D = params["tok_emb"].shape[1]
    Dh = D // n_heads
    V = params["fc_w"].shape[1]
    Vpad = ((V + 127) // 128) * 128
    scale = float(D) ** 0.5                        # embed_dim ** 0.5 (as in the module)

    # --- embeddings (gathers stay in plain JAX; dropout = identity) ---
    pos_e = params["pos_emb"][:Lt]                           # (Lt, D)
    tok_e = params["tok_emb"][trg_tokens] * scale            # (N, Lt, D)
    x = (pos_e[None, :, :] + tok_e).astype(jnp.float32)

    # --- masks: keep tiny (N,1,.,.) forms; no (N*H, Lq, Lk) broadcast in HBM ---
    if trg_mask is None:
        trg_mask = jnp.ones((N, 1, Lt, Lt), jnp.float32)
    if src_mask is None:
        src_mask = jnp.ones((N, 1, 1, Ls), jnp.float32)
    trg_mask = jnp.broadcast_to(trg_mask.astype(jnp.float32), (N, 1, Lt, Lt))
    src_mask = jnp.broadcast_to(src_mask.astype(jnp.float32), (N, 1, 1, Ls))

    # --- weights: bf16 matmul operands, f32 biases / LayerNorm params ---
    lp = params["layer"]
    sa_wqkv, sa_bqkv, sa_wp, sa_bp = _pack_attention(lp["self_attn"], n_heads, Dh)
    ja_wqkv, ja_bqkv, ja_wp, ja_bp = _pack_attention(lp["joint_attn"], n_heads, Dh)
    ln1_g, ln1_b = lp["ln1_g"].reshape(1, D), lp["ln1_b"].reshape(1, D)
    ln2_g, ln2_b = lp["ln2_g"].reshape(1, D), lp["ln2_b"].reshape(1, D)
    ln3_g, ln3_b = lp["ln3_g"].reshape(1, D), lp["ln3_b"].reshape(1, D)
    w1 = lp["w1"].astype(jnp.bfloat16)
    b1 = lp["b1"].reshape(1, -1).astype(jnp.float32)
    w2 = lp["w2"].astype(jnp.bfloat16)
    b2 = lp["b2"].reshape(1, -1).astype(jnp.float32)
    fc_w = jnp.pad(params["fc_w"], ((0, 0), (0, Vpad - V))).astype(jnp.bfloat16)
    fc_b = jnp.pad(params["fc_b"], (0, Vpad - V)).reshape(1, Vpad).astype(jnp.float32)

    weights = (sa_wqkv, sa_bqkv, sa_wp, sa_bp, ln1_g, ln1_b,
               ja_wqkv, ja_bqkv, ja_wp, ja_bp, ln2_g, ln2_b,
               w1, b1, w2, b2, ln3_g, ln3_b, fc_w, fc_b)

    def shared(arr):   # resident weight block: same block index for every grid step
        nd = arr.ndim
        return pl.BlockSpec(arr.shape, lambda b: (0,) * nd)

    kern = functools.partial(_decoder_kernel, n_blocks=n_blocks, n_heads=n_heads,
                             head_dim=Dh, inv_scale=1.0 / scale)

    logits_padded = pl.pallas_call(
        kern,
        out_shape=jax.ShapeDtypeStruct((N, Lt, Vpad), jnp.float32),
        grid=(N,),                      # batch axis; "parallel" -> both TCs on v7x
        in_specs=[
            pl.BlockSpec((1, Lt, D), lambda b: (b, 0, 0)),
            pl.BlockSpec((1, Ls, D), lambda b: (b, 0, 0)),
            pl.BlockSpec((1, 1, Lt, Lt), lambda b: (b, 0, 0, 0)),
            pl.BlockSpec((1, 1, 1, Ls), lambda b: (b, 0, 0, 0)),
        ] + [shared(w) for w in weights],
        out_specs=pl.BlockSpec((1, Lt, Vpad), lambda b: (b, 0, 0)),
        compiler_params=pltpu.CompilerParams(
            dimension_semantics=("parallel",),
            vmem_limit_bytes=32 * 1024 * 1024),   # explicit, safe on v5e/v6e/v7x
    )(x, src.astype(jnp.float32), trg_mask, src_mask, *weights)

    return logits_padded[:, :, :V]                # slice vocab padding back off


# ------------------------------ Param init ------------------------------

def init_params(key, vocab_size, embed_dim, ff_hid_dim, max_length):
    ks = jax.random.split(key, 20)
    n = lambda k, s: (0.02 * jax.random.normal(k, s)).astype(jnp.float32)
    z = lambda s: jnp.zeros(s, jnp.float32)
    o = lambda s: jnp.ones(s, jnp.float32)

    def attn_params(k):
        kk = jax.random.split(k, 4)
        return {"wq": n(kk[0], (embed_dim, embed_dim)), "bq": z((embed_dim,)),
                "wk": n(kk[1], (embed_dim, embed_dim)), "bk": z((embed_dim,)),
                "wv": n(kk[2], (embed_dim, embed_dim)), "bv": z((embed_dim,)),
                "wp": n(kk[3], (embed_dim, embed_dim)), "bp": z((embed_dim,))}

    layer = {
        "self_attn": attn_params(ks[0]),
        "joint_attn": attn_params(ks[1]),
        "ln1_g": o((embed_dim,)), "ln1_b": z((embed_dim,)),
        "ln2_g": o((embed_dim,)), "ln2_b": z((embed_dim,)),
        "ln3_g": o((embed_dim,)), "ln3_b": z((embed_dim,)),
        "w1": n(ks[2], (embed_dim, ff_hid_dim)), "b1": z((ff_hid_dim,)),
        "w2": n(ks[3], (ff_hid_dim, embed_dim)), "b2": z((embed_dim,)),
    }
    return {
        "tok_emb": n(ks[4], (vocab_size, embed_dim)),
        "pos_emb": n(ks[5], (max_length, embed_dim)),
        "layer": layer,
        "fc_w": n(ks[6], (embed_dim, vocab_size)),
        "fc_b": z((vocab_size,)),
    }


# ------------------------------ Main ------------------------------

if __name__ == "__main__":
    vocab_size, embed_dim, n_blocks, n_heads = 50, 32, 2, 4
    ff_hid_dim, max_length = 64, 16
    N, trg_len, src_len = 2, 8, 8

    root = jax.random.PRNGKey(0)
    k_par, k_trg, k_src = jax.random.split(root, 3)

    params = init_params(k_par, vocab_size, embed_dim, ff_hid_dim, max_length)

    trg = jax.random.randint(k_trg, (N, trg_len), 0, vocab_size, dtype=jnp.int32)
    src = jax.random.normal(k_src, (N, src_len, embed_dim), dtype=jnp.float32)
    # causal target mask (N,1,Lt,Lt), full source mask (N,1,1,Ls)
    trg_mask = jnp.broadcast_to(jnp.tril(jnp.ones((trg_len, trg_len), jnp.float32)),
                                (N, 1, trg_len, trg_len))
    src_mask = jnp.ones((N, 1, 1, src_len), jnp.float32)

    fwd = jax.jit(functools.partial(decoder_forward, n_blocks=n_blocks, n_heads=n_heads))
    out = fwd(trg, src, trg_mask, src_mask, params)
    out = jax.block_until_ready(out)
    assert out.shape == (N, trg_len, vocab_size)
    assert bool(jnp.all(jnp.isfinite(out)))
    print("KERNEL_OK")
</pallas_src>

<mosaic_0001>
module attributes {stable_mosaic.version = 11 : i64} {
  func.func @_decoder_kernel(%arg0: i32, %arg1: memref<1x8x32xf32, #tpu.memory_space<vmem>>, %arg2: memref<1x8x32xf32, #tpu.memory_space<vmem>>, %arg3: memref<1x1x8x8xf32, #tpu.memory_space<vmem>>, %arg4: memref<1x1x1x8xf32, #tpu.memory_space<vmem>>, %arg5: memref<12x32x8xbf16, #tpu.memory_space<vmem>>, %arg6: memref<12x1x8xf32, #tpu.memory_space<vmem>>, %arg7: memref<4x8x32xbf16, #tpu.memory_space<vmem>>, %arg8: memref<1x32xf32, #tpu.memory_space<vmem>>, %arg9: memref<1x32xf32, #tpu.memory_space<vmem>>, %arg10: memref<1x32xf32, #tpu.memory_space<vmem>>, %arg11: memref<12x32x8xbf16, #tpu.memory_space<vmem>>, %arg12: memref<12x1x8xf32, #tpu.memory_space<vmem>>, %arg13: memref<4x8x32xbf16, #tpu.memory_space<vmem>>, %arg14: memref<1x32xf32, #tpu.memory_space<vmem>>, %arg15: memref<1x32xf32, #tpu.memory_space<vmem>>, %arg16: memref<1x32xf32, #tpu.memory_space<vmem>>, %arg17: memref<32x64xbf16, #tpu.memory_space<vmem>>, %arg18: memref<1x64xf32, #tpu.memory_space<vmem>>, %arg19: memref<64x32xbf16, #tpu.memory_space<vmem>>, %arg20: memref<1x32xf32, #tpu.memory_space<vmem>>, %arg21: memref<1x32xf32, #tpu.memory_space<vmem>>, %arg22: memref<1x32xf32, #tpu.memory_space<vmem>>, %arg23: memref<32x128xbf16, #tpu.memory_space<vmem>>, %arg24: memref<1x128xf32, #tpu.memory_space<vmem>>, %arg25: memref<1x8x128xf32, #tpu.memory_space<vmem>>) attributes {dimension_semantics = [#tpu.dimension_semantics<parallel>], iteration_bounds = array<i64: 2>, scalar_prefetch = 0 : i64, scratch_operands = 0 : i64, tpu.core_type = #tpu.core_type<tc>, window_params = [{transform_indices = @transform_0, window_bounds = array<i64: 1, 8, 32>}, {transform_indices = @transform_1, window_bounds = array<i64: 1, 8, 32>}, {transform_indices = @transform_2, window_bounds = array<i64: 1, 1, 8, 8>}, {transform_indices = @transform_3, window_bounds = array<i64: 1, 1, 1, 8>}, {pipeline_mode = #tpu.pipeline_mode<synchronous>, transform_indices = @transform_4, window_bounds = array<i64: 12, 32, 8>}, {pipeline_mode = #tpu.pipeline_mode<synchronous>, transform_indices = @transform_5, window_bounds = array<i64: 12, 1, 8>}, {pipeline_mode = #tpu.pipeline_mode<synchronous>, transform_indices = @transform_6, window_bounds = array<i64: 4, 8, 32>}, {pipeline_mode = #tpu.pipeline_mode<synchronous>, transform_indices = @transform_7, window_bounds = array<i64: 1, 32>}, {pipeline_mode = #tpu.pipeline_mode<synchronous>, transform_indices = @transform_8, window_bounds = array<i64: 1, 32>}, {pipeline_mode = #tpu.pipeline_mode<synchronous>, transform_indices = @transform_9, window_bounds = array<i64: 1, 32>}, {pipeline_mode = #tpu.pipeline_mode<synchronous>, transform_indices = @transform_10, window_bounds = array<i64: 12, 32, 8>}, {pipeline_mode = #tpu.pipeline_mode<synchronous>, transform_indices = @transform_11, window_bounds = array<i64: 12, 1, 8>}, {pipeline_mode = #tpu.pipeline_mode<synchronous>, transform_indices = @transform_12, window_bounds = array<i64: 4, 8, 32>}, {pipeline_mode = #tpu.pipeline_mode<synchronous>, transform_indices = @transform_13, window_bounds = array<i64: 1, 32>}, {pipeline_mode = #tpu.pipeline_mode<synchronous>, transform_indices = @transform_14, window_bounds = array<i64: 1, 32>}, {pipeline_mode = #tpu.pipeline_mode<synchronous>, transform_indices = @transform_15, window_bounds = array<i64: 1, 32>}, {pipeline_mode = #tpu.pipeline_mode<synchronous>, transform_indices = @transform_16, window_bounds = array<i64: 32, 64>}, {pipeline_mode = #tpu.pipeline_mode<synchronous>, transform_indices = @transform_17, window_bounds = array<i64: 1, 64>}, {pipeline_mode = #tpu.pipeline_mode<synchronous>, transform_indices = @transform_18, window_bounds = array<i64: 64, 32>}, {pipeline_mode = #tpu.pipeline_mode<synchronous>, transform_indices = @transform_19, window_bounds = array<i64: 1, 32>}, {pipeline_mode = #tpu.pipeline_mode<synchronous>, transform_indices = @transform_20, window_bounds = array<i64: 1, 32>}, {pipeline_mode = #tpu.pipeline_mode<synchronous>, transform_indices = @transform_21, window_bounds = array<i64: 1, 32>}, {pipeline_mode = #tpu.pipeline_mode<synchronous>, transform_indices = @transform_22, window_bounds = array<i64: 32, 128>}, {pipeline_mode = #tpu.pipeline_mode<synchronous>, transform_indices = @transform_23, window_bounds = array<i64: 1, 128>}, {transform_indices = @transform_24, window_bounds = array<i64: 1, 8, 128>}]} {
    %c0 = arith.constant 0 : index
    %c0_0 = arith.constant 0 : index
    %c0_1 = arith.constant 0 : index
    %0 = vector.load %arg1[%c0, %c0_0, %c0_1] : memref<1x8x32xf32, #tpu.memory_space<vmem>>, vector<1x8x32xf32>
    %1 = vector.shape_cast %0 : vector<1x8x32xf32> to vector<8x32xf32>
    %c0_2 = arith.constant 0 : index
    %c0_3 = arith.constant 0 : index
    %c0_4 = arith.constant 0 : index
    %2 = vector.load %arg2[%c0_2, %c0_3, %c0_4] : memref<1x8x32xf32, #tpu.memory_space<vmem>>, vector<1x8x32xf32>
    %3 = vector.shape_cast %2 : vector<1x8x32xf32> to vector<8x32xf32>
    %4 = arith.truncf %3 : vector<8x32xf32> to vector<8x32xbf16>
    %c0_5 = arith.constant 0 : index
    %c0_6 = arith.constant 0 : index
    %c0_7 = arith.constant 0 : index
    %c0_8 = arith.constant 0 : index
    %5 = vector.load %arg3[%c0_5, %c0_6, %c0_7, %c0_8] : memref<1x1x8x8xf32, #tpu.memory_space<vmem>>, vector<1x1x8x8xf32>
    %6 = vector.shape_cast %5 : vector<1x1x8x8xf32> to vector<8x8xf32>
    %c0_9 = arith.constant 0 : index
    %c0_10 = arith.constant 0 : index
    %c0_11 = arith.constant 0 : index
    %c0_12 = arith.constant 0 : index
    %7 = vector.load %arg4[%c0_9, %c0_10, %c0_11, %c0_12] : memref<1x1x1x8xf32, #tpu.memory_space<vmem>>, vector<1x1x1x8xf32>
    %8 = vector.shape_cast %7 : vector<1x1x1x8xf32> to vector<1x8xf32>
    %9 = arith.truncf %1 : vector<8x32xf32> to vector<8x32xbf16>
    %cst = arith.constant 0.000000e+00 : f32
    %10 = vector.broadcast %cst : f32 to vector<8x32xf32>
    %c0_13 = arith.constant 0 : index
    %c0_14 = arith.constant 0 : index
    %c0_15 = arith.constant 0 : index
    %11 = vector.load %arg5[%c0_13, %c0_14, %c0_15] : memref<12x32x8xbf16, #tpu.memory_space<vmem>>, vector<1x32x8xbf16>
    %12 = vector.shape_cast %11 : vector<1x32x8xbf16> to vector<32x8xbf16>
    %cst_16 = arith.constant dense<0.000000e+00> : vector<8x8xf32>
    %13 = tpu.matmul %9, %12, %cst_16 {dimension_numbers = #tpu.dot_dimension_numbers<[1], [0], [0], [1], [0, 0, 1, 1], [], []>} : vector<8x32xbf16>, vector<32x8xbf16>, vector<8x8xf32> -> vector<8x8xf32>
    %c0_17 = arith.constant 0 : index
    %c0_18 = arith.constant 0 : index
    %c0_19 = arith.constant 0 : index
    %14 = vector.load %arg6[%c0_17, %c0_18, %c0_19] : memref<12x1x8xf32, #tpu.memory_space<vmem>>, vector<1x1x8xf32>
    %15 = vector.shape_cast %14 : vector<1x1x8xf32> to vector<1x8xf32>
    %16 = vector.broadcast %15 : vector<1x8xf32> to vector<8x8xf32>
    %17 = arith.addf %13, %16 : vector<8x8xf32>
    %c4 = arith.constant 4 : index
    %c0_20 = arith.constant 0 : index
    %c0_21 = arith.constant 0 : index
    %18 = vector.load %arg5[%c4, %c0_20, %c0_21] : memref<12x32x8xbf16, #tpu.memory_space<vmem>>, vector<1x32x8xbf16>
    %19 = vector.shape_cast %18 : vector<1x32x8xbf16> to vector<32x8xbf16>
    %cst_22 = arith.constant dense<0.000000e+00> : vector<8x8xf32>
    %20 = tpu.matmul %9, %19, %cst_22 {dimension_numbers = #tpu.dot_dimension_numbers<[1], [0], [0], [1], [0, 0, 1, 1], [], []>} : vector<8x32xbf16>, vector<32x8xbf16>, vector<8x8xf32> -> vector<8x8xf32>
    %c4_23 = arith.constant 4 : index
    %c0_24 = arith.constant 0 : index
    %c0_25 = arith.constant 0 : index
    %21 = vector.load %arg6[%c4_23, %c0_24, %c0_25] : memref<12x1x8xf32, #tpu.memory_space<vmem>>, vector<1x1x8xf32>
    %22 = vector.shape_cast %21 : vector<1x1x8xf32> to vector<1x8xf32>
    %23 = vector.broadcast %22 : vector<1x8xf32> to vector<8x8xf32>
    %24 = arith.addf %20, %23 : vector<8x8xf32>
    %c8 = arith.constant 8 : index
    %c0_26 = arith.constant 0 : index
    %c0_27 = arith.constant 0 : index
    %25 = vector.load %arg5[%c8, %c0_26, %c0_27] : memref<12x32x8xbf16, #tpu.memory_space<vmem>>, vector<1x32x8xbf16>
    %26 = vector.shape_cast %25 : vector<1x32x8xbf16> to vector<32x8xbf16>
    %cst_28 = arith.constant dense<0.000000e+00> : vector<8x8xf32>
    %27 = tpu.matmul %9, %26, %cst_28 {dimension_numbers = #tpu.dot_dimension_numbers<[1], [0], [0], [1], [0, 0, 1, 1], [], []>} : vector<8x32xbf16>, vector<32x8xbf16>, vector<8x8xf32> -> vector<8x8xf32>
    %c8_29 = arith.constant 8 : index
    %c0_30 = arith.constant 0 : index
    %c0_31 = arith.constant 0 : index
    %28 = vector.load %arg6[%c8_29, %c0_30, %c0_31] : memref<12x1x8xf32, #tpu.memory_space<vmem>>, vector<1x1x8xf32>
    %29 = vector.shape_cast %28 : vector<1x1x8xf32> to vector<1x8xf32>
    %30 = vector.broadcast %29 : vector<1x8xf32> to vector<8x8xf32>
    %31 = arith.addf %27, %30 : vector<8x8xf32>
    %cst_32 = arith.constant 0.176776692 : f32
    %32 = vector.broadcast %cst_32 : f32 to vector<8x8xf32>
    %33 = arith.mulf %17, %32 : vector<8x8xf32>
    %34 = arith.truncf %33 : vector<8x8xf32> to vector<8x8xbf16>
    %35 = arith.truncf %24 : vector<8x8xf32> to vector<8x8xbf16>
    %cst_33 = arith.constant dense<0.000000e+00> : vector<8x8xf32>
    %36 = tpu.matmul %34, %35, %cst_33 {dimension_numbers = #tpu.dot_dimension_numbers<[1], [1], [0], [0], [0, 0, 1, 0], [], []>} : vector<8x8xbf16>, vector<8x8xbf16>, vector<8x8xf32> -> vector<8x8xf32>
    %cst_34 = arith.constant 0.000000e+00 : f32
    %37 = vector.broadcast %cst_34 : f32 to vector<8x8xf32>
    %38 = arith.cmpf oeq, %6, %37 : vector<8x8xf32>
    %cst_35 = arith.constant -1.000000e+20 : f32
    %39 = vector.broadcast %cst_35 : f32 to vector<8x8xf32>
    %40 = arith.select %38, %39, %36 : vector<8x8xi1>, vector<8x8xf32>
    %cst_36 = arith.constant dense<0xFF800000> : vector<8xf32>
    %41 = vector.multi_reduction <maximumf>, %40, %cst_36 [1] : vector<8x8xf32> to vector<8xf32>
    %42 = vector.shape_cast %41 : vector<8xf32> to vector<8x1xf32>
    %43 = vector.broadcast %42 : vector<8x1xf32> to vector<8x8xf32>
    %44 = arith.subf %40, %43 : vector<8x8xf32>
    %45 = math.exp %44 : vector<8x8xf32>
    %cst_37 = arith.constant dense<0.000000e+00> : vector<8xf32>
    %46 = vector.multi_reduction <add>, %45, %cst_37 [1] : vector<8x8xf32> to vector<8xf32>
    %47 = vector.shape_cast %46 : vector<8xf32> to vector<8x1xf32>
    %48 = arith.truncf %45 : vector<8x8xf32> to vector<8x8xbf16>
    %49 = arith.truncf %31 : vector<8x8xf32> to vector<8x8xbf16>
    %cst_38 = arith.constant dense<0.000000e+00> : vector<8x8xf32>
    %50 = tpu.matmul %48, %49, %cst_38 {dimension_numbers = #tpu.dot_dimension_numbers<[1], [0], [0], [1], [0, 0, 1, 1], [], []>} : vector<8x8xbf16>, vector<8x8xbf16>, vector<8x8xf32> -> vector<8x8xf32>
    %51 = tpu.reciprocal %47 {approx = true} : vector<8x1xf32> -> vector<8x1xf32>
    %52 = vector.broadcast %51 : vector<8x1xf32> to vector<8x8xf32>
    %53 = arith.mulf %50, %52 : vector<8x8xf32>
    %54 = arith.truncf %53 : vector<8x8xf32> to vector<8x8xbf16>
    %c0_39 = arith.constant 0 : index
    %c0_40 = arith.constant 0 : index
    %c0_41 = arith.constant 0 : index
    %55 = vector.load %arg7[%c0_39, %c0_40, %c0_41] : memref<4x8x32xbf16, #tpu.memory_space<vmem>>, vector<1x8x32xbf16>
    %56 = vector.shape_cast %55 : vector<1x8x32xbf16> to vector<8x32xbf16>
    %cst_42 = arith.constant dense<0.000000e+00> : vector<8x32xf32>
    %57 = tpu.matmul %54, %56, %cst_42 {dimension_numbers = #tpu.dot_dimension_numbers<[1], [0], [0], [1], [0, 0, 1, 1], [], []>} : vector<8x8xbf16>, vector<8x32xbf16>, vector<8x32xf32> -> vector<8x32xf32>
    %58 = arith.addf %10, %57 : vector<8x32xf32>
    %c1 = arith.constant 1 : index
    %c0_43 = arith.constant 0 : index
    %c0_44 = arith.constant 0 : index
    %59 = vector.load %arg5[%c1, %c0_43, %c0_44] : memref<12x32x8xbf16, #tpu.memory_space<vmem>>, vector<1x32x8xbf16>
    %60 = vector.shape_cast %59 : vector<1x32x8xbf16> to vector<32x8xbf16>
    %cst_45 = arith.constant dense<0.000000e+00> : vector<8x8xf32>
    %61 = tpu.matmul %9, %60, %cst_45 {dimension_numbers = #tpu.dot_dimension_numbers<[1], [0], [0], [1], [0, 0, 1, 1], [], []>} : vector<8x32xbf16>, vector<32x8xbf16>, vector<8x8xf32> -> vector<8x8xf32>
    %c1_46 = arith.constant 1 : index
    %c0_47 = arith.constant 0 : index
    %c0_48 = arith.constant 0 : index
    %62 = vector.load %arg6[%c1_46, %c0_47, %c0_48] : memref<12x1x8xf32, #tpu.memory_space<vmem>>, vector<1x1x8xf32>
    %63 = vector.shape_cast %62 : vector<1x1x8xf32> to vector<1x8xf32>
    %64 = vector.broadcast %63 : vector<1x8xf32> to vector<8x8xf32>
    %65 = arith.addf %61, %64 : vector<8x8xf32>
    %c5 = arith.constant 5 : index
    %c0_49 = arith.constant 0 : index
    %c0_50 = arith.constant 0 : index
    %66 = vector.load %arg5[%c5, %c0_49, %c0_50] : memref<12x32x8xbf16, #tpu.memory_space<vmem>>, vector<1x32x8xbf16>
    %67 = vector.shape_cast %66 : vector<1x32x8xbf16> to vector<32x8xbf16>
    %cst_51 = arith.constant dense<0.000000e+00> : vector<8x8xf32>
    %68 = tpu.matmul %9, %67, %cst_51 {dimension_numbers = #tpu.dot_dimension_numbers<[1], [0], [0], [1], [0, 0, 1, 1], [], []>} : vector<8x32xbf16>, vector<32x8xbf16>, vector<8x8xf32> -> vector<8x8xf32>
    %c5_52 = arith.constant 5 : index
    %c0_53 = arith.constant 0 : index
    %c0_54 = arith.constant 0 : index
    %69 = vector.load %arg6[%c5_52, %c0_53, %c0_54] : memref<12x1x8xf32, #tpu.memory_space<vmem>>, vector<1x1x8xf32>
    %70 = vector.shape_cast %69 : vector<1x1x8xf32> to vector<1x8xf32>
    %71 = vector.broadcast %70 : vector<1x8xf32> to vector<8x8xf32>
    %72 = arith.addf %68, %71 : vector<8x8xf32>
    %c9 = arith.constant 9 : index
    %c0_55 = arith.constant 0 : index
    %c0_56 = arith.constant 0 : index
    %73 = vector.load %arg5[%c9, %c0_55, %c0_56] : memref<12x32x8xbf16, #tpu.memory_space<vmem>>, vector<1x32x8xbf16>
    %74 = vector.shape_cast %73 : vector<1x32x8xbf16> to vector<32x8xbf16>
    %cst_57 = arith.constant dense<0.000000e+00> : vector<8x8xf32>
    %75 = tpu.matmul %9, %74, %cst_57 {dimension_numbers = #tpu.dot_dimension_numbers<[1], [0], [0], [1], [0, 0, 1, 1], [], []>} : vector<8x32xbf16>, vector<32x8xbf16>, vector<8x8xf32> -> vector<8x8xf32>
    %c9_58 = arith.constant 9 : index
    %c0_59 = arith.constant 0 : index
    %c0_60 = arith.constant 0 : index
    %76 = vector.load %arg6[%c9_58, %c0_59, %c0_60] : memref<12x1x8xf32, #tpu.memory_space<vmem>>, vector<1x1x8xf32>
    %77 = vector.shape_cast %76 : vector<1x1x8xf32> to vector<1x8xf32>
    %78 = vector.broadcast %77 : vector<1x8xf32> to vector<8x8xf32>
    %79 = arith.addf %75, %78 : vector<8x8xf32>
    %cst_61 = arith.constant 0.176776692 : f32
    %80 = vector.broadcast %cst_61 : f32 to vector<8x8xf32>
    %81 = arith.mulf %65, %80 : vector<8x8xf32>
    %82 = arith.truncf %81 : vector<8x8xf32> to vector<8x8xbf16>
    %83 = arith.truncf %72 : vector<8x8xf32> to vector<8x8xbf16>
    %cst_62 = arith.constant dense<0.000000e+00> : vector<8x8xf32>
    %84 = tpu.matmul %82, %83, %cst_62 {dimension_numbers = #tpu.dot_dimension_numbers<[1], [1], [0], [0], [0, 0, 1, 0], [], []>} : vector<8x8xbf16>, vector<8x8xbf16>, vector<8x8xf32> -> vector<8x8xf32>
    %cst_63 = arith.constant 0.000000e+00 : f32
    %85 = vector.broadcast %cst_63 : f32 to vector<8x8xf32>
    %86 = arith.cmpf oeq, %6, %85 : vector<8x8xf32>
    %cst_64 = arith.constant -1.000000e+20 : f32
    %87 = vector.broadcast %cst_64 : f32 to vector<8x8xf32>
    %88 = arith.select %86, %87, %84 : vector<8x8xi1>, vector<8x8xf32>
    %cst_65 = arith.constant dense<0xFF800000> : vector<8xf32>
    %89 = vector.multi_reduction <maximumf>, %88, %cst_65 [1] : vector<8x8xf32> to vector<8xf32>
    %90 = vector.shape_cast %89 : vector<8xf32> to vector<8x1xf32>
    %91 = vector.broadcast %90 : vector<8x1xf32> to vector<8x8xf32>
    %92 = arith.subf %88, %91 : vector<8x8xf32>
    %93 = math.exp %92 : vector<8x8xf32>
    %cst_66 = arith.constant dense<0.000000e+00> : vector<8xf32>
    %94 = vector.multi_reduction <add>, %93, %cst_66 [1] : vector<8x8xf32> to vector<8xf32>
    %95 = vector.shape_cast %94 : vector<8xf32> to vector<8x1xf32>
    %96 = arith.truncf %93 : vector<8x8xf32> to vector<8x8xbf16>
    %97 = arith.truncf %79 : vector<8x8xf32> to vector<8x8xbf16>
    %cst_67 = arith.constant dense<0.000000e+00> : vector<8x8xf32>
    %98 = tpu.matmul %96, %97, %cst_67 {dimension_numbers = #tpu.dot_dimension_numbers<[1], [0], [0], [1], [0, 0, 1, 1], [], []>} : vector<8x8xbf16>, vector<8x8xbf16>, vector<8x8xf32> -> vector<8x8xf32>
    %99 = tpu.reciprocal %95 {approx = true} : vector<8x1xf32> -> vector<8x1xf32>
    %100 = vector.broadcast %99 : vector<8x1xf32> to vector<8x8xf32>
    %101 = arith.mulf %98, %100 : vector<8x8xf32>
    %102 = arith.truncf %101 : vector<8x8xf32> to vector<8x8xbf16>
    %c1_68 = arith.constant 1 : index
    %c0_69 = arith.constant 0 : index
    %c0_70 = arith.constant 0 : index
    %103 = vector.load %arg7[%c1_68, %c0_69, %c0_70] : memref<4x8x32xbf16, #tpu.memory_space<vmem>>, vector<1x8x32xbf16>
    %104 = vector.shape_cast %103 : vector<1x8x32xbf16> to vector<8x32xbf16>
    %cst_71 = arith.constant dense<0.000000e+00> : vector<8x32xf32>
    %105 = tpu.matmul %102, %104, %cst_71 {dimension_numbers = #tpu.dot_dimension_numbers<[1], [0], [0], [1], [0, 0, 1, 1], [], []>} : vector<8x8xbf16>, vector<8x32xbf16>, vector<8x32xf32> -> vector<8x32xf32>
    %106 = arith.addf %58, %105 : vector<8x32xf32>
    %c2 = arith.constant 2 : index
    %c0_72 = arith.constant 0 : index
    %c0_73 = arith.constant 0 : index
    %107 = vector.load %arg5[%c2, %c0_72, %c0_73] : memref<12x32x8xbf16, #tpu.memory_space<vmem>>, vector<1x32x8xbf16>
    %108 = vector.shape_cast %107 : vector<1x32x8xbf16> to vector<32x8xbf16>
    %cst_74 = arith.constant dense<0.000000e+00> : vector<8x8xf32>
    %109 = tpu.matmul %9, %108, %cst_74 {dimension_numbers = #tpu.dot_dimension_numbers<[1], [0], [0], [1], [0, 0, 1, 1], [], []>} : vector<8x32xbf16>, vector<32x8xbf16>, vector<8x8xf32> -> vector<8x8xf32>
    %c2_75 = arith.constant 2 : index
    %c0_76 = arith.constant 0 : index
    %c0_77 = arith.constant 0 : index
    %110 = vector.load %arg6[%c2_75, %c0_76, %c0_77] : memref<12x1x8xf32, #tpu.memory_space<vmem>>, vector<1x1x8xf32>
    %111 = vector.shape_cast %110 : vector<1x1x8xf32> to vector<1x8xf32>
    %112 = vector.broadcast %111 : vector<1x8xf32> to vector<8x8xf32>
    %113 = arith.addf %109, %112 : vector<8x8xf32>
    %c6 = arith.constant 6 : index
    %c0_78 = arith.constant 0 : index
    %c0_79 = arith.constant 0 : index
    %114 = vector.load %arg5[%c6, %c0_78, %c0_79] : memref<12x32x8xbf16, #tpu.memory_space<vmem>>, vector<1x32x8xbf16>
    %115 = vector.shape_cast %114 : vector<1x32x8xbf16> to vector<32x8xbf16>
    %cst_80 = arith.constant dense<0.000000e+00> : vector<8x8xf32>
    %116 = tpu.matmul %9, %115, %cst_80 {dimension_numbers = #tpu.dot_dimension_numbers<[1], [0], [0], [1], [0, 0, 1, 1], [], []>} : vector<8x32xbf16>, vector<32x8xbf16>, vector<8x8xf32> -> vector<8x8xf32>
    %c6_81 = arith.constant 6 : index
    %c0_82 = arith.constant 0 : index
    %c0_83 = arith.constant 0 : index
    %117 = vector.load %arg6[%c6_81, %c0_82, %c0_83] : memref<12x1x8xf32, #tpu.memory_space<vmem>>, vector<1x1x8xf32>
    %118 = vector.shape_cast %117 : vector<1x1x8xf32> to vector<1x8xf32>
    %119 = vector.broadcast %118 : vector<1x8xf32> to vector<8x8xf32>
    %120 = arith.addf %116, %119 : vector<8x8xf32>
    %c10 = arith.constant 10 : index
    %c0_84 = arith.constant 0 : index
    %c0_85 = arith.constant 0 : index
    %121 = vector.load %arg5[%c10, %c0_84, %c0_85] : memref<12x32x8xbf16, #tpu.memory_space<vmem>>, vector<1x32x8xbf16>
    %122 = vector.shape_cast %121 : vector<1x32x8xbf16> to vector<32x8xbf16>
    %cst_86 = arith.constant dense<0.000000e+00> : vector<8x8xf32>
    %123 = tpu.matmul %9, %122, %cst_86 {dimension_numbers = #tpu.dot_dimension_numbers<[1], [0], [0], [1], [0, 0, 1, 1], [], []>} : vector<8x32xbf16>, vector<32x8xbf16>, vector<8x8xf32> -> vector<8x8xf32>
    %c10_87 = arith.constant 10 : index
    %c0_88 = arith.constant 0 : index
    %c0_89 = arith.constant 0 : index
    %124 = vector.load %arg6[%c10_87, %c0_88, %c0_89] : memref<12x1x8xf32, #tpu.memory_space<vmem>>, vector<1x1x8xf32>
    %125 = vector.shape_cast %124 : vector<1x1x8xf32> to vector<1x8xf32>
    %126 = vector.broadcast %125 : vector<1x8xf32> to vector<8x8xf32>
    %127 = arith.addf %123, %126 : vector<8x8xf32>
    %cst_90 = arith.constant 0.176776692 : f32
    %128 = vector.broadcast %cst_90 : f32 to vector<8x8xf32>
    %129 = arith.mulf %113, %128 : vector<8x8xf32>
    %130 = arith.truncf %129 : vector<8x8xf32> to vector<8x8xbf16>
    %131 = arith.truncf %120 : vector<8x8xf32> to vector<8x8xbf16>
    %cst_91 = arith.constant dense<0.000000e+00> : vector<8x8xf32>
    %132 = tpu.matmul %130, %131, %cst_91 {dimension_numbers = #tpu.dot_dimension_numbers<[1], [1], [0], [0], [0, 0, 1, 0], [], []>} : vector<8x8xbf16>, vector<8x8xbf16>, vector<8x8xf32> -> vector<8x8xf32>
    %cst_92 = arith.constant 0.000000e+00 : f32
    %133 = vector.broadcast %cst_92 : f32 to vector<8x8xf32>
    %134 = arith.cmpf oeq, %6, %133 : vector<8x8xf32>
    %cst_93 = arith.constant -1.000000e+20 : f32
    %135 = vector.broadcast %cst_93 : f32 to vector<8x8xf32>
    %136 = arith.select %134, %135, %132 : vector<8x8xi1>, vector<8x8xf32>
    %cst_94 = arith.constant dense<0xFF800000> : vector<8xf32>
    %137 = vector.multi_reduction <maximumf>, %136, %cst_94 [1] : vector<8x8xf32> to vector<8xf32>
    %138 = vector.shape_cast %137 : vector<8xf32> to vector<8x1xf32>
    %139 = vector.broadcast %138 : vector<8x1xf32> to vector<8x8xf32>
    %140 = arith.subf %136, %139 : vector<8x8xf32>
    %141 = math.exp %140 : vector<8x8xf32>
    %cst_95 = arith.constant dense<0.000000e+00> : vector<8xf32>
    %142 = vector.multi_reduction <add>, %141, %cst_95 [1] : vector<8x8xf32> to vector<8xf32>
    %143 = vector.shape_cast %142 : vector<8xf32> to vector<8x1xf32>
    %144 = arith.truncf %141 : vector<8x8xf32> to vector<8x8xbf16>
    %145 = arith.truncf %127 : vector<8x8xf32> to vector<8x8xbf16>
    %cst_96 = arith.constant dense<0.000000e+00> : vector<8x8xf32>
    %146 = tpu.matmul %144, %145, %cst_96 {dimension_numbers = #tpu.dot_dimension_numbers<[1], [0], [0], [1], [0, 0, 1, 1], [], []>} : vector<8x8xbf16>, vector<8x8xbf16>, vector<8x8xf32> -> vector<8x8xf32>
    %147 = tpu.reciprocal %143 {approx = true} : vector<8x1xf32> -> vector<8x1xf32>
    %148 = vector.broadcast %147 : vector<8x1xf32> to vector<8x8xf32>
    %149 = arith.mulf %146, %148 : vector<8x8xf32>
    %150 = arith.truncf %149 : vector<8x8xf32> to vector<8x8xbf16>
    %c2_97 = arith.constant 2 : index
    %c0_98 = arith.constant 0 : index
    %c0_99 = arith.constant 0 : index
    %151 = vector.load %arg7[%c2_97, %c0_98, %c0_99] : memref<4x8x32xbf16, #tpu.memory_space<vmem>>, vector<1x8x32xbf16>
    %152 = vector.shape_cast %151 : vector<1x8x32xbf16> to vector<8x32xbf16>
    %cst_100 = arith.constant dense<0.000000e+00> : vector<8x32xf32>
    %153 = tpu.matmul %150, %152, %cst_100 {dimension_numbers = #tpu.dot_dimension_numbers<[1], [0], [0], [1], [0, 0, 1, 1], [], []>} : vector<8x8xbf16>, vector<8x32xbf16>, vector<8x32xf32> -> vector<8x32xf32>
    %154 = arith.addf %106, %153 : vector<8x32xf32>
    %c3 = arith.constant 3 : index
    %c0_101 = arith.constant 0 : index
    %c0_102 = arith.constant 0 : index
    %155 = vector.load %arg5[%c3, %c0_101, %c0_102] : memref<12x32x8xbf16, #tpu.memory_space<vmem>>, vector<1x32x8xbf16>
    %156 = vector.shape_cast %155 : vector<1x32x8xbf16> to vector<32x8xbf16>
    %cst_103 = arith.constant dense<0.000000e+00> : vector<8x8xf32>
    %157 = tpu.matmul %9, %156, %cst_103 {dimension_numbers = #tpu.dot_dimension_numbers<[1], [0], [0], [1], [0, 0, 1, 1], [], []>} : vector<8x32xbf16>, vector<32x8xbf16>, vector<8x8xf32> -> vector<8x8xf32>
    %c3_104 = arith.constant 3 : index
    %c0_105 = arith.constant 0 : index
    %c0_106 = arith.constant 0 : index
    %158 = vector.load %arg6[%c3_104, %c0_105, %c0_106] : memref<12x1x8xf32, #tpu.memory_space<vmem>>, vector<1x1x8xf32>
    %159 = vector.shape_cast %158 : vector<1x1x8xf32> to vector<1x8xf32>
    %160 = vector.broadcast %159 : vector<1x8xf32> to vector<8x8xf32>
    %161 = arith.addf %157, %160 : vector<8x8xf32>
    %c7 = arith.constant 7 : index
    %c0_107 = arith.constant 0 : index
    %c0_108 = arith.constant 0 : index
    %162 = vector.load %arg5[%c7, %c0_107, %c0_108] : memref<12x32x8xbf16, #tpu.memory_space<vmem>>, vector<1x32x8xbf16>
    %163 = vector.shape_cast %162 : vector<1x32x8xbf16> to vector<32x8xbf16>
    %cst_109 = arith.constant dense<0.000000e+00> : vector<8x8xf32>
    %164 = tpu.matmul %9, %163, %cst_109 {dimension_numbers = #tpu.dot_dimension_numbers<[1], [0], [0], [1], [0, 0, 1, 1], [], []>} : vector<8x32xbf16>, vector<32x8xbf16>, vector<8x8xf32> -> vector<8x8xf32>
    %c7_110 = arith.constant 7 : index
    %c0_111 = arith.constant 0 : index
    %c0_112 = arith.constant 0 : index
    %165 = vector.load %arg6[%c7_110, %c0_111, %c0_112] : memref<12x1x8xf32, #tpu.memory_space<vmem>>, vector<1x1x8xf32>
    %166 = vector.shape_cast %165 : vector<1x1x8xf32> to vector<1x8xf32>
    %167 = vector.broadcast %166 : vector<1x8xf32> to vector<8x8xf32>
    %168 = arith.addf %164, %167 : vector<8x8xf32>
    %c11 = arith.constant 11 : index
    %c0_113 = arith.constant 0 : index
    %c0_114 = arith.constant 0 : index
    %169 = vector.load %arg5[%c11, %c0_113, %c0_114] : memref<12x32x8xbf16, #tpu.memory_space<vmem>>, vector<1x32x8xbf16>
    %170 = vector.shape_cast %169 : vector<1x32x8xbf16> to vector<32x8xbf16>
    %cst_115 = arith.constant dense<0.000000e+00> : vector<8x8xf32>
    %171 = tpu.matmul %9, %170, %cst_115 {dimension_numbers = #tpu.dot_dimension_numbers<[1], [0], [0], [1], [0, 0, 1, 1], [], []>} : vector<8x32xbf16>, vector<32x8xbf16>, vector<8x8xf32> -> vector<8x8xf32>
    %c11_116 = arith.constant 11 : index
    %c0_117 = arith.constant 0 : index
    %c0_118 = arith.constant 0 : index
    %172 = vector.load %arg6[%c11_116, %c0_117, %c0_118] : memref<12x1x8xf32, #tpu.memory_space<vmem>>, vector<1x1x8xf32>
    %173 = vector.shape_cast %172 : vector<1x1x8xf32> to vector<1x8xf32>
    %174 = vector.broadcast %173 : vector<1x8xf32> to vector<8x8xf32>
    %175 = arith.addf %171, %174 : vector<8x8xf32>
    %cst_119 = arith.constant 0.176776692 : f32
    %176 = vector.broadcast %cst_119 : f32 to vector<8x8xf32>
    %177 = arith.mulf %161, %176 : vector<8x8xf32>
    %178 = arith.truncf %177 : vector<8x8xf32> to vector<8x8xbf16>
    %179 = arith.truncf %168 : vector<8x8xf32> to vector<8x8xbf16>
    %cst_120 = arith.constant dense<0.000000e+00> : vector<8x8xf32>
    %180 = tpu.matmul %178, %179, %cst_120 {dimension_numbers = #tpu.dot_dimension_numbers<[1], [1], [0], [0], [0, 0, 1, 0], [], []>} : vector<8x8xbf16>, vector<8x8xbf16>, vector<8x8xf32> -> vector<8x8xf32>
    %cst_121 = arith.constant 0.000000e+00 : f32
    %181 = vector.broadcast %cst_121 : f32 to vector<8x8xf32>
    %182 = arith.cmpf oeq, %6, %181 : vector<8x8xf32>
    %cst_122 = arith.constant -1.000000e+20 : f32
    %183 = vector.broadcast %cst_122 : f32 to vector<8x8xf32>
    %184 = arith.select %182, %183, %180 : vector<8x8xi1>, vector<8x8xf32>
    %cst_123 = arith.constant dense<0xFF800000> : vector<8xf32>
    %185 = vector.multi_reduction <maximumf>, %184, %cst_123 [1] : vector<8x8xf32> to vector<8xf32>
    %186 = vector.shape_cast %185 : vector<8xf32> to vector<8x1xf32>
    %187 = vector.broadcast %186 : vector<8x1xf32> to vector<8x8xf32>
    %188 = arith.subf %184, %187 : vector<8x8xf32>
    %189 = math.exp %188 : vector<8x8xf32>
    %cst_124 = arith.constant dense<0.000000e+00> : vector<8xf32>
    %190 = vector.multi_reduction <add>, %189, %cst_124 [1] : vector<8x8xf32> to vector<8xf32>
    %191 = vector.shape_cast %190 : vector<8xf32> to vector<8x1xf32>
    %192 = arith.truncf %189 : vector<8x8xf32> to vector<8x8xbf16>
    %193 = arith.truncf %175 : vector<8x8xf32> to vector<8x8xbf16>
    %cst_125 = arith.constant dense<0.000000e+00> : vector<8x8xf32>
    %194 = tpu.matmul %192, %193, %cst_125 {dimension_numbers = #tpu.dot_dimension_numbers<[1], [0], [0], [1], [0, 0, 1, 1], [], []>} : vector<8x8xbf16>, vector<8x8xbf16>, vector<8x8xf32> -> vector<8x8xf32>
    %195 = tpu.reciprocal %191 {approx = true} : vector<8x1xf32> -> vector<8x1xf32>
    %196 = vector.broadcast %195 : vector<8x1xf32> to vector<8x8xf32>
    %197 = arith.mulf %194, %196 : vector<8x8xf32>
    %198 = arith.truncf %197 : vector<8x8xf32> to vector<8x8xbf16>
    %c3_126 = arith.constant 3 : index
    %c0_127 = arith.constant 0 : index
    %c0_128 = arith.constant 0 : index
    %199 = vector.load %arg7[%c3_126, %c0_127, %c0_128] : memref<4x8x32xbf16, #tpu.memory_space<vmem>>, vector<1x8x32xbf16>
    %200 = vector.shape_cast %199 : vector<1x8x32xbf16> to vector<8x32xbf16>
    %cst_129 = arith.constant dense<0.000000e+00> : vector<8x32xf32>
    %201 = tpu.matmul %198, %200, %cst_129 {dimension_numbers = #tpu.dot_dimension_numbers<[1], [0], [0], [1], [0, 0, 1, 1], [], []>} : vector<8x8xbf16>, vector<8x32xbf16>, vector<8x32xf32> -> vector<8x32xf32>
    %202 = arith.addf %154, %201 : vector<8x32xf32>
    %c0_130 = arith.constant 0 : index
    %c0_131 = arith.constant 0 : index
    %203 = vector.load %arg8[%c0_130, %c0_131] : memref<1x32xf32, #tpu.memory_space<vmem>>, vector<1x32xf32>
    %204 = vector.broadcast %203 : vector<1x32xf32> to vector<8x32xf32>
    %205 = arith.addf %202, %204 : vector<8x32xf32>
    %206 = arith.addf %1, %205 : vector<8x32xf32>
    %cst_132 = arith.constant dense<0.000000e+00> : vector<8xf32>
    %207 = vector.multi_reduction <add>, %206, %cst_132 [1] : vector<8x32xf32> to vector<8xf32>
    %208 = vector.shape_cast %207 : vector<8xf32> to vector<8x1xf32>
    %cst_133 = arith.constant 3.200000e+01 : f32
    %209 = vector.broadcast %cst_133 : f32 to vector<8x1xf32>
    %210 = arith.divf %208, %209 : vector<8x1xf32>
    %211 = vector.broadcast %210 : vector<8x1xf32> to vector<8x32xf32>
    %212 = arith.subf %206, %211 : vector<8x32xf32>
    %213 = arith.mulf %212, %212 : vector<8x32xf32>
    %cst_134 = arith.constant dense<0.000000e+00> : vector<8xf32>
    %214 = vector.multi_reduction <add>, %213, %cst_134 [1] : vector<8x32xf32> to vector<8xf32>
    %215 = vector.shape_cast %214 : vector<8xf32> to vector<8x1xf32>
    %cst_135 = arith.constant 3.200000e+01 : f32
    %216 = vector.broadcast %cst_135 : f32 to vector<8x1xf32>
    %217 = arith.divf %215, %216 : vector<8x1xf32>
    %cst_136 = arith.constant 9.99999974E-6 : f32
    %218 = vector.broadcast %cst_136 : f32 to vector<8x1xf32>
    %219 = arith.addf %217, %218 : vector<8x1xf32>
    %220 = math.rsqrt %219 : vector<8x1xf32>
    %221 = vector.broadcast %220 : vector<8x1xf32> to vector<8x32xf32>
    %222 = arith.mulf %212, %221 : vector<8x32xf32>
    %c0_137 = arith.constant 0 : index
    %c0_138 = arith.constant 0 : index
    %223 = vector.load %arg9[%c0_137, %c0_138] : memref<1x32xf32, #tpu.memory_space<vmem>>, vector<1x32xf32>
    %224 = vector.broadcast %223 : vector<1x32xf32> to vector<8x32xf32>
    %225 = arith.mulf %222, %224 : vector<8x32xf32>
    %c0_139 = arith.constant 0 : index
    %c0_140 = arith.constant 0 : index
    %226 = vector.load %arg10[%c0_139, %c0_140] : memref<1x32xf32, #tpu.memory_space<vmem>>, vector<1x32xf32>
    %227 = vector.broadcast %226 : vector<1x32xf32> to vector<8x32xf32>
    %228 = arith.addf %225, %227 : vector<8x32xf32>
    %229 = arith.truncf %228 : vector<8x32xf32> to vector<8x32xbf16>
    %cst_141 = arith.constant 0.000000e+00 : f32
    %230 = vector.broadcast %cst_141 : f32 to vector<8x32xf32>
    %c0_142 = arith.constant 0 : index
    %c0_143 = arith.constant 0 : index
    %c0_144 = arith.constant 0 : index
    %231 = vector.load %arg11[%c0_142, %c0_143, %c0_144] : memref<12x32x8xbf16, #tpu.memory_space<vmem>>, vector<1x32x8xbf16>
    %232 = vector.shape_cast %231 : vector<1x32x8xbf16> to vector<32x8xbf16>
    %cst_145 = arith.constant dense<0.000000e+00> : vector<8x8xf32>
    %233 = tpu.matmul %229, %232, %cst_145 {dimension_numbers = #tpu.dot_dimension_numbers<[1], [0], [0], [1], [0, 0, 1, 1], [], []>} : vector<8x32xbf16>, vector<32x8xbf16>, vector<8x8xf32> -> vector<8x8xf32>
    %c0_146 = arith.constant 0 : index
    %c0_147 = arith.constant 0 : index
    %c0_148 = arith.constant 0 : index
    %234 = vector.load %arg12[%c0_146, %c0_147, %c0_148] : memref<12x1x8xf32, #tpu.memory_space<vmem>>, vector<1x1x8xf32>
    %235 = vector.shape_cast %234 : vector<1x1x8xf32> to vector<1x8xf32>
    %236 = vector.broadcast %235 : vector<1x8xf32> to vector<8x8xf32>
    %237 = arith.addf %233, %236 : vector<8x8xf32>
    %c4_149 = arith.constant 4 : index
    %c0_150 = arith.constant 0 : index
    %c0_151 = arith.constant 0 : index
    %238 = vector.load %arg11[%c4_149, %c0_150, %c0_151] : memref<12x32x8xbf16, #tpu.memory_space<vmem>>, vector<1x32x8xbf16>
    %239 = vector.shape_cast %238 : vector<1x32x8xbf16> to vector<32x8xbf16>
    %cst_152 = arith.constant dense<0.000000e+00> : vector<8x8xf32>
    %240 = tpu.matmul %4, %239, %cst_152 {dimension_numbers = #tpu.dot_dimension_numbers<[1], [0], [0], [1], [0, 0, 1, 1], [], []>} : vector<8x32xbf16>, vector<32x8xbf16>, vector<8x8xf32> -> vector<8x8xf32>
    %c4_153 = arith.constant 4 : index
    %c0_154 = arith.constant 0 : index
    %c0_155 = arith.constant 0 : index
    %241 = vector.load %arg12[%c4_153, %c0_154, %c0_155] : memref<12x1x8xf32, #tpu.memory_space<vmem>>, vector<1x1x8xf32>
    %242 = vector.shape_cast %241 : vector<1x1x8xf32> to vector<1x8xf32>
    %243 = vector.broadcast %242 : vector<1x8xf32> to vector<8x8xf32>
    %244 = arith.addf %240, %243 : vector<8x8xf32>
    %c8_156 = arith.constant 8 : index
    %c0_157 = arith.constant 0 : index
    %c0_158 = arith.constant 0 : index
    %245 = vector.load %arg11[%c8_156, %c0_157, %c0_158] : memref<12x32x8xbf16, #tpu.memory_space<vmem>>, vector<1x32x8xbf16>
    %246 = vector.shape_cast %245 : vector<1x32x8xbf16> to vector<32x8xbf16>
    %cst_159 = arith.constant dense<0.000000e+00> : vector<8x8xf32>
    %247 = tpu.matmul %4, %246, %cst_159 {dimension_numbers = #tpu.dot_dimension_numbers<[1], [0], [0], [1], [0, 0, 1, 1], [], []>} : vector<8x32xbf16>, vector<32x8xbf16>, vector<8x8xf32> -> vector<8x8xf32>
    %c8_160 = arith.constant 8 : index
    %c0_161 = arith.constant 0 : index
    %c0_162 = arith.constant 0 : index
    %248 = vector.load %arg12[%c8_160, %c0_161, %c0_162] : memref<12x1x8xf32, #tpu.memory_space<vmem>>, vector<1x1x8xf32>
    %249 = vector.shape_cast %248 : vector<1x1x8xf32> to vector<1x8xf32>
    %250 = vector.broadcast %249 : vector<1x8xf32> to vector<8x8xf32>
    %251 = arith.addf %247, %250 : vector<8x8xf32>
    %cst_163 = arith.constant 0.176776692 : f32
    %252 = vector.broadcast %cst_163 : f32 to vector<8x8xf32>
    %253 = arith.mulf %237, %252 : vector<8x8xf32>
    %254 = arith.truncf %253 : vector<8x8xf32> to vector<8x8xbf16>
    %255 = arith.truncf %244 : vector<8x8xf32> to vector<8x8xbf16>
    %cst_164 = arith.constant dense<0.000000e+00> : vector<8x8xf32>
    %256 = tpu.matmul %254, %255, %cst_164 {dimension_numbers = #tpu.dot_dimension_numbers<[1], [1], [0], [0], [0, 0, 1, 0], [], []>} : vector<8x8xbf16>, vector<8x8xbf16>, vector<8x8xf32> -> vector<8x8xf32>
    %cst_165 = arith.constant 0.000000e+00 : f32
    %257 = vector.broadcast %cst_165 : f32 to vector<1x8xf32>
    %258 = arith.cmpf oeq, %8, %257 : vector<1x8xf32>
    %cst_166 = arith.constant -1.000000e+20 : f32
    %259 = vector.shape_cast %258 : vector<1x8xi1> to vector<1x8xi1>
    %260 = vector.broadcast %259 : vector<1x8xi1> to vector<8x8xi1>
    %261 = vector.broadcast %cst_166 : f32 to vector<8x8xf32>
    %262 = arith.select %260, %261, %256 : vector<8x8xi1>, vector<8x8xf32>
    %cst_167 = arith.constant dense<0xFF800000> : vector<8xf32>
    %263 = vector.multi_reduction <maximumf>, %262, %cst_167 [1] : vector<8x8xf32> to vector<8xf32>
    %264 = vector.shape_cast %263 : vector<8xf32> to vector<8x1xf32>
    %265 = vector.broadcast %264 : vector<8x1xf32> to vector<8x8xf32>
    %266 = arith.subf %262, %265 : vector<8x8xf32>
    %267 = math.exp %266 : vector<8x8xf32>
    %cst_168 = arith.constant dense<0.000000e+00> : vector<8xf32>
    %268 = vector.multi_reduction <add>, %267, %cst_168 [1] : vector<8x8xf32> to vector<8xf32>
    %269 = vector.shape_cast %268 : vector<8xf32> to vector<8x1xf32>
    %270 = arith.truncf %267 : vector<8x8xf32> to vector<8x8xbf16>
    %271 = arith.truncf %251 : vector<8x8xf32> to vector<8x8xbf16>
    %cst_169 = arith.constant dense<0.000000e+00> : vector<8x8xf32>
    %272 = tpu.matmul %270, %271, %cst_169 {dimension_numbers = #tpu.dot_dimension_numbers<[1], [0], [0], [1], [0, 0, 1, 1], [], []>} : vector<8x8xbf16>, vector<8x8xbf16>, vector<8x8xf32> -> vector<8x8xf32>
    %273 = tpu.reciprocal %269 {approx = true} : vector<8x1xf32> -> vector<8x1xf32>
    %274 = vector.broadcast %273 : vector<8x1xf32> to vector<8x8xf32>
    %275 = arith.mulf %272, %274 : vector<8x8xf32>
    %276 = arith.truncf %275 : vector<8x8xf32> to vector<8x8xbf16>
    %c0_170 = arith.constant 0 : index
    %c0_171 = arith.constant 0 : index
    %c0_172 = arith.constant 0 : index
    %277 = vector.load %arg13[%c0_170, %c0_171, %c0_172] : memref<4x8x32xbf16, #tpu.memory_space<vmem>>, vector<1x8x32xbf16>
    %278 = vector.shape_cast %277 : vector<1x8x32xbf16> to vector<8x32xbf16>
    %cst_173 = arith.constant dense<0.000000e+00> : vector<8x32xf32>
    %279 = tpu.matmul %276, %278, %cst_173 {dimension_numbers = #tpu.dot_dimension_numbers<[1], [0], [0], [1], [0, 0, 1, 1], [], []>} : vector<8x8xbf16>, vector<8x32xbf16>, vector<8x32xf32> -> vector<8x32xf32>
    %280 = arith.addf %230, %279 : vector<8x32xf32>
    %c1_174 = arith.constant 1 : index
    %c0_175 = arith.constant 0 : index
    %c0_176 = arith.constant 0 : index
    %281 = vector.load %arg11[%c1_174, %c0_175, %c0_176] : memref<12x32x8xbf16, #tpu.memory_space<vmem>>, vector<1x32x8xbf16>
    %282 = vector.shape_cast %281 : vector<1x32x8xbf16> to vector<32x8xbf16>
    %cst_177 = arith.constant dense<0.000000e+00> : vector<8x8xf32>
    %283 = tpu.matmul %229, %282, %cst_177 {dimension_numbers = #tpu.dot_dimension_numbers<[1], [0], [0], [1], [0, 0, 1, 1], [], []>} : vector<8x32xbf16>, vector<32x8xbf16>, vector<8x8xf32> -> vector<8x8xf32>
    %c1_178 = arith.constant 1 : index
    %c0_179 = arith.constant 0 : index
    %c0_180 = arith.constant 0 : index
    %284 = vector.load %arg12[%c1_178, %c0_179, %c0_180] : memref<12x1x8xf32, #tpu.memory_space<vmem>>, vector<1x1x8xf32>
    %285 = vector.shape_cast %284 : vector<1x1x8xf32> to vector<1x8xf32>
    %286 = vector.broadcast %285 : vector<1x8xf32> to vector<8x8xf32>
    %287 = arith.addf %283, %286 : vector<8x8xf32>
    %c5_181 = arith.constant 5 : index
    %c0_182 = arith.constant 0 : index
    %c0_183 = arith.constant 0 : index
    %288 = vector.load %arg11[%c5_181, %c0_182, %c0_183] : memref<12x32x8xbf16, #tpu.memory_space<vmem>>, vector<1x32x8xbf16>
    %289 = vector.shape_cast %288 : vector<1x32x8xbf16> to vector<32x8xbf16>
    %cst_184 = arith.constant dense<0.000000e+00> : vector<8x8xf32>
    %290 = tpu.matmul %4, %289, %cst_184 {dimension_numbers = #tpu.dot_dimension_numbers<[1], [0], [0], [1], [0, 0, 1, 1], [], []>} : vector<8x32xbf16>, vector<32x8xbf16>, vector<8x8xf32> -> vector<8x8xf32>
    %c5_185 = arith.constant 5 : index
    %c0_186 = arith.constant 0 : index
    %c0_187 = arith.constant 0 : index
    %291 = vector.load %arg12[%c5_185, %c0_186, %c0_187] : memref<12x1x8xf32, #tpu.memory_space<vmem>>, vector<1x1x8xf32>
    %292 = vector.shape_cast %291 : vector<1x1x8xf32> to vector<1x8xf32>
    %293 = vector.broadcast %292 : vector<1x8xf32> to vector<8x8xf32>
    %294 = arith.addf %290, %293 : vector<8x8xf32>
    %c9_188 = arith.constant 9 : index
    %c0_189 = arith.constant 0 : index
    %c0_190 = arith.constant 0 : index
    %295 = vector.load %arg11[%c9_188, %c0_189, %c0_190] : memref<12x32x8xbf16, #tpu.memory_space<vmem>>, vector<1x32x8xbf16>
    %296 = vector.shape_cast %295 : vector<1x32x8xbf16> to vector<32x8xbf16>
    %cst_191 = arith.constant dense<0.000000e+00> : vector<8x8xf32>
    %297 = tpu.matmul %4, %296, %cst_191 {dimension_numbers = #tpu.dot_dimension_numbers<[1], [0], [0], [1], [0, 0, 1, 1], [], []>} : vector<8x32xbf16>, vector<32x8xbf16>, vector<8x8xf32> -> vector<8x8xf32>
    %c9_192 = arith.constant 9 : index
    %c0_193 = arith.constant 0 : index
    %c0_194 = arith.constant 0 : index
    %298 = vector.load %arg12[%c9_192, %c0_193, %c0_194] : memref<12x1x8xf32, #tpu.memory_space<vmem>>, vector<1x1x8xf32>
    %299 = vector.shape_cast %298 : vector<1x1x8xf32> to vector<1x8xf32>
    %300 = vector.broadcast %299 : vector<1x8xf32> to vector<8x8xf32>
    %301 = arith.addf %297, %300 : vector<8x8xf32>
    %cst_195 = arith.constant 0.176776692 : f32
    %302 = vector.broadcast %cst_195 : f32 to vector<8x8xf32>
    %303 = arith.mulf %287, %302 : vector<8x8xf32>
    %304 = arith.truncf %303 : vector<8x8xf32> to vector<8x8xbf16>
    %305 = arith.truncf %294 : vector<8x8xf32> to vector<8x8xbf16>
    %cst_196 = arith.constant dense<0.000000e+00> : vector<8x8xf32>
    %306 = tpu.matmul %304, %305, %cst_196 {dimension_numbers = #tpu.dot_dimension_numbers<[1], [1], [0], [0], [0, 0, 1, 0], [], []>} : vector<8x8xbf16>, vector<8x8xbf16>, vector<8x8xf32> -> vector<8x8xf32>
    %cst_197 = arith.constant 0.000000e+00 : f32
    %307 = vector.broadcast %cst_197 : f32 to vector<1x8xf32>
    %308 = arith.cmpf oeq, %8, %307 : vector<1x8xf32>
    %cst_198 = arith.constant -1.000000e+20 : f32
    %309 = vector.shape_cast %308 : vector<1x8xi1> to vector<1x8xi1>
    %310 = vector.broadcast %309 : vector<1x8xi1> to vector<8x8xi1>
    %311 = vector.broadcast %cst_198 : f32 to vector<8x8xf32>
    %312 = arith.select %310, %311, %306 : vector<8x8xi1>, vector<8x8xf32>
    %cst_199 = arith.constant dense<0xFF800000> : vector<8xf32>
    %313 = vector.multi_reduction <maximumf>, %312, %cst_199 [1] : vector<8x8xf32> to vector<8xf32>
    %314 = vector.shape_cast %313 : vector<8xf32> to vector<8x1xf32>
    %315 = vector.broadcast %314 : vector<8x1xf32> to vector<8x8xf32>
    %316 = arith.subf %312, %315 : vector<8x8xf32>
    %317 = math.exp %316 : vector<8x8xf32>
    %cst_200 = arith.constant dense<0.000000e+00> : vector<8xf32>
    %318 = vector.multi_reduction <add>, %317, %cst_200 [1] : vector<8x8xf32> to vector<8xf32>
    %319 = vector.shape_cast %318 : vector<8xf32> to vector<8x1xf32>
    %320 = arith.truncf %317 : vector<8x8xf32> to vector<8x8xbf16>
    %321 = arith.truncf %301 : vector<8x8xf32> to vector<8x8xbf16>
    %cst_201 = arith.constant dense<0.000000e+00> : vector<8x8xf32>
    %322 = tpu.matmul %320, %321, %cst_201 {dimension_numbers = #tpu.dot_dimension_numbers<[1], [0], [0], [1], [0, 0, 1, 1], [], []>} : vector<8x8xbf16>, vector<8x8xbf16>, vector<8x8xf32> -> vector<8x8xf32>
    %323 = tpu.reciprocal %319 {approx = true} : vector<8x1xf32> -> vector<8x1xf32>
    %324 = vector.broadcast %323 : vector<8x1xf32> to vector<8x8xf32>
    %325 = arith.mulf %322, %324 : vector<8x8xf32>
    %326 = arith.truncf %325 : vector<8x8xf32> to vector<8x8xbf16>
    %c1_202 = arith.constant 1 : index
    %c0_203 = arith.constant 0 : index
    %c0_204 = arith.constant 0 : index
    %327 = vector.load %arg13[%c1_202, %c0_203, %c0_204] : memref<4x8x32xbf16, #tpu.memory_space<vmem>>, vector<1x8x32xbf16>
    %328 = vector.shape_cast %327 : vector<1x8x32xbf16> to vector<8x32xbf16>
    %cst_205 = arith.constant dense<0.000000e+00> : vector<8x32xf32>
    %329 = tpu.matmul %326, %328, %cst_205 {dimension_numbers = #tpu.dot_dimension_numbers<[1], [0], [0], [1], [0, 0, 1, 1], [], []>} : vector<8x8xbf16>, vector<8x32xbf16>, vector<8x32xf32> -> vector<8x32xf32>
    %330 = arith.addf %280, %329 : vector<8x32xf32>
    %c2_206 = arith.constant 2 : index
    %c0_207 = arith.constant 0 : index
    %c0_208 = arith.constant 0 : index
    %331 = vector.load %arg11[%c2_206, %c0_207, %c0_208] : memref<12x32x8xbf16, #tpu.memory_space<vmem>>, vector<1x32x8xbf16>
    %332 = vector.shape_cast %331 : vector<1x32x8xbf16> to vector<32x8xbf16>
    %cst_209 = arith.constant dense<0.000000e+00> : vector<8x8xf32>
    %333 = tpu.matmul %229, %332, %cst_209 {dimension_numbers = #tpu.dot_dimension_numbers<[1], [0], [0], [1], [0, 0, 1, 1], [], []>} : vector<8x32xbf16>, vector<32x8xbf16>, vector<8x8xf32> -> vector<8x8xf32>
    %c2_210 = arith.constant 2 : index
    %c0_211 = arith.constant 0 : index
    %c0_212 = arith.constant 0 : index
    %334 = vector.load %arg12[%c2_210, %c0_211, %c0_212] : memref<12x1x8xf32, #tpu.memory_space<vmem>>, vector<1x1x8xf32>
    %335 = vector.shape_cast %334 : vector<1x1x8xf32> to vector<1x8xf32>
    %336 = vector.broadcast %335 : vector<1x8xf32> to vector<8x8xf32>
    %337 = arith.addf %333, %336 : vector<8x8xf32>
    %c6_213 = arith.constant 6 : index
    %c0_214 = arith.constant 0 : index
    %c0_215 = arith.constant 0 : index
    %338 = vector.load %arg11[%c6_213, %c0_214, %c0_215] : memref<12x32x8xbf16, #tpu.memory_space<vmem>>, vector<1x32x8xbf16>
    %339 = vector.shape_cast %338 : vector<1x32x8xbf16> to vector<32x8xbf16>
    %cst_216 = arith.constant dense<0.000000e+00> : vector<8x8xf32>
    %340 = tpu.matmul %4, %339, %cst_216 {dimension_numbers = #tpu.dot_dimension_numbers<[1], [0], [0], [1], [0, 0, 1, 1], [], []>} : vector<8x32xbf16>, vector<32x8xbf16>, vector<8x8xf32> -> vector<8x8xf32>
    %c6_217 = arith.constant 6 : index
    %c0_218 = arith.constant 0 : index
    %c0_219 = arith.constant 0 : index
    %341 = vector.load %arg12[%c6_217, %c0_218, %c0_219] : memref<12x1x8xf32, #tpu.memory_space<vmem>>, vector<1x1x8xf32>
    %342 = vector.shape_cast %341 : vector<1x1x8xf32> to vector<1x8xf32>
    %343 = vector.broadcast %342 : vector<1x8xf32> to vector<8x8xf32>
    %344 = arith.addf %340, %343 : vector<8x8xf32>
    %c10_220 = arith.constant 10 : index
    %c0_221 = arith.constant 0 : index
    %c0_222 = arith.constant 0 : index
    %345 = vector.load %arg11[%c10_220, %c0_221, %c0_222] : memref<12x32x8xbf16, #tpu.memory_space<vmem>>, vector<1x32x8xbf16>
    %346 = vector.shape_cast %345 : vector<1x32x8xbf16> to vector<32x8xbf16>
    %cst_223 = arith.constant dense<0.000000e+00> : vector<8x8xf32>
    %347 = tpu.matmul %4, %346, %cst_223 {dimension_numbers = #tpu.dot_dimension_numbers<[1], [0], [0], [1], [0, 0, 1, 1], [], []>} : vector<8x32xbf16>, vector<32x8xbf16>, vector<8x8xf32> -> vector<8x8xf32>
    %c10_224 = arith.constant 10 : index
    %c0_225 = arith.constant 0 : index
    %c0_226 = arith.constant 0 : index
    %348 = vector.load %arg12[%c10_224, %c0_225, %c0_226] : memref<12x1x8xf32, #tpu.memory_space<vmem>>, vector<1x1x8xf32>
    %349 = vector.shape_cast %348 : vector<1x1x8xf32> to vector<1x8xf32>
    %350 = vector.broadcast %349 : vector<1x8xf32> to vector<8x8xf32>
    %351 = arith.addf %347, %350 : vector<8x8xf32>
    %cst_227 = arith.constant 0.176776692 : f32
    %352 = vector.broadcast %cst_227 : f32 to vector<8x8xf32>
    %353 = arith.mulf %337, %352 : vector<8x8xf32>
    %354 = arith.truncf %353 : vector<8x8xf32> to vector<8x8xbf16>
    %355 = arith.truncf %344 : vector<8x8xf32> to vector<8x8xbf16>
    %cst_228 = arith.constant dense<0.000000e+00> : vector<8x8xf32>
    %356 = tpu.matmul %354, %355, %cst_228 {dimension_numbers = #tpu.dot_dimension_numbers<[1], [1], [0], [0], [0, 0, 1, 0], [], []>} : vector<8x8xbf16>, vector<8x8xbf16>, vector<8x8xf32> -> vector<8x8xf32>
    %cst_229 = arith.constant 0.000000e+00 : f32
    %357 = vector.broadcast %cst_229 : f32 to vector<1x8xf32>
    %358 = arith.cmpf oeq, %8, %357 : vector<1x8xf32>
    %cst_230 = arith.constant -1.000000e+20 : f32
    %359 = vector.shape_cast %358 : vector<1x8xi1> to vector<1x8xi1>
    %360 = vector.broadcast %359 : vector<1x8xi1> to vector<8x8xi1>
    %361 = vector.broadcast %cst_230 : f32 to vector<8x8xf32>
    %362 = arith.select %360, %361, %356 : vector<8x8xi1>, vector<8x8xf32>
    %cst_231 = arith.constant dense<0xFF800000> : vector<8xf32>
    %363 = vector.multi_reduction <maximumf>, %362, %cst_231 [1] : vector<8x8xf32> to vector<8xf32>
    %364 = vector.shape_cast %363 : vector<8xf32> to vector<8x1xf32>
    %365 = vector.broadcast %364 : vector<8x1xf32> to vector<8x8xf32>
    %366 = arith.subf %362, %365 : vector<8x8xf32>
    %367 = math.exp %366 : vector<8x8xf32>
    %cst_232 = arith.constant dense<0.000000e+00> : vector<8xf32>
    %368 = vector.multi_reduction <add>, %367, %cst_232 [1] : vector<8x8xf32> to vector<8xf32>
    %369 = vector.shape_cast %368 : vector<8xf32> to vector<8x1xf32>
    %370 = arith.truncf %367 : vector<8x8xf32> to vector<8x8xbf16>
    %371 = arith.truncf %351 : vector<8x8xf32> to vector<8x8xbf16>
    %cst_233 = arith.constant dense<0.000000e+00> : vector<8x8xf32>
    %372 = tpu.matmul %370, %371, %cst_233 {dimension_numbers = #tpu.dot_dimension_numbers<[1], [0], [0], [1], [0, 0, 1, 1], [], []>} : vector<8x8xbf16>, vector<8x8xbf16>, vector<8x8xf32> -> vector<8x8xf32>
    %373 = tpu.reciprocal %369 {approx = true} : vector<8x1xf32> -> vector<8x1xf32>
    %374 = vector.broadcast %373 : vector<8x1xf32> to vector<8x8xf32>
    %375 = arith.mulf %372, %374 : vector<8x8xf32>
    %376 = arith.truncf %375 : vector<8x8xf32> to vector<8x8xbf16>
    %c2_234 = arith.constant 2 : index
    %c0_235 = arith.constant 0 : index
    %c0_236 = arith.constant 0 : index
    %377 = vector.load %arg13[%c2_234, %c0_235, %c0_236] : memref<4x8x32xbf16, #tpu.memory_space<vmem>>, vector<1x8x32xbf16>
    %378 = vector.shape_cast %377 : vector<1x8x32xbf16> to vector<8x32xbf16>
    %cst_237 = arith.constant dense<0.000000e+00> : vector<8x32xf32>
    %379 = tpu.matmul %376, %378, %cst_237 {dimension_numbers = #tpu.dot_dimension_numbers<[1], [0], [0], [1], [0, 0, 1, 1], [], []>} : vector<8x8xbf16>, vector<8x32xbf16>, vector<8x32xf32> -> vector<8x32xf32>
    %380 = arith.addf %330, %379 : vector<8x32xf32>
    %c3_238 = arith.constant 3 : index
    %c0_239 = arith.constant 0 : index
    %c0_240 = arith.constant 0 : index
    %381 = vector.load %arg11[%c3_238, %c0_239, %c0_240] : memref<12x32x8xbf16, #tpu.memory_space<vmem>>, vector<1x32x8xbf16>
    %382 = vector.shape_cast %381 : vector<1x32x8xbf16> to vector<32x8xbf16>
    %cst_241 = arith.constant dense<0.000000e+00> : vector<8x8xf32>
    %383 = tpu.matmul %229, %382, %cst_241 {dimension_numbers = #tpu.dot_dimension_numbers<[1], [0], [0], [1], [0, 0, 1, 1], [], []>} : vector<8x32xbf16>, vector<32x8xbf16>, vector<8x8xf32> -> vector<8x8xf32>
    %c3_242 = arith.constant 3 : index
    %c0_243 = arith.constant 0 : index
    %c0_244 = arith.constant 0 : index
    %384 = vector.load %arg12[%c3_242, %c0_243, %c0_244] : memref<12x1x8xf32, #tpu.memory_space<vmem>>, vector<1x1x8xf32>
    %385 = vector.shape_cast %384 : vector<1x1x8xf32> to vector<1x8xf32>
    %386 = vector.broadcast %385 : vector<1x8xf32> to vector<8x8xf32>
    %387 = arith.addf %383, %386 : vector<8x8xf32>
    %c7_245 = arith.constant 7 : index
    %c0_246 = arith.constant 0 : index
    %c0_247 = arith.constant 0 : index
    %388 = vector.load %arg11[%c7_245, %c0_246, %c0_247] : memref<12x32x8xbf16, #tpu.memory_space<vmem>>, vector<1x32x8xbf16>
    %389 = vector.shape_cast %388 : vector<1x32x8xbf16> to vector<32x8xbf16>
    %cst_248 = arith.constant dense<0.000000e+00> : vector<8x8xf32>
    %390 = tpu.matmul %4, %389, %cst_248 {dimension_numbers = #tpu.dot_dimension_numbers<[1], [0], [0], [1], [0, 0, 1, 1], [], []>} : vector<8x32xbf16>, vector<32x8xbf16>, vector<8x8xf32> -> vector<8x8xf32>
    %c7_249 = arith.constant 7 : index
    %c0_250 = arith.constant 0 : index
    %c0_251 = arith.constant 0 : index
    %391 = vector.load %arg12[%c7_249, %c0_250, %c0_251] : memref<12x1x8xf32, #tpu.memory_space<vmem>>, vector<1x1x8xf32>
    %392 = vector.shape_cast %391 : vector<1x1x8xf32> to vector<1x8xf32>
    %393 = vector.broadcast %392 : vector<1x8xf32> to vector<8x8xf32>
    %394 = arith.addf %390, %393 : vector<8x8xf32>
    %c11_252 = arith.constant 11 : index
    %c0_253 = arith.constant 0 : index
    %c0_254 = arith.constant 0 : index
    %395 = vector.load %arg11[%c11_252, %c0_253, %c0_254] : memref<12x32x8xbf16, #tpu.memory_space<vmem>>, vector<1x32x8xbf16>
    %396 = vector.shape_cast %395 : vector<1x32x8xbf16> to vector<32x8xbf16>
    %cst_255 = arith.constant dense<0.000000e+00> : vector<8x8xf32>
    %397 = tpu.matmul %4, %396, %cst_255 {dimension_numbers = #tpu.dot_dimension_numbers<[1], [0], [0], [1], [0, 0, 1, 1], [], []>} : vector<8x32xbf16>, vector<32x8xbf16>, vector<8x8xf32> -> vector<8x8xf32>
    %c11_256 = arith.constant 11 : index
    %c0_257 = arith.constant 0 : index
    %c0_258 = arith.constant 0 : index
    %398 = vector.load %arg12[%c11_256, %c0_257, %c0_258] : memref<12x1x8xf32, #tpu.memory_space<vmem>>, vector<1x1x8xf32>
    %399 = vector.shape_cast %398 : vector<1x1x8xf32> to vector<1x8xf32>
    %400 = vector.broadcast %399 : vector<1x8xf32> to vector<8x8xf32>
    %401 = arith.addf %397, %400 : vector<8x8xf32>
    %cst_259 = arith.constant 0.176776692 : f32
    %402 = vector.broadcast %cst_259 : f32 to vector<8x8xf32>
    %403 = arith.mulf %387, %402 : vector<8x8xf32>
    %404 = arith.truncf %403 : vector<8x8xf32> to vector<8x8xbf16>
    %405 = arith.truncf %394 : vector<8x8xf32> to vector<8x8xbf16>
    %cst_260 = arith.constant dense<0.000000e+00> : vector<8x8xf32>
    %406 = tpu.matmul %404, %405, %cst_260 {dimension_numbers = #tpu.dot_dimension_numbers<[1], [1], [0], [0], [0, 0, 1, 0], [], []>} : vector<8x8xbf16>, vector<8x8xbf16>, vector<8x8xf32> -> vector<8x8xf32>
    %cst_261 = arith.constant 0.000000e+00 : f32
    %407 = vector.broadcast %cst_261 : f32 to vector<1x8xf32>
    %408 = arith.cmpf oeq, %8, %407 : vector<1x8xf32>
    %cst_262 = arith.constant -1.000000e+20 : f32
    %409 = vector.shape_cast %408 : vector<1x8xi1> to vector<1x8xi1>
    %410 = vector.broadcast %409 : vector<1x8xi1> to vector<8x8xi1>
    %411 = vector.broadcast %cst_262 : f32 to vector<8x8xf32>
    %412 = arith.select %410, %411, %406 : vector<8x8xi1>, vector<8x8xf32>
    %cst_263 = arith.constant dense<0xFF800000> : vector<8xf32>
    %413 = vector.multi_reduction <maximumf>, %412, %cst_263 [1] : vector<8x8xf32> to vector<8xf32>
    %414 = vector.shape_cast %413 : vector<8xf32> to vector<8x1xf32>
    %415 = vector.broadcast %414 : vector<8x1xf32> to vector<8x8xf32>
    %416 = arith.subf %412, %415 : vector<8x8xf32>
    %417 = math.exp %416 : vector<8x8xf32>
    %cst_264 = arith.constant dense<0.000000e+00> : vector<8xf32>
    %418 = vector.multi_reduction <add>, %417, %cst_264 [1] : vector<8x8xf32> to vector<8xf32>
    %419 = vector.shape_cast %418 : vector<8xf32> to vector<8x1xf32>
    %420 = arith.truncf %417 : vector<8x8xf32> to vector<8x8xbf16>
    %421 = arith.truncf %401 : vector<8x8xf32> to vector<8x8xbf16>
    %cst_265 = arith.constant dense<0.000000e+00> : vector<8x8xf32>
    %422 = tpu.matmul %420, %421, %cst_265 {dimension_numbers = #tpu.dot_dimension_numbers<[1], [0], [0], [1], [0, 0, 1, 1], [], []>} : vector<8x8xbf16>, vector<8x8xbf16>, vector<8x8xf32> -> vector<8x8xf32>
    %423 = tpu.reciprocal %419 {approx = true} : vector<8x1xf32> -> vector<8x1xf32>
    %424 = vector.broadcast %423 : vector<8x1xf32> to vector<8x8xf32>
    %425 = arith.mulf %422, %424 : vector<8x8xf32>
    %426 = arith.truncf %425 : vector<8x8xf32> to vector<8x8xbf16>
    %c3_266 = arith.constant 3 : index
    %c0_267 = arith.constant 0 : index
    %c0_268 = arith.constant 0 : index
    %427 = vector.load %arg13[%c3_266, %c0_267, %c0_268] : memref<4x8x32xbf16, #tpu.memory_space<vmem>>, vector<1x8x32xbf16>
    %428 = vector.shape_cast %427 : vector<1x8x32xbf16> to vector<8x32xbf16>
    %cst_269 = arith.constant dense<0.000000e+00> : vector<8x32xf32>
    %429 = tpu.matmul %426, %428, %cst_269 {dimension_numbers = #tpu.dot_dimension_numbers<[1], [0], [0], [1], [0, 0, 1, 1], [], []>} : vector<8x8xbf16>, vector<8x32xbf16>, vector<8x32xf32> -> vector<8x32xf32>
    %430 = arith.addf %380, %429 : vector<8x32xf32>
    %c0_270 = arith.constant 0 : index
    %c0_271 = arith.constant 0 : index
    %431 = vector.load %arg14[%c0_270, %c0_271] : memref<1x32xf32, #tpu.memory_space<vmem>>, vector<1x32xf32>
    %432 = vector.broadcast %431 : vector<1x32xf32> to vector<8x32xf32>
    %433 = arith.addf %430, %432 : vector<8x32xf32>
    %434 = arith.addf %228, %433 : vector<8x32xf32>
    %cst_272 = arith.constant dense<0.000000e+00> : vector<8xf32>
    %435 = vector.multi_reduction <add>, %434, %cst_272 [1] : vector<8x32xf32> to vector<8xf32>
    %436 = vector.shape_cast %435 : vector<8xf32> to vector<8x1xf32>
    %cst_273 = arith.constant 3.200000e+01 : f32
    %437 = vector.broadcast %cst_273 : f32 to vector<8x1xf32>
    %438 = arith.divf %436, %437 : vector<8x1xf32>
    %439 = vector.broadcast %438 : vector<8x1xf32> to vector<8x32xf32>
    %440 = arith.subf %434, %439 : vector<8x32xf32>
    %441 = arith.mulf %440, %440 : vector<8x32xf32>
    %cst_274 = arith.constant dense<0.000000e+00> : vector<8xf32>
    %442 = vector.multi_reduction <add>, %441, %cst_274 [1] : vector<8x32xf32> to vector<8xf32>
    %443 = vector.shape_cast %442 : vector<8xf32> to vector<8x1xf32>
    %cst_275 = arith.constant 3.200000e+01 : f32
    %444 = vector.broadcast %cst_275 : f32 to vector<8x1xf32>
    %445 = arith.divf %443, %444 : vector<8x1xf32>
    %cst_276 = arith.constant 9.99999974E-6 : f32
    %446 = vector.broadcast %cst_276 : f32 to vector<8x1xf32>
    %447 = arith.addf %445, %446 : vector<8x1xf32>
    %448 = math.rsqrt %447 : vector<8x1xf32>
    %449 = vector.broadcast %448 : vector<8x1xf32> to vector<8x32xf32>
    %450 = arith.mulf %440, %449 : vector<8x32xf32>
    %c0_277 = arith.constant 0 : index
    %c0_278 = arith.constant 0 : index
    %451 = vector.load %arg15[%c0_277, %c0_278] : memref<1x32xf32, #tpu.memory_space<vmem>>, vector<1x32xf32>
    %452 = vector.broadcast %451 : vector<1x32xf32> to vector<8x32xf32>
    %453 = arith.mulf %450, %452 : vector<8x32xf32>
    %c0_279 = arith.constant 0 : index
    %c0_280 = arith.constant 0 : index
    %454 = vector.load %arg16[%c0_279, %c0_280] : memref<1x32xf32, #tpu.memory_space<vmem>>, vector<1x32xf32>
    %455 = vector.broadcast %454 : vector<1x32xf32> to vector<8x32xf32>
    %456 = arith.addf %453, %455 : vector<8x32xf32>
    %c0_281 = arith.constant 0 : index
    %c0_282 = arith.constant 0 : index
    %457 = vector.load %arg17[%c0_281, %c0_282] : memref<32x64xbf16, #tpu.memory_space<vmem>>, vector<32x64xbf16>
    %458 = arith.truncf %456 : vector<8x32xf32> to vector<8x32xbf16>
    %cst_283 = arith.constant dense<0.000000e+00> : vector<8x64xf32>
    %459 = tpu.matmul %458, %457, %cst_283 {dimension_numbers = #tpu.dot_dimension_numbers<[1], [0], [0], [1], [0, 0, 1, 1], [], []>} : vector<8x32xbf16>, vector<32x64xbf16>, vector<8x64xf32> -> vector<8x64xf32>
    %c0_284 = arith.constant 0 : index
    %c0_285 = arith.constant 0 : index
    %460 = vector.load %arg18[%c0_284, %c0_285] : memref<1x64xf32, #tpu.memory_space<vmem>>, vector<1x64xf32>
    %461 = vector.broadcast %460 : vector<1x64xf32> to vector<8x64xf32>
    %462 = arith.addf %459, %461 : vector<8x64xf32>
    %cst_286 = arith.constant 0.000000e+00 : f32
    %463 = vector.broadcast %cst_286 : f32 to vector<8x64xf32>
    %464 = arith.maximumf %462, %463 : vector<8x64xf32>
    %c0_287 = arith.constant 0 : index
    %c0_288 = arith.constant 0 : index
    %465 = vector.load %arg19[%c0_287, %c0_288] : memref<64x32xbf16, #tpu.memory_space<vmem>>, vector<64x32xbf16>
    %466 = arith.truncf %464 : vector<8x64xf32> to vector<8x64xbf16>
    %cst_289 = arith.constant dense<0.000000e+00> : vector<8x32xf32>
    %467 = tpu.matmul %466, %465, %cst_289 {dimension_numbers = #tpu.dot_dimension_numbers<[1], [0], [0], [1], [0, 0, 1, 1], [], []>} : vector<8x64xbf16>, vector<64x32xbf16>, vector<8x32xf32> -> vector<8x32xf32>
    %c0_290 = arith.constant 0 : index
    %c0_291 = arith.constant 0 : index
    %468 = vector.load %arg20[%c0_290, %c0_291] : memref<1x32xf32, #tpu.memory_space<vmem>>, vector<1x32xf32>
    %469 = vector.broadcast %468 : vector<1x32xf32> to vector<8x32xf32>
    %470 = arith.addf %467, %469 : vector<8x32xf32>
    %471 = arith.addf %456, %470 : vector<8x32xf32>
    %cst_292 = arith.constant dense<0.000000e+00> : vector<8xf32>
    %472 = vector.multi_reduction <add>, %471, %cst_292 [1] : vector<8x32xf32> to vector<8xf32>
    %473 = vector.shape_cast %472 : vector<8xf32> to vector<8x1xf32>
    %cst_293 = arith.constant 3.200000e+01 : f32
    %474 = vector.broadcast %cst_293 : f32 to vector<8x1xf32>
    %475 = arith.divf %473, %474 : vector<8x1xf32>
    %476 = vector.broadcast %475 : vector<8x1xf32> to vector<8x32xf32>
    %477 = arith.subf %471, %476 : vector<8x32xf32>
    %478 = arith.mulf %477, %477 : vector<8x32xf32>
    %cst_294 = arith.constant dense<0.000000e+00> : vector<8xf32>
    %479 = vector.multi_reduction <add>, %478, %cst_294 [1] : vector<8x32xf32> to vector<8xf32>
    %480 = vector.shape_cast %479 : vector<8xf32> to vector<8x1xf32>
    %cst_295 = arith.constant 3.200000e+01 : f32
    %481 = vector.broadcast %cst_295 : f32 to vector<8x1xf32>
    %482 = arith.divf %480, %481 : vector<8x1xf32>
    %cst_296 = arith.constant 9.99999974E-6 : f32
    %483 = vector.broadcast %cst_296 : f32 to vector<8x1xf32>
    %484 = arith.addf %482, %483 : vector<8x1xf32>
    %485 = math.rsqrt %484 : vector<8x1xf32>
    %486 = vector.broadcast %485 : vector<8x1xf32> to vector<8x32xf32>
    %487 = arith.mulf %477, %486 : vector<8x32xf32>
    %c0_297 = arith.constant 0 : index
    %c0_298 = arith.constant 0 : index
    %488 = vector.load %arg21[%c0_297, %c0_298] : memref<1x32xf32, #tpu.memory_space<vmem>>, vector<1x32xf32>
    %489 = vector.broadcast %488 : vector<1x32xf32> to vector<8x32xf32>
    %490 = arith.mulf %487, %489 : vector<8x32xf32>
    %c0_299 = arith.constant 0 : index
    %c0_300 = arith.constant 0 : index
    %491 = vector.load %arg22[%c0_299, %c0_300] : memref<1x32xf32, #tpu.memory_space<vmem>>, vector<1x32xf32>
    %492 = vector.broadcast %491 : vector<1x32xf32> to vector<8x32xf32>
    %493 = arith.addf %490, %492 : vector<8x32xf32>
    %494 = arith.truncf %493 : vector<8x32xf32> to vector<8x32xbf16>
    %cst_301 = arith.constant 0.000000e+00 : f32
    %495 = vector.broadcast %cst_301 : f32 to vector<8x32xf32>
    %c0_302 = arith.constant 0 : index
    %c0_303 = arith.constant 0 : index
    %c0_304 = arith.constant 0 : index
    %496 = vector.load %arg5[%c0_302, %c0_303, %c0_304] : memref<12x32x8xbf16, #tpu.memory_space<vmem>>, vector<1x32x8xbf16>
    %497 = vector.shape_cast %496 : vector<1x32x8xbf16> to vector<32x8xbf16>
    %cst_305 = arith.constant dense<0.000000e+00> : vector<8x8xf32>
    %498 = tpu.matmul %494, %497, %cst_305 {dimension_numbers = #tpu.dot_dimension_numbers<[1], [0], [0], [1], [0, 0, 1, 1], [], []>} : vector<8x32xbf16>, vector<32x8xbf16>, vector<8x8xf32> -> vector<8x8xf32>
    %c0_306 = arith.constant 0 : index
    %c0_307 = arith.constant 0 : index
    %c0_308 = arith.constant 0 : index
    %499 = vector.load %arg6[%c0_306, %c0_307, %c0_308] : memref<12x1x8xf32, #tpu.memory_space<vmem>>, vector<1x1x8xf32>
    %500 = vector.shape_cast %499 : vector<1x1x8xf32> to vector<1x8xf32>
    %501 = vector.broadcast %500 : vector<1x8xf32> to vector<8x8xf32>
    %502 = arith.addf %498, %501 : vector<8x8xf32>
    %c4_309 = arith.constant 4 : index
    %c0_310 = arith.constant 0 : index
    %c0_311 = arith.constant 0 : index
    %503 = vector.load %arg5[%c4_309, %c0_310, %c0_311] : memref<12x32x8xbf16, #tpu.memory_space<vmem>>, vector<1x32x8xbf16>
    %504 = vector.shape_cast %503 : vector<1x32x8xbf16> to vector<32x8xbf16>
    %cst_312 = arith.constant dense<0.000000e+00> : vector<8x8xf32>
    %505 = tpu.matmul %494, %504, %cst_312 {dimension_numbers = #tpu.dot_dimension_numbers<[1], [0], [0], [1], [0, 0, 1, 1], [], []>} : vector<8x32xbf16>, vector<32x8xbf16>, vector<8x8xf32> -> vector<8x8xf32>
    %c4_313 = arith.constant 4 : index
    %c0_314 = arith.constant 0 : index
    %c0_315 = arith.constant 0 : index
    %506 = vector.load %arg6[%c4_313, %c0_314, %c0_315] : memref<12x1x8xf32, #tpu.memory_space<vmem>>, vector<1x1x8xf32>
    %507 = vector.shape_cast %506 : vector<1x1x8xf32> to vector<1x8xf32>
    %508 = vector.broadcast %507 : vector<1x8xf32> to vector<8x8xf32>
    %509 = arith.addf %505, %508 : vector<8x8xf32>
    %c8_316 = arith.constant 8 : index
    %c0_317 = arith.constant 0 : index
    %c0_318 = arith.constant 0 : index
    %510 = vector.load %arg5[%c8_316, %c0_317, %c0_318] : memref<12x32x8xbf16, #tpu.memory_space<vmem>>, vector<1x32x8xbf16>
    %511 = vector.shape_cast %510 : vector<1x32x8xbf16> to vector<32x8xbf16>
    %cst_319 = arith.constant dense<0.000000e+00> : vector<8x8xf32>
    %512 = tpu.matmul %494, %511, %cst_319 {dimension_numbers = #tpu.dot_dimension_numbers<[1], [0], [0], [1], [0, 0, 1, 1], [], []>} : vector<8x32xbf16>, vector<32x8xbf16>, vector<8x8xf32> -> vector<8x8xf32>
    %c8_320 = arith.constant 8 : index
    %c0_321 = arith.constant 0 : index
    %c0_322 = arith.constant 0 : index
    %513 = vector.load %arg6[%c8_320, %c0_321, %c0_322] : memref<12x1x8xf32, #tpu.memory_space<vmem>>, vector<1x1x8xf32>
    %514 = vector.shape_cast %513 : vector<1x1x8xf32> to vector<1x8xf32>
    %515 = vector.broadcast %514 : vector<1x8xf32> to vector<8x8xf32>
    %516 = arith.addf %512, %515 : vector<8x8xf32>
    %cst_323 = arith.constant 0.176776692 : f32
    %517 = vector.broadcast %cst_323 : f32 to vector<8x8xf32>
    %518 = arith.mulf %502, %517 : vector<8x8xf32>
    %519 = arith.truncf %518 : vector<8x8xf32> to vector<8x8xbf16>
    %520 = arith.truncf %509 : vector<8x8xf32> to vector<8x8xbf16>
    %cst_324 = arith.constant dense<0.000000e+00> : vector<8x8xf32>
    %521 = tpu.matmul %519, %520, %cst_324 {dimension_numbers = #tpu.dot_dimension_numbers<[1], [1], [0], [0], [0, 0, 1, 0], [], []>} : vector<8x8xbf16>, vector<8x8xbf16>, vector<8x8xf32> -> vector<8x8xf32>
    %cst_325 = arith.constant 0.000000e+00 : f32
    %522 = vector.broadcast %cst_325 : f32 to vector<8x8xf32>
    %523 = arith.cmpf oeq, %6, %522 : vector<8x8xf32>
    %cst_326 = arith.constant -1.000000e+20 : f32
    %524 = vector.broadcast %cst_326 : f32 to vector<8x8xf32>
    %525 = arith.select %523, %524, %521 : vector<8x8xi1>, vector<8x8xf32>
    %cst_327 = arith.constant dense<0xFF800000> : vector<8xf32>
    %526 = vector.multi_reduction <maximumf>, %525, %cst_327 [1] : vector<8x8xf32> to vector<8xf32>
    %527 = vector.shape_cast %526 : vector<8xf32> to vector<8x1xf32>
    %528 = vector.broadcast %527 : vector<8x1xf32> to vector<8x8xf32>
    %529 = arith.subf %525, %528 : vector<8x8xf32>
    %530 = math.exp %529 : vector<8x8xf32>
    %cst_328 = arith.constant dense<0.000000e+00> : vector<8xf32>
    %531 = vector.multi_reduction <add>, %530, %cst_328 [1] : vector<8x8xf32> to vector<8xf32>
    %532 = vector.shape_cast %531 : vector<8xf32> to vector<8x1xf32>
    %533 = arith.truncf %530 : vector<8x8xf32> to vector<8x8xbf16>
    %534 = arith.truncf %516 : vector<8x8xf32> to vector<8x8xbf16>
    %cst_329 = arith.constant dense<0.000000e+00> : vector<8x8xf32>
    %535 = tpu.matmul %533, %534, %cst_329 {dimension_numbers = #tpu.dot_dimension_numbers<[1], [0], [0], [1], [0, 0, 1, 1], [], []>} : vector<8x8xbf16>, vector<8x8xbf16>, vector<8x8xf32> -> vector<8x8xf32>
    %536 = tpu.reciprocal %532 {approx = true} : vector<8x1xf32> -> vector<8x1xf32>
    %537 = vector.broadcast %536 : vector<8x1xf32> to vector<8x8xf32>
    %538 = arith.mulf %535, %537 : vector<8x8xf32>
    %539 = arith.truncf %538 : vector<8x8xf32> to vector<8x8xbf16>
    %c0_330 = arith.constant 0 : index
    %c0_331 = arith.constant 0 : index
    %c0_332 = arith.constant 0 : index
    %540 = vector.load %arg7[%c0_330, %c0_331, %c0_332] : memref<4x8x32xbf16, #tpu.memory_space<vmem>>, vector<1x8x32xbf16>
    %541 = vector.shape_cast %540 : vector<1x8x32xbf16> to vector<8x32xbf16>
    %cst_333 = arith.constant dense<0.000000e+00> : vector<8x32xf32>
    %542 = tpu.matmul %539, %541, %cst_333 {dimension_numbers = #tpu.dot_dimension_numbers<[1], [0], [0], [1], [0, 0, 1, 1], [], []>} : vector<8x8xbf16>, vector<8x32xbf16>, vector<8x32xf32> -> vector<8x32xf32>
    %543 = arith.addf %495, %542 : vector<8x32xf32>
    %c1_334 = arith.constant 1 : index
    %c0_335 = arith.constant 0 : index
    %c0_336 = arith.constant 0 : index
    %544 = vector.load %arg5[%c1_334, %c0_335, %c0_336] : memref<12x32x8xbf16, #tpu.memory_space<vmem>>, vector<1x32x8xbf16>
    %545 = vector.shape_cast %544 : vector<1x32x8xbf16> to vector<32x8xbf16>
    %cst_337 = arith.constant dense<0.000000e+00> : vector<8x8xf32>
    %546 = tpu.matmul %494, %545, %cst_337 {dimension_numbers = #tpu.dot_dimension_numbers<[1], [0], [0], [1], [0, 0, 1, 1], [], []>} : vector<8x32xbf16>, vector<32x8xbf16>, vector<8x8xf32> -> vector<8x8xf32>
    %c1_338 = arith.constant 1 : index
    %c0_339 = arith.constant 0 : index
    %c0_340 = arith.constant 0 : index
    %547 = vector.load %arg6[%c1_338, %c0_339, %c0_340] : memref<12x1x8xf32, #tpu.memory_space<vmem>>, vector<1x1x8xf32>
    %548 = vector.shape_cast %547 : vector<1x1x8xf32> to vector<1x8xf32>
    %549 = vector.broadcast %548 : vector<1x8xf32> to vector<8x8xf32>
    %550 = arith.addf %546, %549 : vector<8x8xf32>
    %c5_341 = arith.constant 5 : index
    %c0_342 = arith.constant 0 : index
    %c0_343 = arith.constant 0 : index
    %551 = vector.load %arg5[%c5_341, %c0_342, %c0_343] : memref<12x32x8xbf16, #tpu.memory_space<vmem>>, vector<1x32x8xbf16>
    %552 = vector.shape_cast %551 : vector<1x32x8xbf16> to vector<32x8xbf16>
    %cst_344 = arith.constant dense<0.000000e+00> : vector<8x8xf32>
    %553 = tpu.matmul %494, %552, %cst_344 {dimension_numbers = #tpu.dot_dimension_numbers<[1], [0], [0], [1], [0, 0, 1, 1], [], []>} : vector<8x32xbf16>, vector<32x8xbf16>, vector<8x8xf32> -> vector<8x8xf32>
    %c5_345 = arith.constant 5 : index
    %c0_346 = arith.constant 0 : index
    %c0_347 = arith.constant 0 : index
    %554 = vector.load %arg6[%c5_345, %c0_346, %c0_347] : memref<12x1x8xf32, #tpu.memory_space<vmem>>, vector<1x1x8xf32>
    %555 = vector.shape_cast %554 : vector<1x1x8xf32> to vector<1x8xf32>
    %556 = vector.broadcast %555 : vector<1x8xf32> to vector<8x8xf32>
    %557 = arith.addf %553, %556 : vector<8x8xf32>
    %c9_348 = arith.constant 9 : index
    %c0_349 = arith.constant 0 : index
    %c0_350 = arith.constant 0 : index
    %558 = vector.load %arg5[%c9_348, %c0_349, %c0_350] : memref<12x32x8xbf16, #tpu.memory_space<vmem>>, vector<1x32x8xbf16>
    %559 = vector.shape_cast %558 : vector<1x32x8xbf16> to vector<32x8xbf16>
    %cst_351 = arith.constant dense<0.000000e+00> : vector<8x8xf32>
    %560 = tpu.matmul %494, %559, %cst_351 {dimension_numbers = #tpu.dot_dimension_numbers<[1], [0], [0], [1], [0, 0, 1, 1], [], []>} : vector<8x32xbf16>, vector<32x8xbf16>, vector<8x8xf32> -> vector<8x8xf32>
    %c9_352 = arith.constant 9 : index
    %c0_353 = arith.constant 0 : index
    %c0_354 = arith.constant 0 : index
    %561 = vector.load %arg6[%c9_352, %c0_353, %c0_354] : memref<12x1x8xf32, #tpu.memory_space<vmem>>, vector<1x1x8xf32>
    %562 = vector.shape_cast %561 : vector<1x1x8xf32> to vector<1x8xf32>
    %563 = vector.broadcast %562 : vector<1x8xf32> to vector<8x8xf32>
    %564 = arith.addf %560, %563 : vector<8x8xf32>
    %cst_355 = arith.constant 0.176776692 : f32
    %565 = vector.broadcast %cst_355 : f32 to vector<8x8xf32>
    %566 = arith.mulf %550, %565 : vector<8x8xf32>
    %567 = arith.truncf %566 : vector<8x8xf32> to vector<8x8xbf16>
    %568 = arith.truncf %557 : vector<8x8xf32> to vector<8x8xbf16>
    %cst_356 = arith.constant dense<0.000000e+00> : vector<8x8xf32>
    %569 = tpu.matmul %567, %568, %cst_356 {dimension_numbers = #tpu.dot_dimension_numbers<[1], [1], [0], [0], [0, 0, 1, 0], [], []>} : vector<8x8xbf16>, vector<8x8xbf16>, vector<8x8xf32> -> vector<8x8xf32>
    %cst_357 = arith.constant 0.000000e+00 : f32
    %570 = vector.broadcast %cst_357 : f32 to vector<8x8xf32>
    %571 = arith.cmpf oeq, %6, %570 : vector<8x8xf32>
    %cst_358 = arith.constant -1.000000e+20 : f32
    %572 = vector.broadcast %cst_358 : f32 to vector<8x8xf32>
    %573 = arith.select %571, %572, %569 : vector<8x8xi1>, vector<8x8xf32>
    %cst_359 = arith.constant dense<0xFF800000> : vector<8xf32>
    %574 = vector.multi_reduction <maximumf>, %573, %cst_359 [1] : vector<8x8xf32> to vector<8xf32>
    %575 = vector.shape_cast %574 : vector<8xf32> to vector<8x1xf32>
    %576 = vector.broadcast %575 : vector<8x1xf32> to vector<8x8xf32>
    %577 = arith.subf %573, %576 : vector<8x8xf32>
    %578 = math.exp %577 : vector<8x8xf32>
    %cst_360 = arith.constant dense<0.000000e+00> : vector<8xf32>
    %579 = vector.multi_reduction <add>, %578, %cst_360 [1] : vector<8x8xf32> to vector<8xf32>
    %580 = vector.shape_cast %579 : vector<8xf32> to vector<8x1xf32>
    %581 = arith.truncf %578 : vector<8x8xf32> to vector<8x8xbf16>
    %582 = arith.truncf %564 : vector<8x8xf32> to vector<8x8xbf16>
    %cst_361 = arith.constant dense<0.000000e+00> : vector<8x8xf32>
    %583 = tpu.matmul %581, %582, %cst_361 {dimension_numbers = #tpu.dot_dimension_numbers<[1], [0], [0], [1], [0, 0, 1, 1], [], []>} : vector<8x8xbf16>, vector<8x8xbf16>, vector<8x8xf32> -> vector<8x8xf32>
    %584 = tpu.reciprocal %580 {approx = true} : vector<8x1xf32> -> vector<8x1xf32>
    %585 = vector.broadcast %584 : vector<8x1xf32> to vector<8x8xf32>
    %586 = arith.mulf %583, %585 : vector<8x8xf32>
    %587 = arith.truncf %586 : vector<8x8xf32> to vector<8x8xbf16>
    %c1_362 = arith.constant 1 : index
    %c0_363 = arith.constant 0 : index
    %c0_364 = arith.constant 0 : index
    %588 = vector.load %arg7[%c1_362, %c0_363, %c0_364] : memref<4x8x32xbf16, #tpu.memory_space<vmem>>, vector<1x8x32xbf16>
    %589 = vector.shape_cast %588 : vector<1x8x32xbf16> to vector<8x32xbf16>
    %cst_365 = arith.constant dense<0.000000e+00> : vector<8x32xf32>
    %590 = tpu.matmul %587, %589, %cst_365 {dimension_numbers = #tpu.dot_dimension_numbers<[1], [0], [0], [1], [0, 0, 1, 1], [], []>} : vector<8x8xbf16>, vector<8x32xbf16>, vector<8x32xf32> -> vector<8x32xf32>
    %591 = arith.addf %543, %590 : vector<8x32xf32>
    %c2_366 = arith.constant 2 : index
    %c0_367 = arith.constant 0 : index
    %c0_368 = arith.constant 0 : index
    %592 = vector.load %arg5[%c2_366, %c0_367, %c0_368] : memref<12x32x8xbf16, #tpu.memory_space<vmem>>, vector<1x32x8xbf16>
    %593 = vector.shape_cast %592 : vector<1x32x8xbf16> to vector<32x8xbf16>
    %cst_369 = arith.constant dense<0.000000e+00> : vector<8x8xf32>
    %594 = tpu.matmul %494, %593, %cst_369 {dimension_numbers = #tpu.dot_dimension_numbers<[1], [0], [0], [1], [0, 0, 1, 1], [], []>} : vector<8x32xbf16>, vector<32x8xbf16>, vector<8x8xf32> -> vector<8x8xf32>
    %c2_370 = arith.constant 2 : index
    %c0_371 = arith.constant 0 : index
    %c0_372 = arith.constant 0 : index
    %595 = vector.load %arg6[%c2_370, %c0_371, %c0_372] : memref<12x1x8xf32, #tpu.memory_space<vmem>>, vector<1x1x8xf32>
    %596 = vector.shape_cast %595 : vector<1x1x8xf32> to vector<1x8xf32>
    %597 = vector.broadcast %596 : vector<1x8xf32> to vector<8x8xf32>
    %598 = arith.addf %594, %597 : vector<8x8xf32>
    %c6_373 = arith.constant 6 : index
    %c0_374 = arith.constant 0 : index
    %c0_375 = arith.constant 0 : index
    %599 = vector.load %arg5[%c6_373, %c0_374, %c0_375] : memref<12x32x8xbf16, #tpu.memory_space<vmem>>, vector<1x32x8xbf16>
    %600 = vector.shape_cast %599 : vector<1x32x8xbf16> to vector<32x8xbf16>
    %cst_376 = arith.constant dense<0.000000e+00> : vector<8x8xf32>
    %601 = tpu.matmul %494, %600, %cst_376 {dimension_numbers = #tpu.dot_dimension_numbers<[1], [0], [0], [1], [0, 0, 1, 1], [], []>} : vector<8x32xbf16>, vector<32x8xbf16>, vector<8x8xf32> -> vector<8x8xf32>
    %c6_377 = arith.constant 6 : index
    %c0_378 = arith.constant 0 : index
    %c0_379 = arith.constant 0 : index
    %602 = vector.load %arg6[%c6_377, %c0_378, %c0_379] : memref<12x1x8xf32, #tpu.memory_space<vmem>>, vector<1x1x8xf32>
    %603 = vector.shape_cast %602 : vector<1x1x8xf32> to vector<1x8xf32>
    %604 = vector.broadcast %603 : vector<1x8xf32> to vector<8x8xf32>
    %605 = arith.addf %601, %604 : vector<8x8xf32>
    %c10_380 = arith.constant 10 : index
    %c0_381 = arith.constant 0 : index
    %c0_382 = arith.constant 0 : index
    %606 = vector.load %arg5[%c10_380, %c0_381, %c0_382] : memref<12x32x8xbf16, #tpu.memory_space<vmem>>, vector<1x32x8xbf16>
    %607 = vector.shape_cast %606 : vector<1x32x8xbf16> to vector<32x8xbf16>
    %cst_383 = arith.constant dense<0.000000e+00> : vector<8x8xf32>
    %608 = tpu.matmul %494, %607, %cst_383 {dimension_numbers = #tpu.dot_dimension_numbers<[1], [0], [0], [1], [0, 0, 1, 1], [], []>} : vector<8x32xbf16>, vector<32x8xbf16>, vector<8x8xf32> -> vector<8x8xf32>
    %c10_384 = arith.constant 10 : index
    %c0_385 = arith.constant 0 : index
    %c0_386 = arith.constant 0 : index
    %609 = vector.load %arg6[%c10_384, %c0_385, %c0_386] : memref<12x1x8xf32, #tpu.memory_space<vmem>>, vector<1x1x8xf32>
    %610 = vector.shape_cast %609 : vector<1x1x8xf32> to vector<1x8xf32>
    %611 = vector.broadcast %610 : vector<1x8xf32> to vector<8x8xf32>
    %612 = arith.addf %608, %611 : vector<8x8xf32>
    %cst_387 = arith.constant 0.176776692 : f32
    %613 = vector.broadcast %cst_387 : f32 to vector<8x8xf32>
    %614 = arith.mulf %598, %613 : vector<8x8xf32>
    %615 = arith.truncf %614 : vector<8x8xf32> to vector<8x8xbf16>
    %616 = arith.truncf %605 : vector<8x8xf32> to vector<8x8xbf16>
    %cst_388 = arith.constant dense<0.000000e+00> : vector<8x8xf32>
    %617 = tpu.matmul %615, %616, %cst_388 {dimension_numbers = #tpu.dot_dimension_numbers<[1], [1], [0], [0], [0, 0, 1, 0], [], []>} : vector<8x8xbf16>, vector<8x8xbf16>, vector<8x8xf32> -> vector<8x8xf32>
    %cst_389 = arith.constant 0.000000e+00 : f32
    %618 = vector.broadcast %cst_389 : f32 to vector<8x8xf32>
    %619 = arith.cmpf oeq, %6, %618 : vector<8x8xf32>
    %cst_390 = arith.constant -1.000000e+20 : f32
    %620 = vector.broadcast %cst_390 : f32 to vector<8x8xf32>
    %621 = arith.select %619, %620, %617 : vector<8x8xi1>, vector<8x8xf32>
    %cst_391 = arith.constant dense<0xFF800000> : vector<8xf32>
    %622 = vector.multi_reduction <maximumf>, %621, %cst_391 [1] : vector<8x8xf32> to vector<8xf32>
    %623 = vector.shape_cast %622 : vector<8xf32> to vector<8x1xf32>
    %624 = vector.broadcast %623 : vector<8x1xf32> to vector<8x8xf32>
    %625 = arith.subf %621, %624 : vector<8x8xf32>
    %626 = math.exp %625 : vector<8x8xf32>
    %cst_392 = arith.constant dense<0.000000e+00> : vector<8xf32>
    %627 = vector.multi_reduction <add>, %626, %cst_392 [1] : vector<8x8xf32> to vector<8xf32>
    %628 = vector.shape_cast %627 : vector<8xf32> to vector<8x1xf32>
    %629 = arith.truncf %626 : vector<8x8xf32> to vector<8x8xbf16>
    %630 = arith.truncf %612 : vector<8x8xf32> to vector<8x8xbf16>
    %cst_393 = arith.constant dense<0.000000e+00> : vector<8x8xf32>
    %631 = tpu.matmul %629, %630, %cst_393 {dimension_numbers = #tpu.dot_dimension_numbers<[1], [0], [0], [1], [0, 0, 1, 1], [], []>} : vector<8x8xbf16>, vector<8x8xbf16>, vector<8x8xf32> -> vector<8x8xf32>
    %632 = tpu.reciprocal %628 {approx = true} : vector<8x1xf32> -> vector<8x1xf32>
    %633 = vector.broadcast %632 : vector<8x1xf32> to vector<8x8xf32>
    %634 = arith.mulf %631, %633 : vector<8x8xf32>
    %635 = arith.truncf %634 : vector<8x8xf32> to vector<8x8xbf16>
    %c2_394 = arith.constant 2 : index
    %c0_395 = arith.constant 0 : index
    %c0_396 = arith.constant 0 : index
    %636 = vector.load %arg7[%c2_394, %c0_395, %c0_396] : memref<4x8x32xbf16, #tpu.memory_space<vmem>>, vector<1x8x32xbf16>
    %637 = vector.shape_cast %636 : vector<1x8x32xbf16> to vector<8x32xbf16>
    %cst_397 = arith.constant dense<0.000000e+00> : vector<8x32xf32>
    %638 = tpu.matmul %635, %637, %cst_397 {dimension_numbers = #tpu.dot_dimension_numbers<[1], [0], [0], [1], [0, 0, 1, 1], [], []>} : vector<8x8xbf16>, vector<8x32xbf16>, vector<8x32xf32> -> vector<8x32xf32>
    %639 = arith.addf %591, %638 : vector<8x32xf32>
    %c3_398 = arith.constant 3 : index
    %c0_399 = arith.constant 0 : index
    %c0_400 = arith.constant 0 : index
    %640 = vector.load %arg5[%c3_398, %c0_399, %c0_400] : memref<12x32x8xbf16, #tpu.memory_space<vmem>>, vector<1x32x8xbf16>
    %641 = vector.shape_cast %640 : vector<1x32x8xbf16> to vector<32x8xbf16>
    %cst_401 = arith.constant dense<0.000000e+00> : vector<8x8xf32>
    %642 = tpu.matmul %494, %641, %cst_401 {dimension_numbers = #tpu.dot_dimension_numbers<[1], [0], [0], [1], [0, 0, 1, 1], [], []>} : vector<8x32xbf16>, vector<32x8xbf16>, vector<8x8xf32> -> vector<8x8xf32>
    %c3_402 = arith.constant 3 : index
    %c0_403 = arith.constant 0 : index
    %c0_404 = arith.constant 0 : index
    %643 = vector.load %arg6[%c3_402, %c0_403, %c0_404] : memref<12x1x8xf32, #tpu.memory_space<vmem>>, vector<1x1x8xf32>
    %644 = vector.shape_cast %643 : vector<1x1x8xf32> to vector<1x8xf32>
    %645 = vector.broadcast %644 : vector<1x8xf32> to vector<8x8xf32>
    %646 = arith.addf %642, %645 : vector<8x8xf32>
    %c7_405 = arith.constant 7 : index
    %c0_406 = arith.constant 0 : index
    %c0_407 = arith.constant 0 : index
    %647 = vector.load %arg5[%c7_405, %c0_406, %c0_407] : memref<12x32x8xbf16, #tpu.memory_space<vmem>>, vector<1x32x8xbf16>
    %648 = vector.shape_cast %647 : vector<1x32x8xbf16> to vector<32x8xbf16>
    %cst_408 = arith.constant dense<0.000000e+00> : vector<8x8xf32>
    %649 = tpu.matmul %494, %648, %cst_408 {dimension_numbers = #tpu.dot_dimension_numbers<[1], [0], [0], [1], [0, 0, 1, 1], [], []>} : vector<8x32xbf16>, vector<32x8xbf16>, vector<8x8xf32> -> vector<8x8xf32>
    %c7_409 = arith.constant 7 : index
    %c0_410 = arith.constant 0 : index
    %c0_411 = arith.constant 0 : index
    %650 = vector.load %arg6[%c7_409, %c0_410, %c0_411] : memref<12x1x8xf32, #tpu.memory_space<vmem>>, vector<1x1x8xf32>
    %651 = vector.shape_cast %650 : vector<1x1x8xf32> to vector<1x8xf32>
    %652 = vector.broadcast %651 : vector<1x8xf32> to vector<8x8xf32>
    %653 = arith.addf %649, %652 : vector<8x8xf32>
    %c11_412 = arith.constant 11 : index
    %c0_413 = arith.constant 0 : index
    %c0_414 = arith.constant 0 : index
    %654 = vector.load %arg5[%c11_412, %c0_413, %c0_414] : memref<12x32x8xbf16, #tpu.memory_space<vmem>>, vector<1x32x8xbf16>
    %655 = vector.shape_cast %654 : vector<1x32x8xbf16> to vector<32x8xbf16>
    %cst_415 = arith.constant dense<0.000000e+00> : vector<8x8xf32>
    %656 = tpu.matmul %494, %655, %cst_415 {dimension_numbers = #tpu.dot_dimension_numbers<[1], [0], [0], [1], [0, 0, 1, 1], [], []>} : vector<8x32xbf16>, vector<32x8xbf16>, vector<8x8xf32> -> vector<8x8xf32>
    %c11_416 = arith.constant 11 : index
    %c0_417 = arith.constant 0 : index
    %c0_418 = arith.constant 0 : index
    %657 = vector.load %arg6[%c11_416, %c0_417, %c0_418] : memref<12x1x8xf32, #tpu.memory_space<vmem>>, vector<1x1x8xf32>
    %658 = vector.shape_cast %657 : vector<1x1x8xf32> to vector<1x8xf32>
    %659 = vector.broadcast %658 : vector<1x8xf32> to vector<8x8xf32>
    %660 = arith.addf %656, %659 : vector<8x8xf32>
    %cst_419 = arith.constant 0.176776692 : f32
    %661 = vector.broadcast %cst_419 : f32 to vector<8x8xf32>
    %662 = arith.mulf %646, %661 : vector<8x8xf32>
    %663 = arith.truncf %662 : vector<8x8xf32> to vector<8x8xbf16>
    %664 = arith.truncf %653 : vector<8x8xf32> to vector<8x8xbf16>
    %cst_420 = arith.constant dense<0.000000e+00> : vector<8x8xf32>
    %665 = tpu.matmul %663, %664, %cst_420 {dimension_numbers = #tpu.dot_dimension_numbers<[1], [1], [0], [0], [0, 0, 1, 0], [], []>} : vector<8x8xbf16>, vector<8x8xbf16>, vector<8x8xf32> -> vector<8x8xf32>
    %cst_421 = arith.constant 0.000000e+00 : f32
    %666 = vector.broadcast %cst_421 : f32 to vector<8x8xf32>
    %667 = arith.cmpf oeq, %6, %666 : vector<8x8xf32>
    %cst_422 = arith.constant -1.000000e+20 : f32
    %668 = vector.broadcast %cst_422 : f32 to vector<8x8xf32>
    %669 = arith.select %667, %668, %665 : vector<8x8xi1>, vector<8x8xf32>
    %cst_423 = arith.constant dense<0xFF800000> : vector<8xf32>
    %670 = vector.multi_reduction <maximumf>, %669, %cst_423 [1] : vector<8x8xf32> to vector<8xf32>
    %671 = vector.shape_cast %670 : vector<8xf32> to vector<8x1xf32>
    %672 = vector.broadcast %671 : vector<8x1xf32> to vector<8x8xf32>
    %673 = arith.subf %669, %672 : vector<8x8xf32>
    %674 = math.exp %673 : vector<8x8xf32>
    %cst_424 = arith.constant dense<0.000000e+00> : vector<8xf32>
    %675 = vector.multi_reduction <add>, %674, %cst_424 [1] : vector<8x8xf32> to vector<8xf32>
    %676 = vector.shape_cast %675 : vector<8xf32> to vector<8x1xf32>
    %677 = arith.truncf %674 : vector<8x8xf32> to vector<8x8xbf16>
    %678 = arith.truncf %660 : vector<8x8xf32> to vector<8x8xbf16>
    %cst_425 = arith.constant dense<0.000000e+00> : vector<8x8xf32>
    %679 = tpu.matmul %677, %678, %cst_425 {dimension_numbers = #tpu.dot_dimension_numbers<[1], [0], [0], [1], [0, 0, 1, 1], [], []>} : vector<8x8xbf16>, vector<8x8xbf16>, vector<8x8xf32> -> vector<8x8xf32>
    %680 = tpu.reciprocal %676 {approx = true} : vector<8x1xf32> -> vector<8x1xf32>
    %681 = vector.broadcast %680 : vector<8x1xf32> to vector<8x8xf32>
    %682 = arith.mulf %679, %681 : vector<8x8xf32>
    %683 = arith.truncf %682 : vector<8x8xf32> to vector<8x8xbf16>
    %c3_426 = arith.constant 3 : index
    %c0_427 = arith.constant 0 : index
    %c0_428 = arith.constant 0 : index
    %684 = vector.load %arg7[%c3_426, %c0_427, %c0_428] : memref<4x8x32xbf16, #tpu.memory_space<vmem>>, vector<1x8x32xbf16>
    %685 = vector.shape_cast %684 : vector<1x8x32xbf16> to vector<8x32xbf16>
    %cst_429 = arith.constant dense<0.000000e+00> : vector<8x32xf32>
    %686 = tpu.matmul %683, %685, %cst_429 {dimension_numbers = #tpu.dot_dimension_numbers<[1], [0], [0], [1], [0, 0, 1, 1], [], []>} : vector<8x8xbf16>, vector<8x32xbf16>, vector<8x32xf32> -> vector<8x32xf32>
    %687 = arith.addf %639, %686 : vector<8x32xf32>
    %c0_430 = arith.constant 0 : index
    %c0_431 = arith.constant 0 : index
    %688 = vector.load %arg8[%c0_430, %c0_431] : memref<1x32xf32, #tpu.memory_space<vmem>>, vector<1x32xf32>
    %689 = vector.broadcast %688 : vector<1x32xf32> to vector<8x32xf32>
    %690 = arith.addf %687, %689 : vector<8x32xf32>
    %691 = arith.addf %493, %690 : vector<8x32xf32>
    %cst_432 = arith.constant dense<0.000000e+00> : vector<8xf32>
    %692 = vector.multi_reduction <add>, %691, %cst_432 [1] : vector<8x32xf32> to vector<8xf32>
    %693 = vector.shape_cast %692 : vector<8xf32> to vector<8x1xf32>
    %cst_433 = arith.constant 3.200000e+01 : f32
    %694 = vector.broadcast %cst_433 : f32 to vector<8x1xf32>
    %695 = arith.divf %693, %694 : vector<8x1xf32>
    %696 = vector.broadcast %695 : vector<8x1xf32> to vector<8x32xf32>
    %697 = arith.subf %691, %696 : vector<8x32xf32>
    %698 = arith.mulf %697, %697 : vector<8x32xf32>
    %cst_434 = arith.constant dense<0.000000e+00> : vector<8xf32>
    %699 = vector.multi_reduction <add>, %698, %cst_434 [1] : vector<8x32xf32> to vector<8xf32>
    %700 = vector.shape_cast %699 : vector<8xf32> to vector<8x1xf32>
    %cst_435 = arith.constant 3.200000e+01 : f32
    %701 = vector.broadcast %cst_435 : f32 to vector<8x1xf32>
    %702 = arith.divf %700, %701 : vector<8x1xf32>
    %cst_436 = arith.constant 9.99999974E-6 : f32
    %703 = vector.broadcast %cst_436 : f32 to vector<8x1xf32>
    %704 = arith.addf %702, %703 : vector<8x1xf32>
    %705 = math.rsqrt %704 : vector<8x1xf32>
    %706 = vector.broadcast %705 : vector<8x1xf32> to vector<8x32xf32>
    %707 = arith.mulf %697, %706 : vector<8x32xf32>
    %c0_437 = arith.constant 0 : index
    %c0_438 = arith.constant 0 : index
    %708 = vector.load %arg9[%c0_437, %c0_438] : memref<1x32xf32, #tpu.memory_space<vmem>>, vector<1x32xf32>
    %709 = vector.broadcast %708 : vector<1x32xf32> to vector<8x32xf32>
    %710 = arith.mulf %707, %709 : vector<8x32xf32>
    %c0_439 = arith.constant 0 : index
    %c0_440 = arith.constant 0 : index
    %711 = vector.load %arg10[%c0_439, %c0_440] : memref<1x32xf32, #tpu.memory_space<vmem>>, vector<1x32xf32>
    %712 = vector.broadcast %711 : vector<1x32xf32> to vector<8x32xf32>
    %713 = arith.addf %710, %712 : vector<8x32xf32>
    %714 = arith.truncf %713 : vector<8x32xf32> to vector<8x32xbf16>
    %cst_441 = arith.constant 0.000000e+00 : f32
    %715 = vector.broadcast %cst_441 : f32 to vector<8x32xf32>
    %c0_442 = arith.constant 0 : index
    %c0_443 = arith.constant 0 : index
    %c0_444 = arith.constant 0 : index
    %716 = vector.load %arg11[%c0_442, %c0_443, %c0_444] : memref<12x32x8xbf16, #tpu.memory_space<vmem>>, vector<1x32x8xbf16>
    %717 = vector.shape_cast %716 : vector<1x32x8xbf16> to vector<32x8xbf16>
    %cst_445 = arith.constant dense<0.000000e+00> : vector<8x8xf32>
    %718 = tpu.matmul %714, %717, %cst_445 {dimension_numbers = #tpu.dot_dimension_numbers<[1], [0], [0], [1], [0, 0, 1, 1], [], []>} : vector<8x32xbf16>, vector<32x8xbf16>, vector<8x8xf32> -> vector<8x8xf32>
    %c0_446 = arith.constant 0 : index
    %c0_447 = arith.constant 0 : index
    %c0_448 = arith.constant 0 : index
    %719 = vector.load %arg12[%c0_446, %c0_447, %c0_448] : memref<12x1x8xf32, #tpu.memory_space<vmem>>, vector<1x1x8xf32>
    %720 = vector.shape_cast %719 : vector<1x1x8xf32> to vector<1x8xf32>
    %721 = vector.broadcast %720 : vector<1x8xf32> to vector<8x8xf32>
    %722 = arith.addf %718, %721 : vector<8x8xf32>
    %c4_449 = arith.constant 4 : index
    %c0_450 = arith.constant 0 : index
    %c0_451 = arith.constant 0 : index
    %723 = vector.load %arg11[%c4_449, %c0_450, %c0_451] : memref<12x32x8xbf16, #tpu.memory_space<vmem>>, vector<1x32x8xbf16>
    %724 = vector.shape_cast %723 : vector<1x32x8xbf16> to vector<32x8xbf16>
    %cst_452 = arith.constant dense<0.000000e+00> : vector<8x8xf32>
    %725 = tpu.matmul %4, %724, %cst_452 {dimension_numbers = #tpu.dot_dimension_numbers<[1], [0], [0], [1], [0, 0, 1, 1], [], []>} : vector<8x32xbf16>, vector<32x8xbf16>, vector<8x8xf32> -> vector<8x8xf32>
    %c4_453 = arith.constant 4 : index
    %c0_454 = arith.constant 0 : index
    %c0_455 = arith.constant 0 : index
    %726 = vector.load %arg12[%c4_453, %c0_454, %c0_455] : memref<12x1x8xf32, #tpu.memory_space<vmem>>, vector<1x1x8xf32>
    %727 = vector.shape_cast %726 : vector<1x1x8xf32> to vector<1x8xf32>
    %728 = vector.broadcast %727 : vector<1x8xf32> to vector<8x8xf32>
    %729 = arith.addf %725, %728 : vector<8x8xf32>
    %c8_456 = arith.constant 8 : index
    %c0_457 = arith.constant 0 : index
    %c0_458 = arith.constant 0 : index
    %730 = vector.load %arg11[%c8_456, %c0_457, %c0_458] : memref<12x32x8xbf16, #tpu.memory_space<vmem>>, vector<1x32x8xbf16>
    %731 = vector.shape_cast %730 : vector<1x32x8xbf16> to vector<32x8xbf16>
    %cst_459 = arith.constant dense<0.000000e+00> : vector<8x8xf32>
    %732 = tpu.matmul %4, %731, %cst_459 {dimension_numbers = #tpu.dot_dimension_numbers<[1], [0], [0], [1], [0, 0, 1, 1], [], []>} : vector<8x32xbf16>, vector<32x8xbf16>, vector<8x8xf32> -> vector<8x8xf32>
    %c8_460 = arith.constant 8 : index
    %c0_461 = arith.constant 0 : index
    %c0_462 = arith.constant 0 : index
    %733 = vector.load %arg12[%c8_460, %c0_461, %c0_462] : memref<12x1x8xf32, #tpu.memory_space<vmem>>, vector<1x1x8xf32>
    %734 = vector.shape_cast %733 : vector<1x1x8xf32> to vector<1x8xf32>
    %735 = vector.broadcast %734 : vector<1x8xf32> to vector<8x8xf32>
    %736 = arith.addf %732, %735 : vector<8x8xf32>
    %cst_463 = arith.constant 0.176776692 : f32
    %737 = vector.broadcast %cst_463 : f32 to vector<8x8xf32>
    %738 = arith.mulf %722, %737 : vector<8x8xf32>
    %739 = arith.truncf %738 : vector<8x8xf32> to vector<8x8xbf16>
    %740 = arith.truncf %729 : vector<8x8xf32> to vector<8x8xbf16>
    %cst_464 = arith.constant dense<0.000000e+00> : vector<8x8xf32>
    %741 = tpu.matmul %739, %740, %cst_464 {dimension_numbers = #tpu.dot_dimension_numbers<[1], [1], [0], [0], [0, 0, 1, 0], [], []>} : vector<8x8xbf16>, vector<8x8xbf16>, vector<8x8xf32> -> vector<8x8xf32>
    %cst_465 = arith.constant 0.000000e+00 : f32
    %742 = vector.broadcast %cst_465 : f32 to vector<1x8xf32>
    %743 = arith.cmpf oeq, %8, %742 : vector<1x8xf32>
    %cst_466 = arith.constant -1.000000e+20 : f32
    %744 = vector.shape_cast %743 : vector<1x8xi1> to vector<1x8xi1>
    %745 = vector.broadcast %744 : vector<1x8xi1> to vector<8x8xi1>
    %746 = vector.broadcast %cst_466 : f32 to vector<8x8xf32>
    %747 = arith.select %745, %746, %741 : vector<8x8xi1>, vector<8x8xf32>
    %cst_467 = arith.constant dense<0xFF800000> : vector<8xf32>
    %748 = vector.multi_reduction <maximumf>, %747, %cst_467 [1] : vector<8x8xf32> to vector<8xf32>
    %749 = vector.shape_cast %748 : vector<8xf32> to vector<8x1xf32>
    %750 = vector.broadcast %749 : vector<8x1xf32> to vector<8x8xf32>
    %751 = arith.subf %747, %750 : vector<8x8xf32>
    %752 = math.exp %751 : vector<8x8xf32>
    %cst_468 = arith.constant dense<0.000000e+00> : vector<8xf32>
    %753 = vector.multi_reduction <add>, %752, %cst_468 [1] : vector<8x8xf32> to vector<8xf32>
    %754 = vector.shape_cast %753 : vector<8xf32> to vector<8x1xf32>
    %755 = arith.truncf %752 : vector<8x8xf32> to vector<8x8xbf16>
    %756 = arith.truncf %736 : vector<8x8xf32> to vector<8x8xbf16>
    %cst_469 = arith.constant dense<0.000000e+00> : vector<8x8xf32>
    %757 = tpu.matmul %755, %756, %cst_469 {dimension_numbers = #tpu.dot_dimension_numbers<[1], [0], [0], [1], [0, 0, 1, 1], [], []>} : vector<8x8xbf16>, vector<8x8xbf16>, vector<8x8xf32> -> vector<8x8xf32>
    %758 = tpu.reciprocal %754 {approx = true} : vector<8x1xf32> -> vector<8x1xf32>
    %759 = vector.broadcast %758 : vector<8x1xf32> to vector<8x8xf32>
    %760 = arith.mulf %757, %759 : vector<8x8xf32>
    %761 = arith.truncf %760 : vector<8x8xf32> to vector<8x8xbf16>
    %c0_470 = arith.constant 0 : index
    %c0_471 = arith.constant 0 : index
    %c0_472 = arith.constant 0 : index
    %762 = vector.load %arg13[%c0_470, %c0_471, %c0_472] : memref<4x8x32xbf16, #tpu.memory_space<vmem>>, vector<1x8x32xbf16>
    %763 = vector.shape_cast %762 : vector<1x8x32xbf16> to vector<8x32xbf16>
    %cst_473 = arith.constant dense<0.000000e+00> : vector<8x32xf32>
    %764 = tpu.matmul %761, %763, %cst_473 {dimension_numbers = #tpu.dot_dimension_numbers<[1], [0], [0], [1], [0, 0, 1, 1], [], []>} : vector<8x8xbf16>, vector<8x32xbf16>, vector<8x32xf32> -> vector<8x32xf32>
    %765 = arith.addf %715, %764 : vector<8x32xf32>
    %c1_474 = arith.constant 1 : index
    %c0_475 = arith.constant 0 : index
    %c0_476 = arith.constant 0 : index
    %766 = vector.load %arg11[%c1_474, %c0_475, %c0_476] : memref<12x32x8xbf16, #tpu.memory_space<vmem>>, vector<1x32x8xbf16>
    %767 = vector.shape_cast %766 : vector<1x32x8xbf16> to vector<32x8xbf16>
    %cst_477 = arith.constant dense<0.000000e+00> : vector<8x8xf32>
    %768 = tpu.matmul %714, %767, %cst_477 {dimension_numbers = #tpu.dot_dimension_numbers<[1], [0], [0], [1], [0, 0, 1, 1], [], []>} : vector<8x32xbf16>, vector<32x8xbf16>, vector<8x8xf32> -> vector<8x8xf32>
    %c1_478 = arith.constant 1 : index
    %c0_479 = arith.constant 0 : index
    %c0_480 = arith.constant 0 : index
    %769 = vector.load %arg12[%c1_478, %c0_479, %c0_480] : memref<12x1x8xf32, #tpu.memory_space<vmem>>, vector<1x1x8xf32>
    %770 = vector.shape_cast %769 : vector<1x1x8xf32> to vector<1x8xf32>
    %771 = vector.broadcast %770 : vector<1x8xf32> to vector<8x8xf32>
    %772 = arith.addf %768, %771 : vector<8x8xf32>
    %c5_481 = arith.constant 5 : index
    %c0_482 = arith.constant 0 : index
    %c0_483 = arith.constant 0 : index
    %773 = vector.load %arg11[%c5_481, %c0_482, %c0_483] : memref<12x32x8xbf16, #tpu.memory_space<vmem>>, vector<1x32x8xbf16>
    %774 = vector.shape_cast %773 : vector<1x32x8xbf16> to vector<32x8xbf16>
    %cst_484 = arith.constant dense<0.000000e+00> : vector<8x8xf32>
    %775 = tpu.matmul %4, %774, %cst_484 {dimension_numbers = #tpu.dot_dimension_numbers<[1], [0], [0], [1], [0, 0, 1, 1], [], []>} : vector<8x32xbf16>, vector<32x8xbf16>, vector<8x8xf32> -> vector<8x8xf32>
    %c5_485 = arith.constant 5 : index
    %c0_486 = arith.constant 0 : index
    %c0_487 = arith.constant 0 : index
    %776 = vector.load %arg12[%c5_485, %c0_486, %c0_487] : memref<12x1x8xf32, #tpu.memory_space<vmem>>, vector<1x1x8xf32>
    %777 = vector.shape_cast %776 : vector<1x1x8xf32> to vector<1x8xf32>
    %778 = vector.broadcast %777 : vector<1x8xf32> to vector<8x8xf32>
    %779 = arith.addf %775, %778 : vector<8x8xf32>
    %c9_488 = arith.constant 9 : index
    %c0_489 = arith.constant 0 : index
    %c0_490 = arith.constant 0 : index
    %780 = vector.load %arg11[%c9_488, %c0_489, %c0_490] : memref<12x32x8xbf16, #tpu.memory_space<vmem>>, vector<1x32x8xbf16>
    %781 = vector.shape_cast %780 : vector<1x32x8xbf16> to vector<32x8xbf16>
    %cst_491 = arith.constant dense<0.000000e+00> : vector<8x8xf32>
    %782 = tpu.matmul %4, %781, %cst_491 {dimension_numbers = #tpu.dot_dimension_numbers<[1], [0], [0], [1], [0, 0, 1, 1], [], []>} : vector<8x32xbf16>, vector<32x8xbf16>, vector<8x8xf32> -> vector<8x8xf32>
    %c9_492 = arith.constant 9 : index
    %c0_493 = arith.constant 0 : index
    %c0_494 = arith.constant 0 : index
    %783 = vector.load %arg12[%c9_492, %c0_493, %c0_494] : memref<12x1x8xf32, #tpu.memory_space<vmem>>, vector<1x1x8xf32>
    %784 = vector.shape_cast %783 : vector<1x1x8xf32> to vector<1x8xf32>
    %785 = vector.broadcast %784 : vector<1x8xf32> to vector<8x8xf32>
    %786 = arith.addf %782, %785 : vector<8x8xf32>
    %cst_495 = arith.constant 0.176776692 : f32
    %787 = vector.broadcast %cst_495 : f32 to vector<8x8xf32>
    %788 = arith.mulf %772, %787 : vector<8x8xf32>
    %789 = arith.truncf %788 : vector<8x8xf32> to vector<8x8xbf16>
    %790 = arith.truncf %779 : vector<8x8xf32> to vector<8x8xbf16>
    %cst_496 = arith.constant dense<0.000000e+00> : vector<8x8xf32>
    %791 = tpu.matmul %789, %790, %cst_496 {dimension_numbers = #tpu.dot_dimension_numbers<[1], [1], [0], [0], [0, 0, 1, 0], [], []>} : vector<8x8xbf16>, vector<8x8xbf16>, vector<8x8xf32> -> vector<8x8xf32>
    %cst_497 = arith.constant 0.000000e+00 : f32
    %792 = vector.broadcast %cst_497 : f32 to vector<1x8xf32>
    %793 = arith.cmpf oeq, %8, %792 : vector<1x8xf32>
    %cst_498 = arith.constant -1.000000e+20 : f32
    %794 = vector.shape_cast %793 : vector<1x8xi1> to vector<1x8xi1>
    %795 = vector.broadcast %794 : vector<1x8xi1> to vector<8x8xi1>
    %796 = vector.broadcast %cst_498 : f32 to vector<8x8xf32>
    %797 = arith.select %795, %796, %791 : vector<8x8xi1>, vector<8x8xf32>
    %cst_499 = arith.constant dense<0xFF800000> : vector<8xf32>
    %798 = vector.multi_reduction <maximumf>, %797, %cst_499 [1] : vector<8x8xf32> to vector<8xf32>
    %799 = vector.shape_cast %798 : vector<8xf32> to vector<8x1xf32>
    %800 = vector.broadcast %799 : vector<8x1xf32> to vector<8x8xf32>
    %801 = arith.subf %797, %800 : vector<8x8xf32>
    %802 = math.exp %801 : vector<8x8xf32>
    %cst_500 = arith.constant dense<0.000000e+00> : vector<8xf32>
    %803 = vector.multi_reduction <add>, %802, %cst_500 [1] : vector<8x8xf32> to vector<8xf32>
    %804 = vector.shape_cast %803 : vector<8xf32> to vector<8x1xf32>
    %805 = arith.truncf %802 : vector<8x8xf32> to vector<8x8xbf16>
    %806 = arith.truncf %786 : vector<8x8xf32> to vector<8x8xbf16>
    %cst_501 = arith.constant dense<0.000000e+00> : vector<8x8xf32>
    %807 = tpu.matmul %805, %806, %cst_501 {dimension_numbers = #tpu.dot_dimension_numbers<[1], [0], [0], [1], [0, 0, 1, 1], [], []>} : vector<8x8xbf16>, vector<8x8xbf16>, vector<8x8xf32> -> vector<8x8xf32>
    %808 = tpu.reciprocal %804 {approx = true} : vector<8x1xf32> -> vector<8x1xf32>
    %809 = vector.broadcast %808 : vector<8x1xf32> to vector<8x8xf32>
    %810 = arith.mulf %807, %809 : vector<8x8xf32>
    %811 = arith.truncf %810 : vector<8x8xf32> to vector<8x8xbf16>
    %c1_502 = arith.constant 1 : index
    %c0_503 = arith.constant 0 : index
    %c0_504 = arith.constant 0 : index
    %812 = vector.load %arg13[%c1_502, %c0_503, %c0_504] : memref<4x8x32xbf16, #tpu.memory_space<vmem>>, vector<1x8x32xbf16>
    %813 = vector.shape_cast %812 : vector<1x8x32xbf16> to vector<8x32xbf16>
    %cst_505 = arith.constant dense<0.000000e+00> : vector<8x32xf32>
    %814 = tpu.matmul %811, %813, %cst_505 {dimension_numbers = #tpu.dot_dimension_numbers<[1], [0], [0], [1], [0, 0, 1, 1], [], []>} : vector<8x8xbf16>, vector<8x32xbf16>, vector<8x32xf32> -> vector<8x32xf32>
    %815 = arith.addf %765, %814 : vector<8x32xf32>
    %c2_506 = arith.constant 2 : index
    %c0_507 = arith.constant 0 : index
    %c0_508 = arith.constant 0 : index
    %816 = vector.load %arg11[%c2_506, %c0_507, %c0_508] : memref<12x32x8xbf16, #tpu.memory_space<vmem>>, vector<1x32x8xbf16>
    %817 = vector.shape_cast %816 : vector<1x32x8xbf16> to vector<32x8xbf16>
    %cst_509 = arith.constant dense<0.000000e+00> : vector<8x8xf32>
    %818 = tpu.matmul %714, %817, %cst_509 {dimension_numbers = #tpu.dot_dimension_numbers<[1], [0], [0], [1], [0, 0, 1, 1], [], []>} : vector<8x32xbf16>, vector<32x8xbf16>, vector<8x8xf32> -> vector<8x8xf32>
    %c2_510 = arith.constant 2 : index
    %c0_511 = arith.constant 0 : index
    %c0_512 = arith.constant 0 : index
    %819 = vector.load %arg12[%c2_510, %c0_511, %c0_512] : memref<12x1x8xf32, #tpu.memory_space<vmem>>, vector<1x1x8xf32>
    %820 = vector.shape_cast %819 : vector<1x1x8xf32> to vector<1x8xf32>
    %821 = vector.broadcast %820 : vector<1x8xf32> to vector<8x8xf32>
    %822 = arith.addf %818, %821 : vector<8x8xf32>
    %c6_513 = arith.constant 6 : index
    %c0_514 = arith.constant 0 : index
    %c0_515 = arith.constant 0 : index
    %823 = vector.load %arg11[%c6_513, %c0_514, %c0_515] : memref<12x32x8xbf16, #tpu.memory_space<vmem>>, vector<1x32x8xbf16>
    %824 = vector.shape_cast %823 : vector<1x32x8xbf16> to vector<32x8xbf16>
    %cst_516 = arith.constant dense<0.000000e+00> : vector<8x8xf32>
    %825 = tpu.matmul %4, %824, %cst_516 {dimension_numbers = #tpu.dot_dimension_numbers<[1], [0], [0], [1], [0, 0, 1, 1], [], []>} : vector<8x32xbf16>, vector<32x8xbf16>, vector<8x8xf32> -> vector<8x8xf32>
    %c6_517 = arith.constant 6 : index
    %c0_518 = arith.constant 0 : index
    %c0_519 = arith.constant 0 : index
    %826 = vector.load %arg12[%c6_517, %c0_518, %c0_519] : memref<12x1x8xf32, #tpu.memory_space<vmem>>, vector<1x1x8xf32>
    %827 = vector.shape_cast %826 : vector<1x1x8xf32> to vector<1x8xf32>
    %828 = vector.broadcast %827 : vector<1x8xf32> to vector<8x8xf32>
    %829 = arith.addf %825, %828 : vector<8x8xf32>
    %c10_520 = arith.constant 10 : index
    %c0_521 = arith.constant 0 : index
    %c0_522 = arith.constant 0 : index
    %830 = vector.load %arg11[%c10_520, %c0_521, %c0_522] : memref<12x32x8xbf16, #tpu.memory_space<vmem>>, vector<1x32x8xbf16>
    %831 = vector.shape_cast %830 : vector<1x32x8xbf16> to vector<32x8xbf16>
    %cst_523 = arith.constant dense<0.000000e+00> : vector<8x8xf32>
    %832 = tpu.matmul %4, %831, %cst_523 {dimension_numbers = #tpu.dot_dimension_numbers<[1], [0], [0], [1], [0, 0, 1, 1], [], []>} : vector<8x32xbf16>, vector<32x8xbf16>, vector<8x8xf32> -> vector<8x8xf32>
    %c10_524 = arith.constant 10 : index
    %c0_525 = arith.constant 0 : index
    %c0_526 = arith.constant 0 : index
    %833 = vector.load %arg12[%c10_524, %c0_525, %c0_526] : memref<12x1x8xf32, #tpu.memory_space<vmem>>, vector<1x1x8xf32>
    %834 = vector.shape_cast %833 : vector<1x1x8xf32> to vector<1x8xf32>
    %835 = vector.broadcast %834 : vector<1x8xf32> to vector<8x8xf32>
    %836 = arith.addf %832, %835 : vector<8x8xf32>
    %cst_527 = arith.constant 0.176776692 : f32
    %837 = vector.broadcast %cst_527 : f32 to vector<8x8xf32>
    %838 = arith.mulf %822, %837 : vector<8x8xf32>
    %839 = arith.truncf %838 : vector<8x8xf32> to vector<8x8xbf16>
    %840 = arith.truncf %829 : vector<8x8xf32> to vector<8x8xbf16>
    %cst_528 = arith.constant dense<0.000000e+00> : vector<8x8xf32>
    %841 = tpu.matmul %839, %840, %cst_528 {dimension_numbers = #tpu.dot_dimension_numbers<[1], [1], [0], [0], [0, 0, 1, 0], [], []>} : vector<8x8xbf16>, vector<8x8xbf16>, vector<8x8xf32> -> vector<8x8xf32>
    %cst_529 = arith.constant 0.000000e+00 : f32
    %842 = vector.broadcast %cst_529 : f32 to vector<1x8xf32>
    %843 = arith.cmpf oeq, %8, %842 : vector<1x8xf32>
    %cst_530 = arith.constant -1.000000e+20 : f32
    %844 = vector.shape_cast %843 : vector<1x8xi1> to vector<1x8xi1>
    %845 = vector.broadcast %844 : vector<1x8xi1> to vector<8x8xi1>
    %846 = vector.broadcast %cst_530 : f32 to vector<8x8xf32>
    %847 = arith.select %845, %846, %841 : vector<8x8xi1>, vector<8x8xf32>
    %cst_531 = arith.constant dense<0xFF800000> : vector<8xf32>
    %848 = vector.multi_reduction <maximumf>, %847, %cst_531 [1] : vector<8x8xf32> to vector<8xf32>
    %849 = vector.shape_cast %848 : vector<8xf32> to vector<8x1xf32>
    %850 = vector.broadcast %849 : vector<8x1xf32> to vector<8x8xf32>
    %851 = arith.subf %847, %850 : vector<8x8xf32>
    %852 = math.exp %851 : vector<8x8xf32>
    %cst_532 = arith.constant dense<0.000000e+00> : vector<8xf32>
    %853 = vector.multi_reduction <add>, %852, %cst_532 [1] : vector<8x8xf32> to vector<8xf32>
    %854 = vector.shape_cast %853 : vector<8xf32> to vector<8x1xf32>
    %855 = arith.truncf %852 : vector<8x8xf32> to vector<8x8xbf16>
    %856 = arith.truncf %836 : vector<8x8xf32> to vector<8x8xbf16>
    %cst_533 = arith.constant dense<0.000000e+00> : vector<8x8xf32>
    %857 = tpu.matmul %855, %856, %cst_533 {dimension_numbers = #tpu.dot_dimension_numbers<[1], [0], [0], [1], [0, 0, 1, 1], [], []>} : vector<8x8xbf16>, vector<8x8xbf16>, vector<8x8xf32> -> vector<8x8xf32>
    %858 = tpu.reciprocal %854 {approx = true} : vector<8x1xf32> -> vector<8x1xf32>
    %859 = vector.broadcast %858 : vector<8x1xf32> to vector<8x8xf32>
    %860 = arith.mulf %857, %859 : vector<8x8xf32>
    %861 = arith.truncf %860 : vector<8x8xf32> to vector<8x8xbf16>
    %c2_534 = arith.constant 2 : index
    %c0_535 = arith.constant 0 : index
    %c0_536 = arith.constant 0 : index
    %862 = vector.load %arg13[%c2_534, %c0_535, %c0_536] : memref<4x8x32xbf16, #tpu.memory_space<vmem>>, vector<1x8x32xbf16>
    %863 = vector.shape_cast %862 : vector<1x8x32xbf16> to vector<8x32xbf16>
    %cst_537 = arith.constant dense<0.000000e+00> : vector<8x32xf32>
    %864 = tpu.matmul %861, %863, %cst_537 {dimension_numbers = #tpu.dot_dimension_numbers<[1], [0], [0], [1], [0, 0, 1, 1], [], []>} : vector<8x8xbf16>, vector<8x32xbf16>, vector<8x32xf32> -> vector<8x32xf32>
    %865 = arith.addf %815, %864 : vector<8x32xf32>
    %c3_538 = arith.constant 3 : index
    %c0_539 = arith.constant 0 : index
    %c0_540 = arith.constant 0 : index
    %866 = vector.load %arg11[%c3_538, %c0_539, %c0_540] : memref<12x32x8xbf16, #tpu.memory_space<vmem>>, vector<1x32x8xbf16>
    %867 = vector.shape_cast %866 : vector<1x32x8xbf16> to vector<32x8xbf16>
    %cst_541 = arith.constant dense<0.000000e+00> : vector<8x8xf32>
    %868 = tpu.matmul %714, %867, %cst_541 {dimension_numbers = #tpu.dot_dimension_numbers<[1], [0], [0], [1], [0, 0, 1, 1], [], []>} : vector<8x32xbf16>, vector<32x8xbf16>, vector<8x8xf32> -> vector<8x8xf32>
    %c3_542 = arith.constant 3 : index
    %c0_543 = arith.constant 0 : index
    %c0_544 = arith.constant 0 : index
    %869 = vector.load %arg12[%c3_542, %c0_543, %c0_544] : memref<12x1x8xf32, #tpu.memory_space<vmem>>, vector<1x1x8xf32>
    %870 = vector.shape_cast %869 : vector<1x1x8xf32> to vector<1x8xf32>
    %871 = vector.broadcast %870 : vector<1x8xf32> to vector<8x8xf32>
    %872 = arith.addf %868, %871 : vector<8x8xf32>
    %c7_545 = arith.constant 7 : index
    %c0_546 = arith.constant 0 : index
    %c0_547 = arith.constant 0 : index
    %873 = vector.load %arg11[%c7_545, %c0_546, %c0_547] : memref<12x32x8xbf16, #tpu.memory_space<vmem>>, vector<1x32x8xbf16>
    %874 = vector.shape_cast %873 : vector<1x32x8xbf16> to vector<32x8xbf16>
    %cst_548 = arith.constant dense<0.000000e+00> : vector<8x8xf32>
    %875 = tpu.matmul %4, %874, %cst_548 {dimension_numbers = #tpu.dot_dimension_numbers<[1], [0], [0], [1], [0, 0, 1, 1], [], []>} : vector<8x32xbf16>, vector<32x8xbf16>, vector<8x8xf32> -> vector<8x8xf32>
    %c7_549 = arith.constant 7 : index
    %c0_550 = arith.constant 0 : index
    %c0_551 = arith.constant 0 : index
    %876 = vector.load %arg12[%c7_549, %c0_550, %c0_551] : memref<12x1x8xf32, #tpu.memory_space<vmem>>, vector<1x1x8xf32>
    %877 = vector.shape_cast %876 : vector<1x1x8xf32> to vector<1x8xf32>
    %878 = vector.broadcast %877 : vector<1x8xf32> to vector<8x8xf32>
    %879 = arith.addf %875, %878 : vector<8x8xf32>
    %c11_552 = arith.constant 11 : index
    %c0_553 = arith.constant 0 : index
    %c0_554 = arith.constant 0 : index
    %880 = vector.load %arg11[%c11_552, %c0_553, %c0_554] : memref<12x32x8xbf16, #tpu.memory_space<vmem>>, vector<1x32x8xbf16>
    %881 = vector.shape_cast %880 : vector<1x32x8xbf16> to vector<32x8xbf16>
    %cst_555 = arith.constant dense<0.000000e+00> : vector<8x8xf32>
    %882 = tpu.matmul %4, %881, %cst_555 {dimension_numbers = #tpu.dot_dimension_numbers<[1], [0], [0], [1], [0, 0, 1, 1], [], []>} : vector<8x32xbf16>, vector<32x8xbf16>, vector<8x8xf32> -> vector<8x8xf32>
    %c11_556 = arith.constant 11 : index
    %c0_557 = arith.constant 0 : index
    %c0_558 = arith.constant 0 : index
    %883 = vector.load %arg12[%c11_556, %c0_557, %c0_558] : memref<12x1x8xf32, #tpu.memory_space<vmem>>, vector<1x1x8xf32>
    %884 = vector.shape_cast %883 : vector<1x1x8xf32> to vector<1x8xf32>
    %885 = vector.broadcast %884 : vector<1x8xf32> to vector<8x8xf32>
    %886 = arith.addf %882, %885 : vector<8x8xf32>
    %cst_559 = arith.constant 0.176776692 : f32
    %887 = vector.broadcast %cst_559 : f32 to vector<8x8xf32>
    %888 = arith.mulf %872, %887 : vector<8x8xf32>
    %889 = arith.truncf %888 : vector<8x8xf32> to vector<8x8xbf16>
    %890 = arith.truncf %879 : vector<8x8xf32> to vector<8x8xbf16>
    %cst_560 = arith.constant dense<0.000000e+00> : vector<8x8xf32>
    %891 = tpu.matmul %889, %890, %cst_560 {dimension_numbers = #tpu.dot_dimension_numbers<[1], [1], [0], [0], [0, 0, 1, 0], [], []>} : vector<8x8xbf16>, vector<8x8xbf16>, vector<8x8xf32> -> vector<8x8xf32>
    %cst_561 = arith.constant 0.000000e+00 : f32
    %892 = vector.broadcast %cst_561 : f32 to vector<1x8xf32>
    %893 = arith.cmpf oeq, %8, %892 : vector<1x8xf32>
    %cst_562 = arith.constant -1.000000e+20 : f32
    %894 = vector.shape_cast %893 : vector<1x8xi1> to vector<1x8xi1>
    %895 = vector.broadcast %894 : vector<1x8xi1> to vector<8x8xi1>
    %896 = vector.broadcast %cst_562 : f32 to vector<8x8xf32>
    %897 = arith.select %895, %896, %891 : vector<8x8xi1>, vector<8x8xf32>
    %cst_563 = arith.constant dense<0xFF800000> : vector<8xf32>
    %898 = vector.multi_reduction <maximumf>, %897, %cst_563 [1] : vector<8x8xf32> to vector<8xf32>
    %899 = vector.shape_cast %898 : vector<8xf32> to vector<8x1xf32>
    %900 = vector.broadcast %899 : vector<8x1xf32> to vector<8x8xf32>
    %901 = arith.subf %897, %900 : vector<8x8xf32>
    %902 = math.exp %901 : vector<8x8xf32>
    %cst_564 = arith.constant dense<0.000000e+00> : vector<8xf32>
    %903 = vector.multi_reduction <add>, %902, %cst_564 [1] : vector<8x8xf32> to vector<8xf32>
    %904 = vector.shape_cast %903 : vector<8xf32> to vector<8x1xf32>
    %905 = arith.truncf %902 : vector<8x8xf32> to vector<8x8xbf16>
    %906 = arith.truncf %886 : vector<8x8xf32> to vector<8x8xbf16>
    %cst_565 = arith.constant dense<0.000000e+00> : vector<8x8xf32>
    %907 = tpu.matmul %905, %906, %cst_565 {dimension_numbers = #tpu.dot_dimension_numbers<[1], [0], [0], [1], [0, 0, 1, 1], [], []>} : vector<8x8xbf16>, vector<8x8xbf16>, vector<8x8xf32> -> vector<8x8xf32>
    %908 = tpu.reciprocal %904 {approx = true} : vector<8x1xf32> -> vector<8x1xf32>
    %909 = vector.broadcast %908 : vector<8x1xf32> to vector<8x8xf32>
    %910 = arith.mulf %907, %909 : vector<8x8xf32>
    %911 = arith.truncf %910 : vector<8x8xf32> to vector<8x8xbf16>
    %c3_566 = arith.constant 3 : index
    %c0_567 = arith.constant 0 : index
    %c0_568 = arith.constant 0 : index
    %912 = vector.load %arg13[%c3_566, %c0_567, %c0_568] : memref<4x8x32xbf16, #tpu.memory_space<vmem>>, vector<1x8x32xbf16>
    %913 = vector.shape_cast %912 : vector<1x8x32xbf16> to vector<8x32xbf16>
    %cst_569 = arith.constant dense<0.000000e+00> : vector<8x32xf32>
    %914 = tpu.matmul %911, %913, %cst_569 {dimension_numbers = #tpu.dot_dimension_numbers<[1], [0], [0], [1], [0, 0, 1, 1], [], []>} : vector<8x8xbf16>, vector<8x32xbf16>, vector<8x32xf32> -> vector<8x32xf32>
    %915 = arith.addf %865, %914 : vector<8x32xf32>
    %c0_570 = arith.constant 0 : index
    %c0_571 = arith.constant 0 : index
    %916 = vector.load %arg14[%c0_570, %c0_571] : memref<1x32xf32, #tpu.memory_space<vmem>>, vector<1x32xf32>
    %917 = vector.broadcast %916 : vector<1x32xf32> to vector<8x32xf32>
    %918 = arith.addf %915, %917 : vector<8x32xf32>
    %919 = arith.addf %713, %918 : vector<8x32xf32>
    %cst_572 = arith.constant dense<0.000000e+00> : vector<8xf32>
    %920 = vector.multi_reduction <add>, %919, %cst_572 [1] : vector<8x32xf32> to vector<8xf32>
    %921 = vector.shape_cast %920 : vector<8xf32> to vector<8x1xf32>
    %cst_573 = arith.constant 3.200000e+01 : f32
    %922 = vector.broadcast %cst_573 : f32 to vector<8x1xf32>
    %923 = arith.divf %921, %922 : vector<8x1xf32>
    %924 = vector.broadcast %923 : vector<8x1xf32> to vector<8x32xf32>
    %925 = arith.subf %919, %924 : vector<8x32xf32>
    %926 = arith.mulf %925, %925 : vector<8x32xf32>
    %cst_574 = arith.constant dense<0.000000e+00> : vector<8xf32>
    %927 = vector.multi_reduction <add>, %926, %cst_574 [1] : vector<8x32xf32> to vector<8xf32>
    %928 = vector.shape_cast %927 : vector<8xf32> to vector<8x1xf32>
    %cst_575 = arith.constant 3.200000e+01 : f32
    %929 = vector.broadcast %cst_575 : f32 to vector<8x1xf32>
    %930 = arith.divf %928, %929 : vector<8x1xf32>
    %cst_576 = arith.constant 9.99999974E-6 : f32
    %931 = vector.broadcast %cst_576 : f32 to vector<8x1xf32>
    %932 = arith.addf %930, %931 : vector<8x1xf32>
    %933 = math.rsqrt %932 : vector<8x1xf32>
    %934 = vector.broadcast %933 : vector<8x1xf32> to vector<8x32xf32>
    %935 = arith.mulf %925, %934 : vector<8x32xf32>
    %c0_577 = arith.constant 0 : index
    %c0_578 = arith.constant 0 : index
    %936 = vector.load %arg15[%c0_577, %c0_578] : memref<1x32xf32, #tpu.memory_space<vmem>>, vector<1x32xf32>
    %937 = vector.broadcast %936 : vector<1x32xf32> to vector<8x32xf32>
    %938 = arith.mulf %935, %937 : vector<8x32xf32>
    %c0_579 = arith.constant 0 : index
    %c0_580 = arith.constant 0 : index
    %939 = vector.load %arg16[%c0_579, %c0_580] : memref<1x32xf32, #tpu.memory_space<vmem>>, vector<1x32xf32>
    %940 = vector.broadcast %939 : vector<1x32xf32> to vector<8x32xf32>
    %941 = arith.addf %938, %940 : vector<8x32xf32>
    %c0_581 = arith.constant 0 : index
    %c0_582 = arith.constant 0 : index
    %942 = vector.load %arg17[%c0_581, %c0_582] : memref<32x64xbf16, #tpu.memory_space<vmem>>, vector<32x64xbf16>
    %943 = arith.truncf %941 : vector<8x32xf32> to vector<8x32xbf16>
    %cst_583 = arith.constant dense<0.000000e+00> : vector<8x64xf32>
    %944 = tpu.matmul %943, %942, %cst_583 {dimension_numbers = #tpu.dot_dimension_numbers<[1], [0], [0], [1], [0, 0, 1, 1], [], []>} : vector<8x32xbf16>, vector<32x64xbf16>, vector<8x64xf32> -> vector<8x64xf32>
    %c0_584 = arith.constant 0 : index
    %c0_585 = arith.constant 0 : index
    %945 = vector.load %arg18[%c0_584, %c0_585] : memref<1x64xf32, #tpu.memory_space<vmem>>, vector<1x64xf32>
    %946 = vector.broadcast %945 : vector<1x64xf32> to vector<8x64xf32>
    %947 = arith.addf %944, %946 : vector<8x64xf32>
    %cst_586 = arith.constant 0.000000e+00 : f32
    %948 = vector.broadcast %cst_586 : f32 to vector<8x64xf32>
    %949 = arith.maximumf %947, %948 : vector<8x64xf32>
    %c0_587 = arith.constant 0 : index
    %c0_588 = arith.constant 0 : index
    %950 = vector.load %arg19[%c0_587, %c0_588] : memref<64x32xbf16, #tpu.memory_space<vmem>>, vector<64x32xbf16>
    %951 = arith.truncf %949 : vector<8x64xf32> to vector<8x64xbf16>
    %cst_589 = arith.constant dense<0.000000e+00> : vector<8x32xf32>
    %952 = tpu.matmul %951, %950, %cst_589 {dimension_numbers = #tpu.dot_dimension_numbers<[1], [0], [0], [1], [0, 0, 1, 1], [], []>} : vector<8x64xbf16>, vector<64x32xbf16>, vector<8x32xf32> -> vector<8x32xf32>
    %c0_590 = arith.constant 0 : index
    %c0_591 = arith.constant 0 : index
    %953 = vector.load %arg20[%c0_590, %c0_591] : memref<1x32xf32, #tpu.memory_space<vmem>>, vector<1x32xf32>
    %954 = vector.broadcast %953 : vector<1x32xf32> to vector<8x32xf32>
    %955 = arith.addf %952, %954 : vector<8x32xf32>
    %956 = arith.addf %941, %955 : vector<8x32xf32>
    %cst_592 = arith.constant dense<0.000000e+00> : vector<8xf32>
    %957 = vector.multi_reduction <add>, %956, %cst_592 [1] : vector<8x32xf32> to vector<8xf32>
    %958 = vector.shape_cast %957 : vector<8xf32> to vector<8x1xf32>
    %cst_593 = arith.constant 3.200000e+01 : f32
    %959 = vector.broadcast %cst_593 : f32 to vector<8x1xf32>
    %960 = arith.divf %958, %959 : vector<8x1xf32>
    %961 = vector.broadcast %960 : vector<8x1xf32> to vector<8x32xf32>
    %962 = arith.subf %956, %961 : vector<8x32xf32>
    %963 = arith.mulf %962, %962 : vector<8x32xf32>
    %cst_594 = arith.constant dense<0.000000e+00> : vector<8xf32>
    %964 = vector.multi_reduction <add>, %963, %cst_594 [1] : vector<8x32xf32> to vector<8xf32>
    %965 = vector.shape_cast %964 : vector<8xf32> to vector<8x1xf32>
    %cst_595 = arith.constant 3.200000e+01 : f32
    %966 = vector.broadcast %cst_595 : f32 to vector<8x1xf32>
    %967 = arith.divf %965, %966 : vector<8x1xf32>
    %cst_596 = arith.constant 9.99999974E-6 : f32
    %968 = vector.broadcast %cst_596 : f32 to vector<8x1xf32>
    %969 = arith.addf %967, %968 : vector<8x1xf32>
    %970 = math.rsqrt %969 : vector<8x1xf32>
    %971 = vector.broadcast %970 : vector<8x1xf32> to vector<8x32xf32>
    %972 = arith.mulf %962, %971 : vector<8x32xf32>
    %c0_597 = arith.constant 0 : index
    %c0_598 = arith.constant 0 : index
    %973 = vector.load %arg21[%c0_597, %c0_598] : memref<1x32xf32, #tpu.memory_space<vmem>>, vector<1x32xf32>
    %974 = vector.broadcast %973 : vector<1x32xf32> to vector<8x32xf32>
    %975 = arith.mulf %972, %974 : vector<8x32xf32>
    %c0_599 = arith.constant 0 : index
    %c0_600 = arith.constant 0 : index
    %976 = vector.load %arg22[%c0_599, %c0_600] : memref<1x32xf32, #tpu.memory_space<vmem>>, vector<1x32xf32>
    %977 = vector.broadcast %976 : vector<1x32xf32> to vector<8x32xf32>
    %978 = arith.addf %975, %977 : vector<8x32xf32>
    %c0_601 = arith.constant 0 : index
    %c0_602 = arith.constant 0 : index
    %979 = vector.load %arg23[%c0_601, %c0_602] : memref<32x128xbf16, #tpu.memory_space<vmem>>, vector<32x128xbf16>
    %980 = arith.truncf %978 : vector<8x32xf32> to vector<8x32xbf16>
    %cst_603 = arith.constant dense<0.000000e+00> : vector<8x128xf32>
    %981 = tpu.matmul %980, %979, %cst_603 {dimension_numbers = #tpu.dot_dimension_numbers<[1], [0], [0], [1], [0, 0, 1, 1], [], []>} : vector<8x32xbf16>, vector<32x128xbf16>, vector<8x128xf32> -> vector<8x128xf32>
    %c0_604 = arith.constant 0 : index
    %c0_605 = arith.constant 0 : index
    %982 = vector.load %arg24[%c0_604, %c0_605] : memref<1x128xf32, #tpu.memory_space<vmem>>, vector<1x128xf32>
    %983 = vector.broadcast %982 : vector<1x128xf32> to vector<8x128xf32>
    %984 = arith.addf %981, %983 : vector<8x128xf32>
    %c0_606 = arith.constant 0 : index
    %c0_607 = arith.constant 0 : index
    %c0_608 = arith.constant 0 : index
    %985 = vector.load %arg25[%c0_606, %c0_607, %c0_608] : memref<1x8x128xf32, #tpu.memory_space<vmem>>, vector<1x8x128xf32>
    %986 = vector.shape_cast %985 : vector<1x8x128xf32> to vector<8x128xf32>
    %987 = vector.shape_cast %984 : vector<8x128xf32> to vector<1x8x128xf32>
    tpu.vector_store %arg25[%c0_606, %c0_607, %c0_608], %987 {strides = array<i32>} : memref<1x8x128xf32, #tpu.memory_space<vmem>>, vector<1x8x128xf32>,
    return
  }
  func.func @transform_0(%arg0: i32) -> (i32, i32, i32) {
    %c0_i32 = arith.constant 0 : i32
    %c0_i32_0 = arith.constant 0 : i32
    %c0_i32_1 = arith.constant 0 : i32
    return %arg0, %c0_i32, %c0_i32_0 : i32, i32, i32
  }
  func.func @transform_1(%arg0: i32) -> (i32, i32, i32) {
    %c0_i32 = arith.constant 0 : i32
    %c0_i32_0 = arith.constant 0 : i32
    %c0_i32_1 = arith.constant 0 : i32
    return %arg0, %c0_i32, %c0_i32_0 : i32, i32, i32
  }
  func.func @transform_2(%arg0: i32) -> (i32, i32, i32, i32) {
    %c0_i32 = arith.constant 0 : i32
    %c0_i32_0 = arith.constant 0 : i32
    %c0_i32_1 = arith.constant 0 : i32
    %c0_i32_2 = arith.constant 0 : i32
    return %arg0, %c0_i32, %c0_i32_0, %c0_i32_1 : i32, i32, i32, i32
  }
  func.func @transform_3(%arg0: i32) -> (i32, i32, i32, i32) {
    %c0_i32 = arith.constant 0 : i32
    %c0_i32_0 = arith.constant 0 : i32
    %c0_i32_1 = arith.constant 0 : i32
    %c0_i32_2 = arith.constant 0 : i32
    return %arg0, %c0_i32, %c0_i32_0, %c0_i32_1 : i32, i32, i32, i32
  }
  func.func @transform_4(%arg0: i32) -> (i32, i32, i32) {
    %c0_i32 = arith.constant 0 : i32
    %c0_i32_0 = arith.constant 0 : i32
    %c0_i32_1 = arith.constant 0 : i32
    %c0_i32_2 = arith.constant 0 : i32
    return %c0_i32, %c0_i32_0, %c0_i32_1 : i32, i32, i32
  }
  func.func @transform_5(%arg0: i32) -> (i32, i32, i32) {
    %c0_i32 = arith.constant 0 : i32
    %c0_i32_0 = arith.constant 0 : i32
    %c0_i32_1 = arith.constant 0 : i32
    %c0_i32_2 = arith.constant 0 : i32
    return %c0_i32, %c0_i32_0, %c0_i32_1 : i32, i32, i32
  }
  func.func @transform_6(%arg0: i32) -> (i32, i32, i32) {
    %c0_i32 = arith.constant 0 : i32
    %c0_i32_0 = arith.constant 0 : i32
    %c0_i32_1 = arith.constant 0 : i32
    %c0_i32_2 = arith.constant 0 : i32
    return %c0_i32, %c0_i32_0, %c0_i32_1 : i32, i32, i32
  }
  func.func @transform_7(%arg0: i32) -> (i32, i32) {
    %c0_i32 = arith.constant 0 : i32
    %c0_i32_0 = arith.constant 0 : i32
    %c0_i32_1 = arith.constant 0 : i32
    return %c0_i32, %c0_i32_0 : i32, i32
  }
  func.func @transform_8(%arg0: i32) -> (i32, i32) {
    %c0_i32 = arith.constant 0 : i32
    %c0_i32_0 = arith.constant 0 : i32
    %c0_i32_1 = arith.constant 0 : i32
    return %c0_i32, %c0_i32_0 : i32, i32
  }
  func.func @transform_9(%arg0: i32) -> (i32, i32) {
    %c0_i32 = arith.constant 0 : i32
    %c0_i32_0 = arith.constant 0 : i32
    %c0_i32_1 = arith.constant 0 : i32
    return %c0_i32, %c0_i32_0 : i32, i32
  }
  func.func @transform_10(%arg0: i32) -> (i32, i32, i32) {
    %c0_i32 = arith.constant 0 : i32
    %c0_i32_0 = arith.constant 0 : i32
    %c0_i32_1 = arith.constant 0 : i32
    %c0_i32_2 = arith.constant 0 : i32
    return %c0_i32, %c0_i32_0, %c0_i32_1 : i32, i32, i32
  }
  func.func @transform_11(%arg0: i32) -> (i32, i32, i32) {
    %c0_i32 = arith.constant 0 : i32
    %c0_i32_0 = arith.constant 0 : i32
    %c0_i32_1 = arith.constant 0 : i32
    %c0_i32_2 = arith.constant 0 : i32
    return %c0_i32, %c0_i32_0, %c0_i32_1 : i32, i32, i32
  }
  func.func @transform_12(%arg0: i32) -> (i32, i32, i32) {
    %c0_i32 = arith.constant 0 : i32
    %c0_i32_0 = arith.constant 0 : i32
    %c0_i32_1 = arith.constant 0 : i32
    %c0_i32_2 = arith.constant 0 : i32
    return %c0_i32, %c0_i32_0, %c0_i32_1 : i32, i32, i32
  }
  func.func @transform_13(%arg0: i32) -> (i32, i32) {
    %c0_i32 = arith.constant 0 : i32
    %c0_i32_0 = arith.constant 0 : i32
    %c0_i32_1 = arith.constant 0 : i32
    return %c0_i32, %c0_i32_0 : i32, i32
  }
  func.func @transform_14(%arg0: i32) -> (i32, i32) {
    %c0_i32 = arith.constant 0 : i32
    %c0_i32_0 = arith.constant 0 : i32
    %c0_i32_1 = arith.constant 0 : i32
    return %c0_i32, %c0_i32_0 : i32, i32
  }
  func.func @transform_15(%arg0: i32) -> (i32, i32) {
    %c0_i32 = arith.constant 0 : i32
    %c0_i32_0 = arith.constant 0 : i32
    %c0_i32_1 = arith.constant 0 : i32
    return %c0_i32, %c0_i32_0 : i32, i32
  }
  func.func @transform_16(%arg0: i32) -> (i32, i32) {
    %c0_i32 = arith.constant 0 : i32
    %c0_i32_0 = arith.constant 0 : i32
    %c0_i32_1 = arith.constant 0 : i32
    return %c0_i32, %c0_i32_0 : i32, i32
  }
  func.func @transform_17(%arg0: i32) -> (i32, i32) {
    %c0_i32 = arith.constant 0 : i32
    %c0_i32_0 = arith.constant 0 : i32
    %c0_i32_1 = arith.constant 0 : i32
    return %c0_i32, %c0_i32_0 : i32, i32
  }
  func.func @transform_18(%arg0: i32) -> (i32, i32) {
    %c0_i32 = arith.constant 0 : i32
    %c0_i32_0 = arith.constant 0 : i32
    %c0_i32_1 = arith.constant 0 : i32
    return %c0_i32, %c0_i32_0 : i32, i32
  }
  func.func @transform_19(%arg0: i32) -> (i32, i32) {
    %c0_i32 = arith.constant 0 : i32
    %c0_i32_0 = arith.constant 0 : i32
    %c0_i32_1 = arith.constant 0 : i32
    return %c0_i32, %c0_i32_0 : i32, i32
  }
  func.func @transform_20(%arg0: i32) -> (i32, i32) {
    %c0_i32 = arith.constant 0 : i32
    %c0_i32_0 = arith.constant 0 : i32
    %c0_i32_1 = arith.constant 0 : i32
    return %c0_i32, %c0_i32_0 : i32, i32
  }
  func.func @transform_21(%arg0: i32) -> (i32, i32) {
    %c0_i32 = arith.constant 0 : i32
    %c0_i32_0 = arith.constant 0 : i32
    %c0_i32_1 = arith.constant 0 : i32
    return %c0_i32, %c0_i32_0 : i32, i32
  }
  func.func @transform_22(%arg0: i32) -> (i32, i32) {
    %c0_i32 = arith.constant 0 : i32
    %c0_i32_0 = arith.constant 0 : i32
    %c0_i32_1 = arith.constant 0 : i32
    return %c0_i32, %c0_i32_0 : i32, i32
  }
  func.func @transform_23(%arg0: i32) -> (i32, i32) {
    %c0_i32 = arith.constant 0 : i32
    %c0_i32_0 = arith.constant 0 : i32
    %c0_i32_1 = arith.constant 0 : i32
    return %c0_i32, %c0_i32_0 : i32, i32
  }
  func.func @transform_24(%arg0: i32) -> (i32, i32, i32) {
    %c0_i32 = arith.constant 0 : i32
    %c0_i32_0 = arith.constant 0 : i32
    %c0_i32_1 = arith.constant 0 : i32
    return %arg0, %c0_i32, %c0_i32_0 : i32, i32, i32
  }
}

</mosaic_0001>

<bundles_post_ra>
// kernel: decoder_forward.1
= control target key start
LH: loop header
LB: loop body
LE: loop exit
PB: predicated region body
PF: predicated region fallthrough
CT: control target
= control target key end

     0   :  { %s8984_s0 = inlined_call_operand.vmem [shape: f32[2,8,32], index: 0, kind: input, shape index: {}]   ;;  %s8985_s1 = inlined_call_operand.vmem [shape: f32[2,8,32], index: 1, kind: input, shape index: {}]   ;;  %s8986_s2 = inlined_call_operand.vmem [shape: f32[2,1,8,8], index: 2, kind: input, shape index: {}]   ;;  %s8987_s3 = inlined_call_operand.vmem [shape: f32[2,1,1,8], index: 3, kind: input, shape index: {}]   ;;  %s8988_s4 = inlined_call_operand.vmem [shape: bf16[12,32,8], index: 4, kind: input, shape index: {}]   ;;  %s8989_s5 = inlined_call_operand.vmem [shape: f32[12,1,8], index: 5, kind: input, shape index: {}]   ;;  %s8990_s6 = inlined_call_operand.vmem [shape: bf16[4,8,32], index: 6, kind: input, shape index: {}]   ;;  %s8991_s7 = inlined_call_operand.vmem [shape: f32[1,32], index: 7, kind: input, shape index: {}]   ;;  %s8992_s8 = inlined_call_operand.vmem [shape: f32[1,32], index: 8, kind: input, shape index: {}]   ;;  %s8993_s9 = inlined_call_operand.vmem [shape: f32[1,32], index: 9, kind: input, shape index: {}]   ;;  %s8994_s10 = inlined_call_operand.vmem [shape: bf16[12,32,8], index: 10, kind: input, shape index: {}]   ;;  %s8995_s11 = inlined_call_operand.vmem [shape: f32[12,1,8], index: 11, kind: input, shape index: {}]   ;;  %s8996_s12 = inlined_call_operand.vmem [shape: bf16[4,8,32], index: 12, kind: input, shape index: {}]   ;;  %s8997_s13 = inlined_call_operand.vmem [shape: f32[1,32], index: 13, kind: input, shape index: {}]   ;;  %s8998_s14 = inlined_call_operand.vmem [shape: f32[1,32], index: 14, kind: input, shape index: {}]   ;;  %s8999_s15 = inlined_call_operand.vmem [shape: f32[1,32], index: 15, kind: input, shape index: {}]   ;;  %s9000_s16 = inlined_call_operand.vmem [shape: bf16[32,64], index: 16, kind: input, shape index: {}]   ;;  %s9001_s17 = inlined_call_operand.vmem [shape: f32[1,64], index: 17, kind: input, shape index: {}]   ;;  %s9002_s18 = inlined_call_operand.vmem [shape: bf16[64,32], index: 18, kind: input, shape index: {}]   ;;  %s9003_s19 = inlined_call_operand.vmem [shape: f32[1,32], index: 19, kind: input, shape index: {}]   ;;  %s9004_s20 = inlined_call_operand.vmem [shape: f32[1,32], index: 20, kind: input, shape index: {}]   ;;  %s9005_s21 = inlined_call_operand.vmem [shape: f32[1,32], index: 21, kind: input, shape index: {}]   ;;  %s9006_s22 = inlined_call_operand.vmem [shape: bf16[32,128], index: 22, kind: input, shape index: {}]   ;;  %s9007_s23 = inlined_call_operand.vmem [shape: f32[1,128], index: 23, kind: input, shape index: {}]   ;;  %s9008_s24 = inlined_call_operand.hbm [shape: f32[2,8,128], index: 24, kind: output, shape index: {}]  }
   0x1   :  { %9023 = sst [smem:[#allocation11_spill]] %s8984_s0 }
   0x2   :  { %9024 = sst [smem:[#allocation12_spill]] %s8985_s1 }
   0x3   :  { %9025 = sst [smem:[#allocation13_spill]] %s8986_s2 }
   0x4   :  { %9026 = sst [smem:[#allocation14_spill]] %s8987_s3 }
   0x5   :  { %9027 = sst [smem:[#allocation15_spill]] %s8988_s4 }
   0x6   :  { %9028 = sst [smem:[#allocation16_spill]] %s8989_s5 }
   0x7   :  { %9029 = sst [smem:[#allocation17_spill]] %s8990_s6 }
   0x8   :  { %9030 = sst [smem:[#allocation18_spill]] %s8991_s7 }
   0x9   :  { %9031 = sst [smem:[#allocation19_spill]] %s8992_s8 }
   0xa   :  { %9032 = sst [smem:[#allocation20_spill]] %s8993_s9 }
   0xb   :  { %9033 = sst [smem:[#allocation21_spill]] %s8994_s10 }
   0xc   :  { %9034 = sst [smem:[#allocation22_spill]] %s9008_s24 }
   0xd   :  { %29 = vsyncpa [#allocation3], 0 }
   0xe   :  { %31 = vsyncpa [#allocation3 + $0x1], 0  ;;  %s7679_s5 = smov 0   ;;  %s7681_s26 = smov 0  }
   0xf   :  { %s7683_s27 = smov 0   ;;  %s7685_s28 = smov 0  }
  0x10 LB: > { %9035 = sst [smem:[#allocation5_spill]] %s7536_s5  ;;  %s7700_s6 = sadd.s32 4294967295, %s7548_s28   ;;  %s7548_s28 = sphi %s7685_s28, %s9059_s28   ;;  %s7544_s27 = sphi %s7683_s27, %s9061_s27   ;;  %s7540_s26 = sphi %s7681_s26, %s9063_s26   ;;  %s7536_s5 = sphi %s7679_s5, %s9062_s5  }
  0x11   : > { %9036 = sst [smem:[#allocation6_spill]] %s7544_s27  ;;  %s6047_s2 = sadd.s32 4294967294, %s7548_s28  }
  0x12   : > { %9037 = sst [smem:[#allocation7_spill]] %s7548_s28  ;;  %s7704_s29 = sadd.s32 1, %s7548_s28  }
  0x13   : > { %9038 = sst [smem:[#allocation8_spill]] %s7704_s29  ;;  %s568_s0 = sadd.s32 1, %s7544_s27 }
  0x14   : > { %s565_s7 = ssub.s32 %s7548_s28, %s7704_s29  ;;  %p578_p0 = scmp.ne.s32.totalorder %s7544_s27, %s7540_s26 }
  0x15   : > { %p566_p1 = scmp.eq.s32.totalorder %s565_s7, 0  ;;  %p579_p2 = scmp.eq.s32.totalorder %s7700_s6, 1 }
  0x16   : > { %p584_p3 = scmp.ne.s32.totalorder %s7540_s26, %s7536_s5  ;;  %p585_p4 = scmp.eq.s32.totalorder %s6047_s2, 1 }
  0x17   : > { %s7715_s30 = scalar_select %p566_p1, %s7544_s27, %s568_s0  }
  0x18   : > { %p7717_p5 = por %p579_p2, %p578_p0  ;;  %p7721_p6 = por %p585_p4, %p584_p3 }
  0x19   : > { %9039 = sst [smem:[#allocation9_spill]] %s7715_s30  ;;  %p6050_p7 = scmp.ge.s32.totalorder %s7548_s28, 1 }
  0x1a   : > { %s9041_s25 = scalar_select %p7721_p6, 1, 0 }
  0x1b   : > { %p690_p8 = scmp.lt.s32.totalorder %s7548_s28, 3 }
  0x1c   : > { %9042 = sst [smem:[#allocation10_spill]] %s9041_s25 }
  0x1d   : > { %p691_p9 = pnand %p6050_p7, %p690_p8 }
  0x1e   : > { %s9043_s1 = sld [smem:[#allocation15_spill]] (!%p691_p9)  ;;  %p766_p10 = scmp.lt.s32.totalorder (!%p691_p9), %s7700_s6, 1 }
  0x1f   : > { %694 = sbr.rel (%p691_p9) target bundleno = 14655 (0x393f), region = 116  ;;  %s9044_s27 = sld [smem:[#allocation11_spill]] (!%p691_p9) }
  0x20   : > { %s9047_s8 = sld [smem:[#allocation13_spill]] (!%p691_p9) }
  0x21   : > { %s9048_s7 = sld [smem:[#allocation17_spill]] (!%p691_p9) }
  0x22   : > { %s9049_s25 = sld [smem:[#allocation18_spill]] (!%p691_p9) }
  0x23   : > { %s9050_s10 = sld [smem:[#allocation21_spill]] (!%p691_p9) }
  0x24   : > { %v7292_v0 = vld [vmem:[%s9043_s1 + $0x8] sm:$0xff]   ;;  %v7550_v1 = vmov 0.0   ;;  %v7294_v3 = vld [vmem:[%s9043_s1] sm:$0xff]   ;;  %vm7551_vm0 = vmmov 0   ;;  %s7749_s2 = scalar_select %p766_p10, %s7700_s6, 1  ;;  %vm811_vm1 = vcmask 261120  }
  0x25   : > { %6594 = vmatprep.subr.bf16.mxu0 %v7550_v1  ;;  %6602 = vmatprep.subr.bf16.mxu1 %v7550_v1  ;;  %v7293_v2 = vld [vmem:[%s9043_s1 + $0x48] sm:$0xff]   ;;  %v7295_v4 = vld [vmem:[%s9043_s1 + $0x40] sm:$0xff]   ;;  %vm988_vm2 = vcmask 64512   ;;  %vm1051_vm4 = vcmask 1043456   ;;  %v7298_v40 = vld [vmem:[%s9043_s1 + $0x18] sm:$0xff]   ;;  %s9051_s28 = sld [smem:[#allocation12_spill]] }
  0x26   : > { %6595 = vmatpush3.bf16.msra.mxu0 %v7292_v0  ;;  %6598 = vmatprep.mubr.msk.bf16.mxu0 %vm7551_vm0, %v7550_v1  ;;  %s7752_s30 = sshll.u32 %s7749_s2, 3  ;;  %v7296_v7 = vld [vmem:[%s9043_s1 + $0x88] sm:$0xff]   ;;  %v7297_v8 = vld [vmem:[%s9043_s1 + $0x80] sm:$0xff]   ;;  %v7300_v41 = vld [vmem:[%s9043_s1 + $0x10] sm:$0xff]   ;;  %s9053_s9 = sld [smem:[#allocation20_spill]]  ;;  %vm3816_vm7 = vcmask 523264  }
  0x27   : > { %6603 = vmatpush3.bf16.msra.mxu1 %v7293_v2  ;;  %6596 = vmatprep.subr.bf16.mxu0 %v7550_v1  ;;  %s769_s29 = scalar_lea.vmem %s9044_s27, %s7752_s30  ;;  %s9045_s27 = sld [smem:[#allocation16_spill]]  ;;  %v7299_v46 = vld [vmem:[%s9043_s1 + $0x58] sm:$0xff]   ;;  %v7301_v49 = vld [vmem:[%s9043_s1 + $0x50] sm:$0xff]  }
  0x28   : > { %6604 = vmatprep.subr.bf16.mxu1 %v7550_v1  ;;  %6606 = vmatprep.mubr.msk.bf16.mxu1 %vm7551_vm0, %v7550_v1  ;;  %v7759_v5 = vld [vmem:[%s769_s29] sm:$0xff]  ;;  %s777_s4 = scalar_lea.vmem %s9047_s8, %s7752_s30  ;;  %v7302_v54 = vld [vmem:[%s9043_s1 + $0x98] sm:$0xff]   ;;  %v7303_v55 = vld [vmem:[%s9043_s1 + $0x90] sm:$0xff]  }
  0x29   : > { %v7764_v6 = vpack.c.bf16 %v7759_v5, %v7759_v5  ;;  %v7801_v25 = vld [vmem:[%s777_s4] sm:$0xff]  ;;  %s763_s4 = sand.u32 1, %s7540_s26  }
  0x2a   : > { %6597 = vmatpush3.bf16.msra.mxu0 %v7294_v3  ;;  %vm1035_vm3 = vcmp.eq.f32.partialorder %v7801_v25, 0.0  ;;  %v7460_v25 = vld [vmem:[%s9050_s10 + $0x8] sm:$0xff]   ;;  %s6051_s0 = sshll.u32 %s763_s4, 3 }
  0x2b   : > { %6605 = vmatpush3.bf16.msra.mxu1 %v7295_v4  ;;  %6610 = vmatprep.subr.bf16.mxu0 %v7550_v1  ;;  %s773_s24 = scalar_lea.vmem %s9051_s28, %s7752_s30  ;;  %s9052_s30 = sld [smem:[#allocation19_spill]] }
  0x2c   : > { %6618 = vmatprep.subr.bf16.mxu1 %v7550_v1  ;;  %s6356_s28 = sshll.u32 %s7700_s6, 7  ;;  %s7553_s6 = smov [#allocation2]  }
  0x2d   : > { %6599 = vmatmul.mubr.msk.bf16.vlgmr.msra.gmra.mxu0 %vm811_vm1, %v7764_v6  ;;  %s9046_s29 = smov %s9045_s27  ;;  %v6055_v9 = vld [vmem:[%s9045_s27] ss:$0 sm:$0xff]  ;;  %s9054_s27 = sld [smem:[#allocation14_spill]] }
  0x2e   : > { %6607 = vmatmul.mubr.msk.bf16.vlgmr.msra.gmra.mxu1 %vm811_vm1, %v7764_v6  ;;  %6614 = vmatprep.mubr.msk.bf16.mxu0 %vm7551_vm0, %v7550_v1  ;;  %v6064_v10 = vld [vmem:[%s9046_s29 + $0x4] ss:$0 sm:$0xff]  ;;  %v6073_v32 = vld [vmem:[%s9046_s29 + $0x8] ss:$0 sm:$0xff]  ;;  %v6084_v60 = vld [vmem:[%s9046_s29 + $0x1] ss:$0 sm:$0xff] }
  0x2f   : > { %6620 = vmatprep.mubr.msk.bf16.mxu1 %vm7551_vm0, %v7550_v1  ;;  %6611 = vmatpush3.bf16.msra.mxu0 %v7296_v7  ;;  %v6093_v61 = vld [vmem:[%s9046_s29 + $0x5] ss:$0 sm:$0xff] }
  0x30   : > { %6612 = vmatprep.subr.bf16.mxu0 %v7550_v1 }
  0x33   : > { %6613 = vmatpush3.bf16.msra.mxu0 %v7297_v8  ;;  %s780_s5 = scalar_lea.vmem %s9054_s27, %s7749_s2  ;;  %s9055_s2 = sld [smem:[#allocation22_spill]] }
  0x34   : > { %6624 = vmatprep.subr.bf16.mxu0 %v7550_v1 }
  0x36   : > { %6615 = vmatmul.mubr.msk.bf16.vlgmr.msra.gmra.mxu0 %vm811_vm1, %v7764_v6 }
  0x37   : > { %6626 = vmatprep.mubr.msk.bf16.mxu0 %vm7551_vm0, %v7550_v1 }
  0x39   : > { %s8943_s8 = scalar_lea.hbm %s9055_s2, %s6356_s28 }
  0xed   : > { %v849_v11 = vpop.f32.mrf.mxu0 }
  0xee   : > { %v914_v12 = vpop.f32.mrf.mxu1  ;;  %v850_v13 = vadd.f32 %v6055_v9, %v849_v11 }
  0xef   : > { %v915_v14 = vadd.f32 %v6064_v10, %v914_v12  ;;  %v6600_v15 = vpop.f32.mrf.mxu0 }
  0xf0   : > { %v6608_v16 = vpop.f32.mrf.mxu1  ;;  %v985_v20 = vmul.f32 0.17677669, %v850_v13 }
  0xf1   : > { %v987_v17 = vpack.c.bf16 %v915_v14, %v915_v14  ;;  %v852_v18 = vpop.f32.mrf.mxu0 }
  0xf2   : > { %v917_v19 = vpop.f32.mrf.mxu1  ;;  %v986_v24 = vpack.c.bf16 %v985_v20, %v985_v20 }
  0xf3   : > { %v993_v21 = vsel %vm988_vm2, %v987_v17, 0  ;;  %v6601_v22 = vpop.f32.mrf.mxu0  ;;  %v6102_v17 = vld [vmem:[%s9046_s29 + $0x9] ss:$0 sm:$0xff] }
  0xf4   : > { %v6609_v23 = vpop.f32.mrf.mxu1  ;;  %6619 = vmatpush3.bf16.xpose.msra.mxu1 %v993_v21 }
  0xf5   : > { %6630 = vmatprep.subr.bf16.mxu1 %v7550_v1 }
  0xf6   : > { %v979_v33 = vpop.f32.mrf.mxu0 }
  0xf7   : > { %v980_v34 = vadd.f32 %v6073_v32, %v979_v33 }
  0xf8   : > { %v6616_v35 = vpop.f32.mrf.mxu0 }
  0xf9   : > { %v1047_v36 = vpack.c.bf16 %v980_v34, %v980_v34 }
  0xfa   : > { %v982_v37 = vpop.f32.mrf.mxu0 }
  0xfb   : > { %6621 = vmatmul.mubr.msk.bf16.vlgmr.msra.gmra.mxu1 %vm988_vm2, %v986_v24  ;;  %v1053_v38 = vsel %vm1051_vm4, %v1047_v36, 0 }
  0xfc   : > { %6634 = vmatprep.mubr.msk.bf16.mxu1 %vm7551_vm0, %v7550_v1  ;;  %v6617_v39 = vpop.f32.mrf.mxu0  ;;  %6625 = vmatpush3.bf16.msra.mxu0 %v1053_v38  ;;  %v7304_v38 = vld [vmem:[%s9043_s1 + $0x68] sm:$0xff]  }
  0xfd   : > { %6638 = vmatprep.subr.bf16.mxu0 %v7550_v1  ;;  %6631 = vmatpush3.bf16.msra.mxu1 %v7298_v40  ;;  %v6108_v39 = vld [vmem:[%s9048_s7 + $0x4] sm:$0xf] }
  0xfe   : > { %6632 = vmatprep.subr.bf16.mxu1 %v7550_v1  ;;  %v7893_v40 = vsel %vm1051_vm4, %v6108_v39, 0  ;;  %v6140_v39 = vld [vmem:[%s9048_s7 + $0x8] sm:$0xf] }
 0x101   : > { %6633 = vmatpush3.bf16.msra.mxu1 %v7300_v41  ;;  %v7305_v41 = vld [vmem:[%s9043_s1 + $0x60] sm:$0xff]  }
 0x102   : > { %6646 = vmatprep.subr.bf16.mxu1 %v7550_v1 }
 0x104   : > { %6635 = vmatmul.mubr.msk.bf16.vlgmr.msra.gmra.mxu1 %vm811_vm1, %v7764_v6 }
 0x105   : > { %6650 = vmatprep.mubr.msk.bf16.mxu1 %vm7551_vm0, %v7550_v1  ;;  %6647 = vmatpush3.bf16.msra.mxu1 %v7302_v54 }
 0x106   : > { %6648 = vmatprep.subr.bf16.mxu1 %v7550_v1 }
 0x109   : > { %6649 = vmatpush3.bf16.msra.mxu1 %v7303_v55 }
 0x10a   : > { %6660 = vmatprep.subr.bf16.mxu1 %v7550_v1 }
 0x10c   : > { %6651 = vmatmul.mubr.msk.bf16.vlgmr.msra.gmra.mxu1 %vm811_vm1, %v7764_v6 }
 0x10d   : > { %6662 = vmatprep.mubr.msk.bf16.mxu1 %vm7551_vm0, %v7550_v1 }
 0x1bb   : > { %v1029_v26 = vpop.f32.mrf.mxu1 }
 0x1bc   : > { %v1036_v27 = vsel %vm1035_vm3, -1e+20, %v1029_v26 }
 0x1bd   : > { %v6622_v28 = vpop.f32.mrf.mxu1  ;;  %v1037_v29 = vsel %vm988_vm2, %v1036_v27, -inf }
 0x1be   : > { %1038 = vmax.xlane.f32.xlu0 %v1037_v29 }
 0x1bf   : > { %v1032_v30 = vpop.f32.mrf.mxu1 }
 0x1c0   : > { %v1098_v30 = vld [vmem:[%s9048_s7] sm:$0xf] }
 0x1c1   : > { %v6623_v31 = vpop.f32.mrf.mxu1  ;;  %v7876_v34 = vsel %vm1051_vm4, %v1098_v30, 0 }
 0x1c4   : > { %v1158_v50 = vpop.f32.mrf.mxu1 }
 0x1c5   : > { %v1159_v63 = vadd.f32 %v6084_v60, %v1158_v50 }
 0x1c6   : > { %v6636_v51 = vpop.f32.mrf.mxu1 }
 0x1c7   : > { %v1294_v7 = vmul.f32 0.17677669, %v1159_v63  ;;  %v7307_v51 = vld [vmem:[%s9043_s1 + $0x20] sm:$0xff]  }
 0x1c8   : > { %v1161_v52 = vpop.f32.mrf.mxu1 }
 0x1c9   : > { %v1295_v10 = vpack.c.bf16 %v1294_v7, %v1294_v7 }
 0x1ca   : > { %v6637_v53 = vpop.f32.mrf.mxu1 }
 0x1cc   : > { %v1288_v18 = vpop.f32.mrf.mxu1 }
 0x1cd   : > { %v1289_v19 = vadd.f32 %v6102_v17, %v1288_v18 }
 0x1ce   : > { %v6652_v20 = vpop.f32.mrf.mxu1 }
 0x1cf   : > { %v1354_v21 = vpack.c.bf16 %v1289_v19, %v1289_v19 }
 0x1d0   : > { %v1291_v22 = vpop.f32.mrf.mxu1 }
 0x1d1   : > { %v1359_v23 = vsel %vm1051_vm4, %v1354_v21, 0 }
 0x1d2   : > { %v6653_v24 = vpop.f32.mrf.mxu1  ;;  %6661 = vmatpush3.bf16.msra.mxu1 %v1359_v23  ;;  %v6134_v23 = vld [vmem:[%s9046_s29 + $0xa] ss:$0 sm:$0xff] }
 0x1d3   : > { %6672 = vmatprep.subr.bf16.mxu1 %v7550_v1 }
 0x247   : > { %v1039_v42 = vpop.xlane.xlu0 %1038 }
 0x248   : > { %v1040_v43 = vsub.f32 %v1036_v27, %v1039_v42 }
 0x24a   : > { %v1041_v44 = vmul.f32 1.442695, %v1040_v43 }
 0x24c   : > { %7348 = vpow2.f32 %v1041_v44 }
 0x259   : > { %v7349_v45 = vpop.eup %7348 }
 0x25a   : > { %v1043_v47 = vsel %vm988_vm2, %v7349_v45, 0.0  ;;  %v1046_v48 = vpack.c.bf16 %v7349_v45, %v7349_v45 }
 0x25b   : > { %1044 = vadd.xlane.f32.xlu1 %v1043_v47  ;;  %v7306_v47 = vld [vmem:[%s9043_s1 + $0x28] sm:$0xff]  }
 0x25c   : > { %6627 = vmatmul.mubr.msk.bf16.vlgmr.msra.gmra.mxu0 %vm988_vm2, %v1046_v48 }
 0x25d   : > { %6639 = vmatpush3.bf16.msra.mxu0 %v7299_v46  ;;  %6642 = vmatprep.mubr.msk.bf16.mxu0 %vm7551_vm0, %v7550_v1 }
 0x25e   : > { %6640 = vmatprep.subr.bf16.mxu0 %v7550_v1 }
 0x261   : > { %6641 = vmatpush3.bf16.msra.mxu0 %v7301_v49 }
 0x262   : > { %6654 = vmatprep.subr.bf16.mxu0 %v7550_v1 }
 0x264   : > { %6643 = vmatmul.mubr.msk.bf16.vlgmr.msra.gmra.mxu0 %vm811_vm1, %v7764_v6 }
 0x265   : > { %6656 = vmatprep.mubr.msk.bf16.mxu0 %vm7551_vm0, %v7550_v1 }
 0x2e4   : > { %v1045_v29 = vpop.xlane.xlu1 %1044 }
 0x31c   : > { %v1089_v56 = vpop.f32.mrf.mxu0 }
 0x31e   : > { %v6628_v57 = vpop.f32.mrf.mxu0 }
 0x320   : > { %v1092_v58 = vpop.f32.mrf.mxu0 }
 0x322   : > { %v6629_v59 = vpop.f32.mrf.mxu0 }
 0x324   : > { %v1223_v62 = vpop.f32.mrf.mxu0 }
 0x325   : > { %v1224_v0 = vadd.f32 %v6093_v61, %v1223_v62 }
 0x326   : > { %v6644_v2 = vpop.f32.mrf.mxu0 }
 0x327   : > { %v1296_v3 = vpack.c.bf16 %v1224_v0, %v1224_v0  ;;  %v7308_v0 = vld [vmem:[%s9043_s1 + $0xa8] sm:$0xff]   ;;  %v7309_v2 = vld [vmem:[%s9043_s1 + $0xa0] sm:$0xff]  }
 0x328   : > { %v1226_v4 = vpop.f32.mrf.mxu0 }
 0x329   : > { %v1301_v8 = vsel %vm988_vm2, %v1296_v3, 0 }
 0x32a   : > { %v6645_v9 = vpop.f32.mrf.mxu0  ;;  %6655 = vmatpush3.bf16.xpose.msra.mxu0 %v1301_v8 }
 0x32b   : > { %6666 = vmatprep.subr.bf16.mxu0 %v7550_v1  ;;  %v6116_v9 = vld [vmem:[%s9046_s29 + $0x2] ss:$0 sm:$0xff] }
 0x331   : > { %6657 = vmatmul.mubr.msk.bf16.vlgmr.msra.gmra.mxu0 %vm988_vm2, %v1295_v10 }
 0x332   : > { %6668 = vmatprep.mubr.msk.bf16.mxu0 %vm7551_vm0, %v7550_v1  ;;  %6667 = vmatpush3.bf16.msra.mxu0 %v7893_v40 }
 0x333   : > { %6678 = vmatprep.subr.bf16.mxu0 %v7550_v1 }
 0x3f1   : > { %v1337_v11 = vpop.f32.mrf.mxu0 }
 0x3f2   : > { %v1343_v12 = vsel %vm1035_vm3, -1e+20, %v1337_v11 }
 0x3f3   : > { %v6658_v13 = vpop.f32.mrf.mxu0  ;;  %v1344_v14 = vsel %vm988_vm2, %v1343_v12, -inf }
 0x3f4   : > { %1345 = vmax.xlane.f32.xlu0 %v1344_v14 }
 0x3f5   : > { %v1340_v15 = vpop.f32.mrf.mxu0 }
 0x3f7   : > { %v6659_v16 = vpop.f32.mrf.mxu0 }
 0x47d   : > { %v1346_v26 = vpop.xlane.xlu0 %1345 }
 0x47e   : > { %v1347_v27 = vsub.f32 %v1343_v12, %v1346_v26 }
 0x480   : > { %v1348_v28 = vmul.f32 1.442695, %v1347_v27 }
 0x482   : > { %7350 = vpow2.f32 %v1348_v28 }
 0x483   : > { %7352 = vrcp.f32 %v1045_v29 }
 0x48f   : > { %v7351_v31 = vpop.eup %7350 }
 0x490   : > { %v1350_v32 = vsel %vm988_vm2, %v7351_v31, 0.0  ;;  %v1353_v33 = vpack.c.bf16 %v7351_v31, %v7351_v31  ;;  %v7353_v35 = vpop.eup %7352 }
 0x491   : > { %1351 = vadd.xlane.f32.xlu1 %v1350_v32  ;;  %v1096_v36 = vmul.f32 %v7353_v35, %v1089_v56  ;;  %v6125_v56 = vld [vmem:[%s9046_s29 + $0x6] ss:$0 sm:$0xff] }
 0x492   : > { %6663 = vmatmul.mubr.msk.bf16.vlgmr.msra.gmra.mxu1 %vm988_vm2, %v1353_v33 }
 0x493   : > { %6673 = vmatpush3.bf16.msra.mxu1 %v7876_v34  ;;  %6674 = vmatprep.mubr.msk.bf16.mxu1 %vm7551_vm0, %v7550_v1  ;;  %v1097_v37 = vpack.c.bf16 %v1096_v36, %v1096_v36 }
 0x494   : > { %6686 = vmatprep.subr.bf16.mxu1 %v7550_v1 }
 0x49a   : > { %6675 = vmatmul.mubr.msk.bf16.vlgmr.msra.gmra.mxu1 %vm988_vm2, %v1097_v37 }
 0x49b   : > { %6690 = vmatprep.mubr.msk.bf16.mxu1 %vm7551_vm0, %v7550_v1  ;;  %6687 = vmatpush3.bf16.msra.mxu1 %v7304_v38 }
 0x49c   : > { %6688 = vmatprep.subr.bf16.mxu1 %v7550_v1 }
 0x49f   : > { %6689 = vmatpush3.bf16.msra.mxu1 %v7305_v41  ;;  %v7964_v41 = vsel %vm1051_vm4, %v6140_v39, 0 }
 0x4a0   : > { %6702 = vmatprep.subr.bf16.mxu1 %v7550_v1 }
 0x4a2   : > { %6691 = vmatmul.mubr.msk.bf16.vlgmr.msra.gmra.mxu1 %vm811_vm1, %v7764_v6 }
 0x4a3   : > { %6704 = vmatprep.mubr.msk.bf16.mxu1 %vm7551_vm0, %v7550_v1 }
 0x51a   : > { %v1352_v42 = vpop.xlane.xlu1 %1351 }
 0x51b   : > { %7354 = vrcp.f32 %v1352_v42  ;;  %v7310_v42 = vld [vmem:[%s9043_s1 + $0x38] sm:$0xff]  }
 0x528   : > { %v7355_v43 = vpop.eup %7354 }
 0x552   : > { %v1395_v44 = vpop.f32.mrf.mxu1 }
 0x553   : > { %v1402_v45 = vmul.f32 %v7355_v43, %v1395_v44  ;;  %v7312_v43 = vld [vmem:[%s9043_s1 + $0x30] sm:$0xff]  }
 0x554   : > { %v6664_v46 = vpop.f32.mrf.mxu1 }
 0x555   : > { %v1403_v48 = vpack.c.bf16 %v1402_v45, %v1402_v45 }
 0x556   : > { %v1398_v49 = vpop.f32.mrf.mxu1 }
 0x557   : > { %6669 = vmatmul.mubr.msk.bf16.vlgmr.msra.gmra.mxu0 %vm988_vm2, %v1403_v48  ;;  %v7311_v49 = vld [vmem:[%s9043_s1 + $0x78] sm:$0xff]  }
 0x558   : > { %v6665_v50 = vpop.f32.mrf.mxu1  ;;  %6679 = vmatpush3.bf16.msra.mxu0 %v7306_v47  ;;  %6682 = vmatprep.mubr.msk.bf16.mxu0 %vm7551_vm0, %v7550_v1 }
 0x559   : > { %6680 = vmatprep.subr.bf16.mxu0 %v7550_v1 }
 0x55a   : > { %v7916_v52 = vpop.f32.mrf.mxu1 }
 0x55c   : > { %v6676_v53 = vpop.f32.mrf.mxu1  ;;  %6681 = vmatpush3.bf16.msra.mxu0 %v7307_v51 }
 0x55d   : > { %6694 = vmatprep.subr.bf16.mxu0 %v7550_v1 }
 0x55e   : > { %v1495_v54 = vpop.f32.mrf.mxu1 }
 0x55f   : > { %6683 = vmatmul.mubr.msk.bf16.vlgmr.msra.gmra.mxu0 %vm811_vm1, %v7764_v6  ;;  %v7313_v54 = vld [vmem:[%s9043_s1 + $0x70] sm:$0xff]  }
 0x560   : > { %v6677_v55 = vpop.f32.mrf.mxu1  ;;  %6698 = vmatprep.mubr.msk.bf16.mxu0 %vm7551_vm0, %v7550_v1  ;;  %6695 = vmatpush3.bf16.msra.mxu0 %v7308_v0 }
 0x561   : > { %6696 = vmatprep.subr.bf16.mxu0 %v7550_v1 }
 0x562   : > { %v1622_v57 = vpop.f32.mrf.mxu1 }
 0x563   : > { %v1623_v58 = vadd.f32 %v6125_v56, %v1622_v57 }
 0x564   : > { %v6692_v59 = vpop.f32.mrf.mxu1  ;;  %6697 = vmatpush3.bf16.msra.mxu0 %v7309_v2 }
 0x565   : > { %v1695_v60 = vpack.c.bf16 %v1623_v58, %v1623_v58  ;;  %6708 = vmatprep.subr.bf16.mxu0 %v7550_v1  ;;  %v7314_v59 = vld [vmem:[%s9043_s1 + $0xb8] sm:$0xff]  }
 0x566   : > { %v1625_v61 = vpop.f32.mrf.mxu1 }
 0x567   : > { %v1700_v62 = vsel %vm988_vm2, %v1695_v60, 0  ;;  %6699 = vmatmul.mubr.msk.bf16.vlgmr.msra.gmra.mxu0 %vm811_vm1, %v7764_v6  ;;  %v7315_v60 = vld [vmem:[%s9043_s1 + $0xb0] sm:$0xff]  }
 0x568   : > { %v6693_v63 = vpop.f32.mrf.mxu1  ;;  %6703 = vmatpush3.bf16.xpose.msra.mxu1 %v1700_v62  ;;  %6710 = vmatprep.mubr.msk.bf16.mxu0 %vm7551_vm0, %v7550_v1 }
 0x569   : > { %6714 = vmatprep.subr.bf16.mxu1 %v7550_v1 }
 0x617   : > { %v7940_v3 = vpop.f32.mrf.mxu0 }
 0x618   : > { %v1493_v61 = vadd.f32 %v7916_v52, %v7940_v3 }
 0x619   : > { %v6670_v4 = vpop.f32.mrf.mxu0 }
 0x61b   : > { %v1449_v7 = vpop.f32.mrf.mxu0 }
 0x61c   : > { %v6147_v7 = vld [vmem:[%s9046_s29 + $0x3] ss:$0 sm:$0xff] }
 0x61d   : > { %v6671_v8 = vpop.f32.mrf.mxu0 }
 0x61f   : > { %v1557_v10 = vpop.f32.mrf.mxu0 }
 0x620   : > { %v1558_v11 = vadd.f32 %v6116_v9, %v1557_v10 }
 0x621   : > { %v6684_v12 = vpop.f32.mrf.mxu0 }
 0x622   : > { %v1693_v13 = vmul.f32 0.17677669, %v1558_v11 }
 0x623   : > { %v1560_v14 = vpop.f32.mrf.mxu0 }
 0x624   : > { %v1694_v15 = vpack.c.bf16 %v1693_v13, %v1693_v13 }
 0x625   : > { %v6685_v16 = vpop.f32.mrf.mxu0 }
 0x626   : > { %6705 = vmatmul.mubr.msk.bf16.vlgmr.msra.gmra.mxu1 %vm988_vm2, %v1694_v15 }
 0x627   : > { %6716 = vmatprep.mubr.msk.bf16.mxu1 %vm7551_vm0, %v7550_v1  ;;  %v1687_v24 = vpop.f32.mrf.mxu0  ;;  %6715 = vmatpush3.bf16.msra.mxu1 %v7964_v41 }
 0x628   : > { %v1688_v26 = vadd.f32 %v6134_v23, %v1687_v24  ;;  %6728 = vmatprep.subr.bf16.mxu1 %v7550_v1 }
 0x629   : > { %v6700_v27 = vpop.f32.mrf.mxu0 }
 0x62a   : > { %v1753_v28 = vpack.c.bf16 %v1688_v26, %v1688_v26 }
 0x62b   : > { %v1690_v29 = vpop.f32.mrf.mxu0 }
 0x62c   : > { %v1758_v30 = vsel %vm1051_vm4, %v1753_v28, 0 }
 0x62d   : > { %v6701_v31 = vpop.f32.mrf.mxu0  ;;  %6709 = vmatpush3.bf16.msra.mxu0 %v1758_v30 }
 0x62e   : > { %6720 = vmatprep.subr.bf16.mxu0 %v7550_v1 }
 0x6e6   : > { %v1736_v17 = vpop.f32.mrf.mxu1 }
 0x6e7   : > { %v1742_v18 = vsel %vm1035_vm3, -1e+20, %v1736_v17 }
 0x6e8   : > { %v6706_v19 = vpop.f32.mrf.mxu1  ;;  %v1743_v20 = vsel %vm988_vm2, %v1742_v18, -inf }
 0x6e9   : > { %1744 = vmax.xlane.f32.xlu0 %v1743_v20 }
 0x6ea   : > { %v1739_v21 = vpop.f32.mrf.mxu1 }
 0x6ec   : > { %v6707_v22 = vpop.f32.mrf.mxu1 }
 0x6ed   : > { %v6165_v22 = vld [vmem:[%s9046_s29 + $0xb] ss:$0 sm:$0xff] }
 0x772   : > { %v1745_v32 = vpop.xlane.xlu0 %1744 }
 0x773   : > { %v1746_v33 = vsub.f32 %v1742_v18, %v1745_v32 }
 0x775   : > { %v1747_v35 = vmul.f32 1.442695, %v1746_v33 }
 0x777   : > { %7356 = vpow2.f32 %v1747_v35 }
 0x784   : > { %v7357_v36 = vpop.eup %7356 }
 0x785   : > { %v1749_v37 = vsel %vm988_vm2, %v7357_v36, 0.0  ;;  %v1752_v38 = vpack.c.bf16 %v7357_v36, %v7357_v36 }
 0x786   : > { %1750 = vadd.xlane.f32.xlu1 %v1749_v37 }
 0x787   : > { %6711 = vmatmul.mubr.msk.bf16.vlgmr.msra.gmra.mxu0 %vm988_vm2, %v1752_v38  ;;  %v6171_v38 = vld [vmem:[%s9048_s7 + $0xc] sm:$0xf]  ;;  %s5942_s7 = scalar_lea.sflag [#allocation3], %s763_s4 }
 0x788   : > { %6724 = vmatprep.mubr.msk.bf16.mxu0 %vm7551_vm0, %v7550_v1  ;;  %6721 = vmatpush3.bf16.msra.mxu0 %v7310_v42  ;;  %v8038_v39 = vsel %vm1051_vm4, %v6171_v38, 0  ;;  %v7321_v38 = vld [vmem:[%s9050_s10 + $0x10] sm:$0xff]  }
 0x789   : > { %6722 = vmatprep.subr.bf16.mxu0 %v7550_v1 }
 0x78c   : > { %6723 = vmatpush3.bf16.msra.mxu0 %v7312_v43 }
 0x78d   : > { %6736 = vmatprep.subr.bf16.mxu0 %v7550_v1 }
 0x78f   : > { %6725 = vmatmul.mubr.msk.bf16.vlgmr.msra.gmra.mxu0 %vm811_vm1, %v7764_v6 }
 0x790   : > { %6740 = vmatprep.mubr.msk.bf16.mxu0 %vm7551_vm0, %v7550_v1  ;;  %6737 = vmatpush3.bf16.msra.mxu0 %v7314_v59 }
 0x791   : > { %6738 = vmatprep.subr.bf16.mxu0 %v7550_v1 }
 0x794   : > { %6739 = vmatpush3.bf16.msra.mxu0 %v7315_v60 }
 0x795   : > { %6750 = vmatprep.subr.bf16.mxu0 %v7550_v1 }
 0x797   : > { %6741 = vmatmul.mubr.msk.bf16.vlgmr.msra.gmra.mxu0 %vm811_vm1, %v7764_v6 }
 0x798   : > { %6752 = vmatprep.mubr.msk.bf16.mxu0 %vm7551_vm0, %v7550_v1 }
 0x80f   : > { %v1751_v44 = vpop.xlane.xlu1 %1750 }
 0x810   : > { %7358 = vrcp.f32 %v1751_v44 }
 0x81d   : > { %v7359_v45 = vpop.eup %7358 }
 0x847   : > { %v1794_v46 = vpop.f32.mrf.mxu0 }
 0x848   : > { %v1801_v47 = vmul.f32 %v7359_v45, %v1794_v46 }
 0x849   : > { %v6712_v48 = vpop.f32.mrf.mxu0 }
 0x84a   : > { %v1802_v50 = vpack.c.bf16 %v1801_v47, %v1801_v47 }
 0x84b   : > { %v1797_v51 = vpop.f32.mrf.mxu0 }
 0x84c   : > { %6717 = vmatmul.mubr.msk.bf16.vlgmr.msra.gmra.mxu1 %vm988_vm2, %v1802_v50  ;;  %v6173_v51 = vld [vmem:[%s9049_s25] ss:$0 sm:$0xff] }
 0x84d   : > { %v6713_v53 = vpop.f32.mrf.mxu0  ;;  %6729 = vmatpush3.bf16.msra.mxu1 %v7311_v49  ;;  %6732 = vmatprep.mubr.msk.bf16.mxu1 %vm7551_vm0, %v7550_v1 }
 0x84e   : > { %6730 = vmatprep.subr.bf16.mxu1 %v7550_v1 }
 0x84f   : > { %v1911_v55 = vpop.f32.mrf.mxu0 }
 0x850   : > { %v1912_v9 = vadd.f32 %v6147_v7, %v1911_v55 }
 0x851   : > { %6731 = vmatpush3.bf16.msra.mxu1 %v7313_v54  ;;  %v6726_v56 = vpop.f32.mrf.mxu0 }
 0x852   : > { %6744 = vmatprep.subr.bf16.mxu1 %v7550_v1  ;;  %v2047_v3 = vmul.f32 0.17677669, %v1912_v9 }
 0x853   : > { %v1914_v57 = vpop.f32.mrf.mxu0 }
 0x854   : > { %6733 = vmatmul.mubr.msk.bf16.vlgmr.msra.gmra.mxu1 %vm811_vm1, %v7764_v6  ;;  %v6156_v6 = vld [vmem:[%s9046_s29 + $0x7] ss:$0 sm:$0xff]  ;;  %v2048_v15 = vpack.c.bf16 %v2047_v3, %v2047_v3 }
 0x855   : > { %6746 = vmatprep.mubr.msk.bf16.mxu1 %vm7551_vm0, %v7550_v1  ;;  %v6727_v58 = vpop.f32.mrf.mxu0 }
 0x857   : > { %v2041_v23 = vpop.f32.mrf.mxu0 }
 0x858   : > { %v2042_v24 = vadd.f32 %v6165_v22, %v2041_v23 }
 0x859   : > { %v6742_v26 = vpop.f32.mrf.mxu0 }
 0x85a   : > { %v2107_v27 = vpack.c.bf16 %v2042_v24, %v2042_v24  ;;  %v7322_v26 = vld [vmem:[%s9050_s10 + $0x88] sm:$0xff]  }
 0x85b   : > { %v2044_v28 = vpop.f32.mrf.mxu0 }
 0x85c   : > { %v2112_v29 = vsel %vm1051_vm4, %v2107_v27, 0  ;;  %v7323_v27 = vld [vmem:[%s9050_s10 + $0x80] sm:$0xff]  }
 0x85d   : > { %v6743_v30 = vpop.f32.mrf.mxu0  ;;  %6751 = vmatpush3.bf16.msra.mxu0 %v2112_v29  ;;  %v6176_v28 = vld [vmem:[%s8995_s11] ss:$0 sm:$0xff] }
 0x85e   : > { %6762 = vmatprep.subr.bf16.mxu0 %v7550_v1 }
 0x90c   : > { %v1845_v62 = vpop.f32.mrf.mxu1 }
 0x90d   : > { %v8009_v63 = vadd.f32 %v1845_v62, %v1493_v61 }
 0x90e   : > { %v6718_v0 = vpop.f32.mrf.mxu1 }
 0x910   : > { %v1848_v2 = vpop.f32.mrf.mxu1 }
 0x912   : > { %v6719_v4 = vpop.f32.mrf.mxu1 }
 0x913   : > { %v783_v4 = vld [vmem:[%s773_s24] sm:$0xff] }
 0x914   : > { %v1976_v8 = vpop.f32.mrf.mxu1  ;;  %v8063_v7 = vpack.c.bf16 %v783_v4, %v783_v4 }
 0x915   : > { %v1977_v10 = vadd.f32 %v6156_v6, %v1976_v8  ;;  %v7318_v6 = vld [vmem:[%s9050_s10 + $0x8] sm:$0xff]   ;;  %v7319_v8 = vld [vmem:[%s9050_s10] sm:$0xff]  }
 0x916   : > { %v6734_v11 = vpop.f32.mrf.mxu1 }
 0x917   : > { %v2049_v12 = vpack.c.bf16 %v1977_v10, %v1977_v10 }
 0x918   : > { %v1979_v52 = vpop.f32.mrf.mxu1 }
 0x919   : > { %v2054_v13 = vsel %vm988_vm2, %v2049_v12, 0  ;;  %v6174_v52 = vld [vmem:[%s9052_s30] ss:$0 sm:$0xff] }
 0x91a   : > { %v6735_v14 = vpop.f32.mrf.mxu1  ;;  %6745 = vmatpush3.bf16.xpose.msra.mxu1 %v2054_v13  ;;  %v6175_v13 = vld [vmem:[%s9053_s9] ss:$0 sm:$0xff] }
 0x91b   : > { %6756 = vmatprep.subr.bf16.mxu1 %v7550_v1 }
 0x921   : > { %6747 = vmatmul.mubr.msk.bf16.vlgmr.msra.gmra.mxu1 %vm988_vm2, %v2048_v15 }
 0x922   : > { %6758 = vmatprep.mubr.msk.bf16.mxu1 %vm7551_vm0, %v7550_v1  ;;  %6757 = vmatpush3.bf16.msra.mxu1 %v8038_v39 }
 0x923   : > { %6770 = vmatprep.subr.bf16.mxu1 %v7550_v1 }
 0x9e1   : > { %v2090_v16 = vpop.f32.mrf.mxu1 }
 0x9e2   : > { %v2096_v17 = vsel %vm1035_vm3, -1e+20, %v2090_v16 }
 0x9e3   : > { %v6748_v18 = vpop.f32.mrf.mxu1  ;;  %v2097_v19 = vsel %vm988_vm2, %v2096_v17, -inf }
 0x9e4   : > { %2098 = vmax.xlane.f32.xlu0 %v2097_v19 }
 0x9e5   : > { %v2093_v20 = vpop.f32.mrf.mxu1 }
 0x9e7   : > { %v6749_v21 = vpop.f32.mrf.mxu1 }
 0xa6d   : > { %v2099_v31 = vpop.xlane.xlu0 %2098 }
 0xa6e   : > { %v2100_v32 = vsub.f32 %v2096_v17, %v2099_v31  ;;  %v6185_v17 = vld [vmem:[%s8995_s11 + $0x4] ss:$0 sm:$0xff] }
 0xa70   : > { %v2101_v33 = vmul.f32 1.442695, %v2100_v32 }
 0xa72   : > { %7360 = vpow2.f32 %v2101_v33 }
 0xa7f   : > { %v7361_v35 = vpop.eup %7360 }
 0xa80   : > { %v2103_v36 = vsel %vm988_vm2, %v7361_v35, 0.0  ;;  %v2106_v37 = vpack.c.bf16 %v7361_v35, %v7361_v35  ;;  %v7320_v35 = vld [vmem:[%s9050_s10 + $0x18] sm:$0xff]  }
 0xa81   : > { %2104 = vadd.xlane.f32.xlu1 %v2103_v36 }
 0xa82   : > { %6753 = vmatmul.mubr.msk.bf16.vlgmr.msra.gmra.mxu0 %vm988_vm2, %v2106_v37 }
 0xa83   : > { %6766 = vmatprep.mubr.msk.bf16.mxu0 %vm7551_vm0, %v7550_v1  ;;  %6763 = vmatpush3.bf16.msra.mxu0 %v7318_v6 }
 0xa84   : > { %6764 = vmatprep.subr.bf16.mxu0 %v7550_v1 }
 0xa87   : > { %6765 = vmatpush3.bf16.msra.mxu0 %v7319_v8 }
 0xa88   : > { %6778 = vmatprep.subr.bf16.mxu0 %v7550_v1 }
 0xb0a   : > { %v2105_v42 = vpop.xlane.xlu1 %2104 }
 0xb0b   : > { %7362 = vrcp.f32 %v2105_v42  ;;  %v2496_v42 = vlaneseq }
 0xb18   : > { %v7363_v43 = vpop.eup %7362 }
 0xb42   : > { %v2148_v44 = vpop.f32.mrf.mxu0 }
 0xb43   : > { %v2155_v45 = vmul.f32 %v7363_v43, %v2148_v44  ;;  %v786_v43 = vld [vmem:[%s780_s5] sm:$0x1]  ;;  %v2497_v44 = vshrl.u32 %v2496_v42, 7 }
 0xb44   : > { %v6754_v46 = vpop.f32.mrf.mxu0  ;;  %vm2494_vm5 = vcmp.eq.f32.partialorder %v786_v43, 0.0 }
 0xb45   : > { %v2156_v47 = vpack.c.bf16 %v2155_v45, %v2155_v45  ;;  %v2498_v45 = vsub.s32 0, %v2497_v44  ;;  %v7552_v46 = vmov 0  }
 0xb46   : > { %v2151_v48 = vpop.f32.mrf.mxu0 }
 0xb47   : > { %6759 = vmatmul.mubr.msk.bf16.vlgmr.msra.gmra.mxu1 %vm988_vm2, %v2156_v47  ;;  %v2495_v47 = vsel %vm2494_vm5, 1, %v7552_v46 }
 0xb48   : > { %v6755_v49 = vpop.f32.mrf.mxu0  ;;  %6774 = vmatprep.mubr.msk.bf16.mxu1 %vm7551_vm0, %v7550_v1  ;;  %v8136_v48 = vrot.slane %v2495_v47, %v2498_v45  ;;  %v6223_v45 = vld [vmem:[%s8995_s11 + $0x9] ss:$0 sm:$0xff] }
 0xb4a   : > { %vm2500_vm6 = vcmp.eq.s32.totalorder %v8136_v48, 1  ;;  %v7475_v48 = vld [vmem:[%s9000_s16 + $0x8] sm:$0xff]  }
 0xc07   : > { %v2199_v50 = vpop.f32.mrf.mxu1 }
 0xc08   : > { %v2205_v53 = vadd.f32 %v2199_v50, %v8009_v63  ;;  %v7316_v63 = vld [vmem:[%s9050_s10 + $0x48] sm:$0xff]  }
 0xc09   : > { %v6760_v54 = vpop.f32.mrf.mxu1  ;;  %6771 = vmatpush3.bf16.msra.mxu1 %v7316_v63 }
 0xc0a   : > { %v2213_v55 = vadd.f32 %v6173_v51, %v2205_v53  ;;  %6772 = vmatprep.subr.bf16.mxu1 %v7550_v1 }
 0xc0b   : > { %v2202_v56 = vpop.f32.mrf.mxu1 }
 0xc0c   : > { %v2214_v57 = vadd.f32 %v2213_v55, %v7759_v5  ;;  %v7317_v5 = vld [vmem:[%s9050_s10 + $0x40] sm:$0xff]  }
 0xc0d   : > { %v6761_v58 = vpop.f32.mrf.mxu1  ;;  %6773 = vmatpush3.bf16.msra.mxu1 %v7317_v5 }
 0xc0e   : > { %v2215_v59 = vsel %vm811_vm1, %v2214_v57, 0.0  ;;  %6786 = vmatprep.subr.bf16.mxu1 %v7550_v1 }
 0xc0f   : > { %2216 = vadd.xlane.f32.xlu0 %v2215_v59 }
 0xc10   : > { %6775 = vmatmul.mubr.msk.bf16.vlgmr.msra.gmra.mxu1 %vm811_vm1, %v8063_v7 }
 0xc11   : > { %6788 = vmatprep.mubr.msk.bf16.mxu1 %vm7551_vm0, %v7550_v1 }
 0xc98   : > { %v2217_v60 = vpop.xlane.xlu0 %2216 }
 0xc99   : > { %v2219_v61 = vmul.f32 0.03125, %v2217_v60  ;;  %v6194_v60 = vld [vmem:[%s8995_s11 + $0x8] ss:$0 sm:$0xff] }
 0xc9b   : > { %v2220_v62 = vsub.f32 %v2214_v57, %v2219_v61 }
 0xc9d   : > { %v2221_v0 = vmul.f32 %v2220_v62, %v2220_v62 }
 0xc9f   : > { %v2222_v2 = vsel %vm811_vm1, %v2221_v0, 0.0 }
 0xca0   : > { %2223 = vadd.xlane.f32.xlu1 %v2222_v2 }
 0xcd0   : > { %v2374_v18 = vpop.f32.mrf.mxu1 }
 0xcd1   : > { %v2375_v19 = vadd.f32 %v6185_v17, %v2374_v18 }
 0xcd2   : > { %v6776_v20 = vpop.f32.mrf.mxu1 }
 0xcd3   : > { %v2447_v21 = vpack.c.bf16 %v2375_v19, %v2375_v19 }
 0xcd4   : > { %v2377_v22 = vpop.f32.mrf.mxu1 }
 0xcd5   : > { %v8098_v23 = vsel %vm988_vm2, %v2447_v21, 0  ;;  %v6214_v21 = vld [vmem:[%s8995_s11 + $0x5] ss:$0 sm:$0xff]  ;;  %v6205_v22 = vld [vmem:[%s8995_s11 + $0x1] ss:$0 sm:$0xff] }
 0xcd6   : > { %v6777_v24 = vpop.f32.mrf.mxu1  ;;  %6787 = vmatpush3.bf16.xpose.msra.mxu1 %v8098_v23 }
 0xcd7   : > { %6798 = vmatprep.subr.bf16.mxu1 %v7550_v1 }
 0xd29   : > { %v2224_v9 = vpop.xlane.xlu1 %2223 }
 0xd2a   : > { %v2225_v10 = vmul.f32 0.03125, %v2224_v9 }
 0xd2c   : > { %v2226_v11 = vadd.f32 1e-05, %v2225_v10 }
 0xd2e   : > { %7364 = vrsqrt.f32 %v2226_v11  ;;  %v7324_v11 = vld [vmem:[%s9050_s10 + $0x58] sm:$0xff]  }
 0xd3b   : > { %v7365_v12 = vpop.eup %7364 }
 0xd3c   : > { %v2228_v3 = vmul.f32 %v7365_v12, %v2220_v62 }
 0xd3e   : > { %v2236_v14 = vmul.f32 %v6174_v52, %v2228_v3  ;;  %v7325_v3 = vld [vmem:[%s9050_s10 + $0x50] sm:$0xff]  }
 0xd40   : > { %v8084_v15 = vadd.f32 %v6175_v13, %v2236_v14  ;;  %v7326_v13 = vld [vmem:[%s9050_s10 + $0x98] sm:$0xff]   ;;  %v7327_v14 = vld [vmem:[%s9050_s10 + $0x90] sm:$0xff]  }
 0xd42   : > { %v8088_v16 = vpack.c.bf16 %v8084_v15, %v8084_v15 }
 0xd44   : > { %6767 = vmatmul.mubr.msk.bf16.vlgmr.msra.gmra.mxu0 %vm811_vm1, %v8088_v16 }
 0xd45   : > { %6782 = vmatprep.mubr.msk.bf16.mxu0 %vm7551_vm0, %v7550_v1  ;;  %6779 = vmatpush3.bf16.msra.mxu0 %v7322_v26 }
 0xd46   : > { %6780 = vmatprep.subr.bf16.mxu0 %v7550_v1 }
 0xd49   : > { %6781 = vmatpush3.bf16.msra.mxu0 %v7323_v27 }
 0xd4a   : > { %6792 = vmatprep.subr.bf16.mxu0 %v7550_v1 }
 0xd4c   : > { %6783 = vmatmul.mubr.msk.bf16.vlgmr.msra.gmra.mxu0 %vm811_vm1, %v8063_v7 }
 0xd4d   : > { %6794 = vmatprep.mubr.msk.bf16.mxu0 %vm7551_vm0, %v7550_v1 }
 0xe04   : > { %v2306_v29 = vpop.f32.mrf.mxu0 }
 0xe05   : > { %v2307_v30 = vadd.f32 %v6176_v28, %v2306_v29 }
 0xe06   : > { %v6768_v31 = vpop.f32.mrf.mxu0 }
 0xe07   : > { %v2445_v32 = vmul.f32 0.17677669, %v2307_v30 }
 0xe08   : > { %v2309_v33 = vpop.f32.mrf.mxu0 }
 0xe09   : > { %v2446_v36 = vpack.c.bf16 %v2445_v32, %v2445_v32 }
 0xe0a   : > { %v6769_v37 = vpop.f32.mrf.mxu0 }
 0xe0b   : > { %6789 = vmatmul.mubr.msk.bf16.vlgmr.msra.gmra.mxu1 %vm988_vm2, %v2446_v36 }
 0xe0c   : > { %6799 = vmatpush3.bf16.msra.mxu1 %v7320_v35  ;;  %6802 = vmatprep.mubr.msk.bf16.mxu1 %vm7551_vm0, %v7550_v1  ;;  %v2439_v61 = vpop.f32.mrf.mxu0 }
 0xe0d   : > { %6800 = vmatprep.subr.bf16.mxu1 %v7550_v1  ;;  %v2440_v62 = vadd.f32 %v6194_v60, %v2439_v61 }
 0xe0e   : > { %v6784_v0 = vpop.f32.mrf.mxu0 }
 0xe0f   : > { %v2512_v2 = vpack.c.bf16 %v2440_v62, %v2440_v62 }
 0xe10   : > { %6801 = vmatpush3.bf16.msra.mxu1 %v7321_v38  ;;  %v2442_v63 = vpop.f32.mrf.mxu0 }
 0xe11   : > { %6814 = vmatprep.subr.bf16.mxu1 %v7550_v1  ;;  %v8146_v5 = vsel %vm1051_vm4, %v2512_v2, 0 }
 0xe12   : > { %v6785_v4 = vpop.f32.mrf.mxu0  ;;  %6793 = vmatpush3.bf16.msra.mxu0 %v8146_v5 }
 0xe13   : > { %6803 = vmatmul.mubr.msk.bf16.vlgmr.msra.gmra.mxu1 %vm811_vm1, %v8088_v16  ;;  %6806 = vmatprep.subr.bf16.mxu0 %v7550_v1 }
 0xe14   : > { %6818 = vmatprep.mubr.msk.bf16.mxu1 %vm7551_vm0, %v7550_v1  ;;  %6815 = vmatpush3.bf16.msra.mxu1 %v7326_v13 }
 0xe15   : > { %6816 = vmatprep.subr.bf16.mxu1 %v7550_v1 }
 0xe18   : > { %6817 = vmatpush3.bf16.msra.mxu1 %v7327_v14  ;;  %v7330_v14 = vld [vmem:[%s9050_s10 + $0x28] sm:$0xff]  }
 0xe19   : > { %6828 = vmatprep.subr.bf16.mxu1 %v7550_v1 }
 0xe1b   : > { %6819 = vmatmul.mubr.msk.bf16.vlgmr.msra.gmra.mxu1 %vm811_vm1, %v8063_v7 }
 0xe1c   : > { %6830 = vmatprep.mubr.msk.bf16.mxu1 %vm7551_vm0, %v7550_v1 }
 0xecb   : > { %v2488_v49 = vpop.f32.mrf.mxu1 }
 0xecc   : > { %v2501_v50 = vsel %vm2500_vm6, -1e+20, %v2488_v49 }
 0xecd   : > { %v6790_v51 = vpop.f32.mrf.mxu1  ;;  %v2502_v53 = vsel %vm988_vm2, %v2501_v50, -inf }
 0xece   : > { %2503 = vmax.xlane.f32.xlu0 %v2502_v53 }
 0xecf   : > { %v2491_v54 = vpop.f32.mrf.mxu1 }
 0xed1   : > { %v6791_v55 = vpop.f32.mrf.mxu1 }
 0xed3   : > { %v2622_v56 = vpop.f32.mrf.mxu1 }
 0xed4   : > { %v2623_v28 = vadd.f32 %v6205_v22, %v2622_v56 }
 0xed5   : > { %v6804_v57 = vpop.f32.mrf.mxu1 }
 0xed6   : > { %v2758_v33 = vmul.f32 0.17677669, %v2623_v28 }
 0xed7   : > { %v2625_v58 = vpop.f32.mrf.mxu1 }
 0xed8   : > { %v2759_v35 = vpack.c.bf16 %v2758_v33, %v2758_v33 }
 0xed9   : > { %v6805_v59 = vpop.f32.mrf.mxu1 }
 0xeda   : > { %v2562_v59 = vld [vmem:[%s8996_s12] sm:$0xf] }
 0xedb   : > { %v2752_v46 = vpop.f32.mrf.mxu1  ;;  %v8208_v0 = vsel %vm1051_vm4, %v2562_v59, 0 }
 0xedc   : > { %v2753_v47 = vadd.f32 %v6223_v45, %v2752_v46  ;;  %v6237_v46 = vld [vmem:[%s8995_s11 + $0x2] ss:$0 sm:$0xff] }
 0xedd   : > { %v6820_v49 = vpop.f32.mrf.mxu1 }
 0xedf   : > { %v2755_v51 = vpop.f32.mrf.mxu1 }
 0xee1   : > { %v6821_v54 = vpop.f32.mrf.mxu1 }
 0xf57   : > { %v2504_v6 = vpop.xlane.xlu0 %2503 }
 0xf58   : > { %v2505_v8 = vsub.f32 %v2501_v50, %v2504_v6  ;;  %v2818_v50 = vpack.c.bf16 %v2753_v47, %v2753_v47  ;;  %v7328_v6 = vld [vmem:[%s9050_s10 + $0x68] sm:$0xff]  }
 0xf5a   : > { %v2506_v9 = vmul.f32 1.442695, %v2505_v8  ;;  %v8199_v53 = vsel %vm1051_vm4, %v2818_v50, 0  ;;  %v6229_v8 = vld [vmem:[%s8996_s12 + $0x4] sm:$0xf] }
 0xf5b   : > { %6829 = vmatpush3.bf16.msra.mxu1 %v8199_v53 }
 0xf5c   : > { %7366 = vpow2.f32 %v2506_v9  ;;  %6840 = vmatprep.subr.bf16.mxu1 %v7550_v1  ;;  %v8225_v9 = vsel %vm1051_vm4, %v6229_v8, 0 }
 0xf69   : > { %v7367_v10 = vpop.eup %7366 }
 0xf6a   : > { %v2508_v12 = vsel %vm988_vm2, %v7367_v10, 0.0  ;;  %v2511_v52 = vpack.c.bf16 %v7367_v10, %v7367_v10  ;;  %v7329_v10 = vld [vmem:[%s9050_s10 + $0x60] sm:$0xff]  }
 0xf6b   : > { %2509 = vadd.xlane.f32.xlu0 %v2508_v12 }
 0xf6c   : > { %6795 = vmatmul.mubr.msk.bf16.vlgmr.msra.gmra.mxu0 %vm988_vm2, %v2511_v52 }
 0xf6d   : > { %6807 = vmatpush3.bf16.msra.mxu0 %v7324_v11  ;;  %6810 = vmatprep.mubr.msk.bf16.mxu0 %vm7551_vm0, %v7550_v1 }
 0xf6e   : > { %6808 = vmatprep.subr.bf16.mxu0 %v7550_v1 }
 0xf71   : > { %6809 = vmatpush3.bf16.msra.mxu0 %v7325_v3 }
 0xf72   : > { %6822 = vmatprep.subr.bf16.mxu0 %v7550_v1 }
 0xf74   : > { %6811 = vmatmul.mubr.msk.bf16.vlgmr.msra.gmra.mxu0 %vm811_vm1, %v8063_v7 }
 0xf75   : > { %6824 = vmatprep.mubr.msk.bf16.mxu0 %vm7551_vm0, %v7550_v1 }
 0xff4   : > { %v2510_v58 = vpop.xlane.xlu0 %2509 }
0x102c   : > { %v2553_v17 = vpop.f32.mrf.mxu0 }
0x102e   : > { %v6796_v18 = vpop.f32.mrf.mxu0 }
0x1030   : > { %v2556_v19 = vpop.f32.mrf.mxu0 }
0x1032   : > { %v6797_v20 = vpop.f32.mrf.mxu0 }
0x1033   : > { %v7331_v20 = vld [vmem:[%s9050_s10 + $0x20] sm:$0xff]  }
0x1034   : > { %v2687_v24 = vpop.f32.mrf.mxu0 }
0x1035   : > { %v2688_v26 = vadd.f32 %v6214_v21, %v2687_v24 }
0x1036   : > { %v6812_v27 = vpop.f32.mrf.mxu0 }
0x1037   : > { %v2760_v29 = vpack.c.bf16 %v2688_v26, %v2688_v26  ;;  %v6246_v27 = vld [vmem:[%s8995_s11 + $0x6] ss:$0 sm:$0xff] }
0x1038   : > { %v2690_v30 = vpop.f32.mrf.mxu0 }
0x1039   : > { %v8185_v31 = vsel %vm988_vm2, %v2760_v29, 0 }
0x103a   : > { %v6813_v32 = vpop.f32.mrf.mxu0  ;;  %6823 = vmatpush3.bf16.xpose.msra.mxu0 %v8185_v31 }
0x103b   : > { %6834 = vmatprep.subr.bf16.mxu0 %v7550_v1 }
0x1041   : > { %6825 = vmatmul.mubr.msk.bf16.vlgmr.msra.gmra.mxu0 %vm988_vm2, %v2759_v35 }
0x1042   : > { %6836 = vmatprep.mubr.msk.bf16.mxu0 %vm7551_vm0, %v7550_v1  ;;  %6835 = vmatpush3.bf16.msra.mxu0 %v8225_v9 }
0x1043   : > { %6846 = vmatprep.subr.bf16.mxu0 %v7550_v1 }
0x1101   : > { %v2801_v36 = vpop.f32.mrf.mxu0 }
0x1102   : > { %v2807_v37 = vsel %vm2500_vm6, -1e+20, %v2801_v36 }
0x1103   : > { %v6826_v38 = vpop.f32.mrf.mxu0  ;;  %v2808_v42 = vsel %vm988_vm2, %v2807_v37, -inf }
0x1104   : > { %2809 = vmax.xlane.f32.xlu1 %v2808_v42  ;;  %v7333_v38 = vld [vmem:[%s9050_s10 + $0xa0] sm:$0xff]  }
0x1105   : > { %v2804_v43 = vpop.f32.mrf.mxu0 }
0x1107   : > { %v6827_v44 = vpop.f32.mrf.mxu0 }
0x118d   : > { %v2810_v55 = vpop.xlane.xlu1 %2809 }
0x118e   : > { %v2811_v56 = vsub.f32 %v2807_v37, %v2810_v55  ;;  %v7332_v37 = vld [vmem:[%s9050_s10 + $0xa8] sm:$0xff]  }
0x1190   : > { %v2812_v57 = vmul.f32 1.442695, %v2811_v56 }
0x1192   : > { %7368 = vpow2.f32 %v2812_v57 }
0x1193   : > { %7370 = vrcp.f32 %v2510_v58 }
0x119f   : > { %v7369_v60 = vpop.eup %7368 }
0x11a0   : > { %v2814_v61 = vsel %vm988_vm2, %v7369_v60, 0.0  ;;  %v2817_v62 = vpack.c.bf16 %v7369_v60, %v7369_v60  ;;  %v7371_v2 = vpop.eup %7370 }
0x11a1   : > { %2815 = vadd.xlane.f32.xlu1 %v2814_v61  ;;  %v2560_v63 = vmul.f32 %v7371_v2, %v2553_v17  ;;  %v6255_v2 = vld [vmem:[%s8995_s11 + $0xa] ss:$0 sm:$0xff] }
0x11a2   : > { %6831 = vmatmul.mubr.msk.bf16.vlgmr.msra.gmra.mxu1 %vm988_vm2, %v2817_v62 }
0x11a3   : > { %6841 = vmatpush3.bf16.msra.mxu1 %v8208_v0  ;;  %6842 = vmatprep.mubr.msk.bf16.mxu1 %vm7551_vm0, %v7550_v1  ;;  %v2561_v4 = vpack.c.bf16 %v2560_v63, %v2560_v63 }
0x11a4   : > { %6854 = vmatprep.subr.bf16.mxu1 %v7550_v1 }
0x11aa   : > { %6843 = vmatmul.mubr.msk.bf16.vlgmr.msra.gmra.mxu1 %vm988_vm2, %v2561_v4 }
0x11ab   : > { %6858 = vmatprep.mubr.msk.bf16.mxu1 %vm7551_vm0, %v7550_v1  ;;  %6855 = vmatpush3.bf16.msra.mxu1 %v7328_v6 }
0x11ac   : > { %6856 = vmatprep.subr.bf16.mxu1 %v7550_v1 }
0x11af   : > { %6857 = vmatpush3.bf16.msra.mxu1 %v7329_v10 }
0x11b0   : > { %6870 = vmatprep.subr.bf16.mxu1 %v7550_v1 }
0x11b2   : > { %6859 = vmatmul.mubr.msk.bf16.vlgmr.msra.gmra.mxu1 %vm811_vm1, %v8063_v7 }
0x11b3   : > { %6872 = vmatprep.mubr.msk.bf16.mxu1 %vm7551_vm0, %v7550_v1 }
0x122a   : > { %v2816_v11 = vpop.xlane.xlu1 %2815 }
0x122b   : > { %7372 = vrcp.f32 %v2816_v11 }
0x1238   : > { %v7373_v12 = vpop.eup %7372 }
0x1262   : > { %v2859_v52 = vpop.f32.mrf.mxu1 }
0x1263   : > { %v2866_v3 = vmul.f32 %v7373_v12, %v2859_v52 }
0x1264   : > { %v6832_v13 = vpop.f32.mrf.mxu1 }
0x1265   : > { %v2867_v17 = vpack.c.bf16 %v2866_v3, %v2866_v3 }
0x1266   : > { %v2862_v18 = vpop.f32.mrf.mxu1 }
0x1267   : > { %6837 = vmatmul.mubr.msk.bf16.vlgmr.msra.gmra.mxu0 %vm988_vm2, %v2867_v17  ;;  %v7334_v17 = vld [vmem:[%s9050_s10 + $0x38] sm:$0xff]  }
0x1268   : > { %v6833_v19 = vpop.f32.mrf.mxu1  ;;  %6847 = vmatpush3.bf16.msra.mxu0 %v7330_v14  ;;  %6850 = vmatprep.mubr.msk.bf16.mxu0 %vm7551_vm0, %v7550_v1 }
0x1269   : > { %6848 = vmatprep.subr.bf16.mxu0 %v7550_v1 }
0x126a   : > { %v8248_v21 = vpop.f32.mrf.mxu1 }
0x126c   : > { %v6844_v22 = vpop.f32.mrf.mxu1  ;;  %6849 = vmatpush3.bf16.msra.mxu0 %v7331_v20  ;;  %v7335_v20 = vld [vmem:[%s9050_s10 + $0x30] sm:$0xff]  }
0x126d   : > { %6862 = vmatprep.subr.bf16.mxu0 %v7550_v1  ;;  %v6261_v22 = vld [vmem:[%s8996_s12 + $0x8] sm:$0xf] }
0x126e   : > { %v2959_v24 = vpop.f32.mrf.mxu1 }
0x126f   : > { %6851 = vmatmul.mubr.msk.bf16.vlgmr.msra.gmra.mxu0 %vm811_vm1, %v8088_v16  ;;  %v8314_v24 = vsel %vm1051_vm4, %v6261_v22, 0 }
0x1270   : > { %v6845_v26 = vpop.f32.mrf.mxu1  ;;  %6866 = vmatprep.mubr.msk.bf16.mxu0 %vm7551_vm0, %v7550_v1  ;;  %6863 = vmatpush3.bf16.msra.mxu0 %v7332_v37  ;;  %v7337_v37 = vld [vmem:[%s9050_s10 + $0x70] sm:$0xff]  }
0x1271   : > { %6864 = vmatprep.subr.bf16.mxu0 %v7550_v1 }
0x1272   : > { %v3086_v28 = vpop.f32.mrf.mxu1 }
0x1273   : > { %v3087_v29 = vadd.f32 %v6246_v27, %v3086_v28 }
0x1274   : > { %v6860_v30 = vpop.f32.mrf.mxu1  ;;  %6865 = vmatpush3.bf16.msra.mxu0 %v7333_v38 }
0x1275   : > { %v3159_v32 = vpack.c.bf16 %v3087_v29, %v3087_v29  ;;  %6876 = vmatprep.subr.bf16.mxu0 %v7550_v1  ;;  %v7336_v30 = vld [vmem:[%s9050_s10 + $0x78] sm:$0xff]  }
0x1276   : > { %v3089_v33 = vpop.f32.mrf.mxu1 }
0x1277   : > { %v8259_v35 = vsel %vm988_vm2, %v3159_v32, 0  ;;  %6867 = vmatmul.mubr.msk.bf16.vlgmr.msra.gmra.mxu0 %vm811_vm1, %v8063_v7 }
0x1278   : > { %v6861_v36 = vpop.f32.mrf.mxu1  ;;  %6871 = vmatpush3.bf16.xpose.msra.mxu1 %v8259_v35  ;;  %6878 = vmatprep.mubr.msk.bf16.mxu0 %vm7551_vm0, %v7550_v1 }
0x1279   : > { %6882 = vmatprep.subr.bf16.mxu1 %v7550_v1 }
0x1327   : > { %v8275_v42 = vpop.f32.mrf.mxu0 }
0x1329   : > { %v6838_v43 = vpop.f32.mrf.mxu0 }
0x132b   : > { %v2913_v44 = vpop.f32.mrf.mxu0 }
0x132d   : > { %v6839_v45 = vpop.f32.mrf.mxu0 }
0x132f   : > { %v3021_v47 = vpop.f32.mrf.mxu0 }
0x1330   : > { %v3022_v49 = vadd.f32 %v6237_v46, %v3021_v47  ;;  %v7338_v46 = vld [vmem:[%s9050_s10 + $0xb8] sm:$0xff]   ;;  %v7339_v47 = vld [vmem:[%s9050_s10 + $0xb0] sm:$0xff]  }
0x1331   : > { %v6852_v50 = vpop.f32.mrf.mxu0 }
0x1332   : > { %v3157_v51 = vmul.f32 0.17677669, %v3022_v49  ;;  %v2957_v49 = vadd.f32 %v8248_v21, %v8275_v42 }
0x1333   : > { %v3024_v54 = vpop.f32.mrf.mxu0 }
0x1334   : > { %v3158_v55 = vpack.c.bf16 %v3157_v51, %v3157_v51 }
0x1335   : > { %v6853_v56 = vpop.f32.mrf.mxu0 }
0x1336   : > { %6873 = vmatmul.mubr.msk.bf16.vlgmr.msra.gmra.mxu1 %vm988_vm2, %v3158_v55 }
0x1337   : > { %6884 = vmatprep.mubr.msk.bf16.mxu1 %vm7551_vm0, %v7550_v1  ;;  %v3151_v63 = vpop.f32.mrf.mxu0  ;;  %6883 = vmatpush3.bf16.msra.mxu1 %v8314_v24 }
0x1338   : > { %v3152_v4 = vadd.f32 %v6255_v2, %v3151_v63  ;;  %6896 = vmatprep.subr.bf16.mxu1 %v7550_v1 }
0x1339   : > { %v6868_v6 = vpop.f32.mrf.mxu0 }
0x133a   : > { %v3217_v8 = vpack.c.bf16 %v3152_v4, %v3152_v4 }
0x133b   : > { %v3154_v10 = vpop.f32.mrf.mxu0 }
0x133c   : > { %v8290_v11 = vsel %vm1051_vm4, %v3217_v8, 0 }
0x133d   : > { %v6869_v12 = vpop.f32.mrf.mxu0  ;;  %6877 = vmatpush3.bf16.msra.mxu0 %v8290_v11 }
0x133e   : > { %6888 = vmatprep.subr.bf16.mxu0 %v7550_v1 }
0x13f6   : > { %v3200_v57 = vpop.f32.mrf.mxu1 }
0x13f7   : > { %v3206_v58 = vsel %vm2500_vm6, -1e+20, %v3200_v57  ;;  %v6277_v57 = vld [vmem:[%s8995_s11 + $0x7] ss:$0 sm:$0xff] }
0x13f8   : > { %v6874_v59 = vpop.f32.mrf.mxu1  ;;  %v3207_v60 = vsel %vm988_vm2, %v3206_v58, -inf }
0x13f9   : > { %3208 = vmax.xlane.f32.xlu0 %v3207_v60 }
0x13fa   : > { %v3203_v61 = vpop.f32.mrf.mxu1 }
0x13fc   : > { %v6875_v62 = vpop.f32.mrf.mxu1 }
0x1482   : > { %v3209_v52 = vpop.xlane.xlu0 %3208 }
0x1483   : > { %v3210_v3 = vsub.f32 %v3206_v58, %v3209_v52 }
0x1485   : > { %v3211_v13 = vmul.f32 1.442695, %v3210_v3 }
0x1487   : > { %7374 = vpow2.f32 %v3211_v13  ;;  %v6286_v13 = vld [vmem:[%s8995_s11 + $0xb] ss:$0 sm:$0xff] }
0x1494   : > { %v7375_v14 = vpop.eup %7374 }
0x1495   : > { %v3213_v18 = vsel %vm988_vm2, %v7375_v14, 0.0  ;;  %v3216_v19 = vpack.c.bf16 %v7375_v14, %v7375_v14 }
0x1496   : > { %3214 = vadd.xlane.f32.xlu1 %v3213_v18 }
0x1497   : > { %6879 = vmatmul.mubr.msk.bf16.vlgmr.msra.gmra.mxu0 %vm988_vm2, %v3216_v19 }
0x1498   : > { %6889 = vmatpush3.bf16.msra.mxu0 %v7334_v17  ;;  %6892 = vmatprep.mubr.msk.bf16.mxu0 %vm7551_vm0, %v7550_v1 }
0x1499   : > { %6890 = vmatprep.subr.bf16.mxu0 %v7550_v1 }
0x149c   : > { %6891 = vmatpush3.bf16.msra.mxu0 %v7335_v20 }
0x149d   : > { %6904 = vmatprep.subr.bf16.mxu0 %v7550_v1 }
0x149f   : > { %6893 = vmatmul.mubr.msk.bf16.vlgmr.msra.gmra.mxu0 %vm811_vm1, %v8088_v16 }
0x14a0   : > { %6908 = vmatprep.mubr.msk.bf16.mxu0 %vm7551_vm0, %v7550_v1  ;;  %6905 = vmatpush3.bf16.msra.mxu0 %v7338_v46 }
0x14a1   : > { %6906 = vmatprep.subr.bf16.mxu0 %v7550_v1 }
0x14a4   : > { %6907 = vmatpush3.bf16.msra.mxu0 %v7339_v47 }
0x14a5   : > { %6918 = vmatprep.subr.bf16.mxu0 %v7550_v1 }
0x14a7   : > { %6909 = vmatmul.mubr.msk.bf16.vlgmr.msra.gmra.mxu0 %vm811_vm1, %v8063_v7 }
0x14a8   : > { %6920 = vmatprep.mubr.msk.bf16.mxu0 %vm7551_vm0, %v7550_v1 }
0x151f   : > { %v3215_v26 = vpop.xlane.xlu1 %3214 }
0x1520   : > { %7376 = vrcp.f32 %v3215_v26 }
0x152d   : > { %v7377_v27 = vpop.eup %7376 }
0x1557   : > { %v3258_v28 = vpop.f32.mrf.mxu0 }
0x1558   : > { %v3265_v29 = vmul.f32 %v7377_v27, %v3258_v28 }
0x1559   : > { %v6880_v16 = vpop.f32.mrf.mxu0 }
0x155a   : > { %v3266_v32 = vpack.c.bf16 %v3265_v29, %v3265_v29 }
0x155b   : > { %v3261_v33 = vpop.f32.mrf.mxu0 }
0x155c   : > { %6885 = vmatmul.mubr.msk.bf16.vlgmr.msra.gmra.mxu1 %vm988_vm2, %v3266_v32  ;;  %v6292_v33 = vld [vmem:[%s8996_s12 + $0xc] sm:$0xf] }
0x155d   : > { %v6881_v36 = vpop.f32.mrf.mxu0  ;;  %6897 = vmatpush3.bf16.msra.mxu1 %v7336_v30  ;;  %6900 = vmatprep.mubr.msk.bf16.mxu1 %vm7551_vm0, %v7550_v1 }
0x155e   : > { %6898 = vmatprep.subr.bf16.mxu1 %v7550_v1  ;;  %v8382_v36 = vsel %vm1051_vm4, %v6292_v33, 0 }
0x155f   : > { %v3375_v38 = vpop.f32.mrf.mxu0 }
0x1561   : > { %v6894_v43 = vpop.f32.mrf.mxu0  ;;  %6899 = vmatpush3.bf16.msra.mxu1 %v7337_v37 }
0x1562   : > { %6912 = vmatprep.subr.bf16.mxu1 %v7550_v1 }
0x1563   : > { %v3378_v44 = vpop.f32.mrf.mxu0 }
0x1564   : > { %6901 = vmatmul.mubr.msk.bf16.vlgmr.msra.gmra.mxu1 %vm811_vm1, %v8063_v7  ;;  %v6268_v7 = vld [vmem:[%s8995_s11 + $0x3] ss:$0 sm:$0xff] }
0x1565   : > { %v6895_v45 = vpop.f32.mrf.mxu0  ;;  %6914 = vmatprep.mubr.msk.bf16.mxu1 %vm7551_vm0, %v7550_v1  ;;  %v3376_v61 = vadd.f32 %v6268_v7, %v3375_v38 }
0x1567   : > { %v3511_v63 = vmul.f32 0.17677669, %v3376_v61  ;;  %v3505_v14 = vpop.f32.mrf.mxu0 }
0x1568   : > { %v3506_v17 = vadd.f32 %v6286_v13, %v3505_v14  ;;  %v6296_v14 = vld [vmem:[%s8999_s15] ss:$0 sm:$0xff] }
0x1569   : > { %v3512_v4 = vpack.c.bf16 %v3511_v63, %v3511_v63  ;;  %v6910_v18 = vpop.f32.mrf.mxu0 }
0x156a   : > { %v3571_v19 = vpack.c.bf16 %v3506_v17, %v3506_v17 }
0x156b   : > { %v3508_v20 = vpop.f32.mrf.mxu0 }
0x156c   : > { %v8370_v22 = vsel %vm1051_vm4, %v3571_v19, 0  ;;  %v7424_v20 = vld [vmem:[%s9043_s1 + $0x8] sm:$0xff]  }
0x156d   : > { %v6911_v26 = vpop.f32.mrf.mxu0  ;;  %6919 = vmatpush3.bf16.msra.mxu0 %v8370_v22 }
0x156e   : > { %6930 = vmatprep.subr.bf16.mxu0 %v7550_v1  ;;  %v7425_v26 = vld [vmem:[%s9043_s1] sm:$0xff]  }
0x161c   : > { %v3309_v50 = vpop.f32.mrf.mxu1 }
0x161d   : > { %v8347_v51 = vadd.f32 %v3309_v50, %v2957_v49 }
0x161e   : > { %v6886_v54 = vpop.f32.mrf.mxu1 }
0x161f   : > { %v6294_v54 = vld [vmem:[%s8997_s13] ss:$0 sm:$0xff] }
0x1620   : > { %v3312_v55 = vpop.f32.mrf.mxu1 }
0x1622   : > { %v6887_v56 = vpop.f32.mrf.mxu1 }
0x1624   : > { %v3440_v58 = vpop.f32.mrf.mxu1 }
0x1625   : > { %v3441_v59 = vadd.f32 %v6277_v57, %v3440_v58 }
0x1626   : > { %v6902_v60 = vpop.f32.mrf.mxu1 }
0x1627   : > { %v3513_v62 = vpack.c.bf16 %v3441_v59, %v3441_v59 }
0x1628   : > { %v3443_v21 = vpop.f32.mrf.mxu1 }
0x1629   : > { %v8356_v42 = vsel %vm988_vm2, %v3513_v62, 0 }
0x162a   : > { %v6903_v2 = vpop.f32.mrf.mxu1  ;;  %6913 = vmatpush3.bf16.xpose.msra.mxu1 %v8356_v42 }
0x162b   : > { %6924 = vmatprep.subr.bf16.mxu1 %v7550_v1 }
0x1631   : > { %6915 = vmatmul.mubr.msk.bf16.vlgmr.msra.gmra.mxu1 %vm988_vm2, %v3512_v4  ;;  %v7342_v4 = vld [vmem:[%s9002_s18 + $0x18] sm:$0xff]  }
0x1632   : > { %6926 = vmatprep.mubr.msk.bf16.mxu1 %vm7551_vm0, %v7550_v1  ;;  %6925 = vmatpush3.bf16.msra.mxu1 %v8382_v36 }
0x1633   : > { %6938 = vmatprep.subr.bf16.mxu1 %v7550_v1 }
0x16f1   : > { %v3554_v6 = vpop.f32.mrf.mxu1 }
0x16f2   : > { %v3560_v8 = vsel %vm2500_vm6, -1e+20, %v3554_v6  ;;  %v7343_v6 = vld [vmem:[%s9002_s18 + $0x10] sm:$0xff]  }
0x16f3   : > { %v6916_v10 = vpop.f32.mrf.mxu1  ;;  %v3561_v12 = vsel %vm988_vm2, %v3560_v8, -inf }
0x16f4   : > { %3562 = vmax.xlane.f32.xlu0 %v3561_v12 }
0x16f5   : > { %v3557_v52 = vpop.f32.mrf.mxu1 }
0x16f7   : > { %v6917_v3 = vpop.f32.mrf.mxu1 }
0x16f8   : > { %v6295_v3 = vld [vmem:[%s8998_s14] ss:$0 sm:$0xff] }
0x177d   : > { %v3563_v27 = vpop.xlane.xlu0 %3562 }
0x177e   : > { %v3564_v28 = vsub.f32 %v3560_v8, %v3563_v27  ;;  %v7344_v27 = vld [vmem:[%s9002_s18 + $0x8] sm:$0xff]  }
0x1780   : > { %v3565_v29 = vmul.f32 1.442695, %v3564_v28  ;;  %v7345_v28 = vld [vmem:[%s9002_s18] sm:$0xff]  }
0x1782   : > { %7378 = vpow2.f32 %v3565_v29  ;;  %v6297_v29 = vld [vmem:[%s9001_s17] ss:$0 sm:$0xff] }
0x178f   : > { %v7379_v16 = vpop.eup %7378 }
0x1790   : > { %v3567_v30 = vsel %vm988_vm2, %v7379_v16, 0.0  ;;  %v3570_v32 = vpack.c.bf16 %v7379_v16, %v7379_v16 }
0x1791   : > { %3568 = vadd.xlane.f32.xlu1 %v3567_v30 }
0x1792   : > { %6921 = vmatmul.mubr.msk.bf16.vlgmr.msra.gmra.mxu0 %vm988_vm2, %v3570_v32 }
0x1793   : > { %6934 = vmatprep.mubr.msk.bf16.mxu0 %vm7551_vm0, %v7550_v1 }
0x181a   : > { %v3569_v37 = vpop.xlane.xlu1 %3568 }
0x181b   : > { %7380 = vrcp.f32 %v3569_v37 }
0x1828   : > { %v7381_v38 = vpop.eup %7380 }
0x1852   : > { %v3612_v43 = vpop.f32.mrf.mxu0 }
0x1853   : > { %v3619_v44 = vmul.f32 %v7381_v38, %v3612_v43 }
0x1854   : > { %v6922_v45 = vpop.f32.mrf.mxu0 }
0x1855   : > { %v3620_v46 = vpack.c.bf16 %v3619_v44, %v3619_v44  ;;  %v7426_v44 = vld [vmem:[%s9043_s1 + $0x88] sm:$0xff]   ;;  %v7427_v45 = vld [vmem:[%s9043_s1 + $0x80] sm:$0xff]  }
0x1856   : > { %v3615_v47 = vpop.f32.mrf.mxu0 }
0x1857   : > { %6927 = vmatmul.mubr.msk.bf16.vlgmr.msra.gmra.mxu1 %vm988_vm2, %v3620_v46  ;;  %v6301_v46 = vld [vmem:[%s9003_s19] ss:$0 sm:$0xff] }
0x1858   : > { %v6923_v49 = vpop.f32.mrf.mxu0  ;;  %6946 = vmatprep.mubr.msk.bf16.mxu1 %vm7551_vm0, %v7550_v1  ;;  %6939 = vmatpush3.bf16.msra.mxu1 %v7342_v4  ;;  %v6308_v4 = vld [vmem:[%s9005_s21] ss:$0 sm:$0xff] }
0x1859   : > { %6940 = vmatprep.subr.bf16.mxu1 %v7550_v1 }
0x185c   : > { %6941 = vmatpush3.bf16.msra.mxu1 %v7343_v6 }
0x185d   : > { %6942 = vmatprep.subr.bf16.mxu1 %v7550_v1 }
0x1860   : > { %6943 = vmatpush3.bf16.msra.mxu1 %v7344_v27 }
0x1861   : > { %6944 = vmatprep.subr.bf16.mxu1 %v7550_v1 }
0x1864   : > { %6945 = vmatpush3.bf16.msra.mxu1 %v7345_v28 }
0x1865   : > { %6966 = vmatprep.subr.bf16.mxu1 %v7550_v1 }
0x1917   : > { %v3663_v50 = vpop.f32.mrf.mxu1 }
0x1918   : > { %v3669_v55 = vadd.f32 %v3663_v50, %v8347_v51  ;;  %v7340_v51 = vld [vmem:[%s9000_s16 + $0x8] sm:$0xff]  }
0x1919   : > { %v6928_v56 = vpop.f32.mrf.mxu1  ;;  %6931 = vmatpush3.bf16.msra.mxu0 %v7340_v51  ;;  %v6307_v51 = vld [vmem:[%s9004_s20] ss:$0 sm:$0xff] }
0x191a   : > { %v3677_v57 = vadd.f32 %v6294_v54, %v3669_v55  ;;  %6932 = vmatprep.subr.bf16.mxu0 %v7550_v1 }
0x191b   : > { %v3666_v7 = vpop.f32.mrf.mxu1 }
0x191c   : > { %v3678_v58 = vadd.f32 %v3677_v57, %v8084_v15  ;;  %v7341_v15 = vld [vmem:[%s9000_s16] sm:$0xff]  }
0x191d   : > { %v6929_v59 = vpop.f32.mrf.mxu1  ;;  %6933 = vmatpush3.bf16.msra.mxu0 %v7341_v15 }
0x191e   : > { %v3679_v60 = vsel %vm811_vm1, %v3678_v58, 0.0  ;;  %6950 = vmatprep.subr.bf16.mxu0 %v7550_v1 }
0x191f   : > { %3680 = vadd.xlane.f32.xlu0 %v3679_v60 }
0x19a8   : > { %v3681_v61 = vpop.xlane.xlu0 %3680 }
0x19a9   : > { %v3682_v62 = vmul.f32 0.03125, %v3681_v61 }
0x19ab   : > { %v3683_v21 = vsub.f32 %v3678_v58, %v3682_v62 }
0x19ad   : > { %v3684_v2 = vmul.f32 %v3683_v21, %v3683_v21 }
0x19af   : > { %v3685_v63 = vsel %vm811_vm1, %v3684_v2, 0.0 }
0x19b0   : > { %3686 = vadd.xlane.f32.xlu1 %v3685_v63 }
0x1a39   : > { %v3687_v8 = vpop.xlane.xlu1 %3686 }
0x1a3a   : > { %v3688_v10 = vmul.f32 0.03125, %v3687_v8 }
0x1a3c   : > { %v3689_v12 = vadd.f32 1e-05, %v3688_v10 }
0x1a3e   : > { %7382 = vrsqrt.f32 %v3689_v12  ;;  %v7428_v12 = vld [vmem:[%s9043_s1 + $0x48] sm:$0xff]  }
0x1a4b   : > { %v7383_v52 = vpop.eup %7382 }
0x1a4c   : > { %v3691_v13 = vmul.f32 %v7383_v52, %v3683_v21  ;;  %v7429_v52 = vld [vmem:[%s9043_s1 + $0x40] sm:$0xff]  }
0x1a4e   : > { %v3699_v17 = vmul.f32 %v6295_v3, %v3691_v13 }
0x1a50   : > { %v3707_v18 = vadd.f32 %v6296_v14, %v3699_v17  ;;  %v7430_v14 = vld [vmem:[%s9046_s29 + $0x8] ss:$0 sm:$0xff] }
0x1a52   : > { %v3712_v19 = vpack.c.bf16 %v3707_v18, %v3707_v18 }
0x1a54   : > { %6935 = vmatmul.mubr.msk.bf16.vlgmr.msra.gmra.mxu0 %vm811_vm1, %v3712_v19 }
0x1a55   : > { %6951 = vmatpush3.bf16.msra.mxu0 %v7424_v20  ;;  %6954 = vmatprep.mubr.msk.bf16.mxu0 %vm7551_vm0, %v7550_v1 }
0x1a56   : > { %6952 = vmatprep.subr.bf16.mxu0 %v7550_v1 }
0x1a59   : > { %6953 = vmatpush3.bf16.msra.mxu0 %v7425_v26 }
0x1a5a   : > { %6958 = vmatprep.subr.bf16.mxu0 %v7550_v1 }
0x1b14   : > { %v3769_v16 = vpop.f32.mrf.mxu0 }
0x1b15   : > { %v3770_v30 = vadd.f32 %v6297_v29, %v3769_v16 }
0x1b16   : > { %v6936_v32 = vpop.f32.mrf.mxu0 }
0x1b17   : > { %v3775_v33 = vmax.f32 %v3770_v30, 0.0  ;;  %v7431_v32 = vld [vmem:[%s9046_s29 + $0x4] ss:$0 sm:$0xff] }
0x1b18   : > { %v3772_v37 = vpop.f32.mrf.mxu0 }
0x1b19   : > { %v3784_v38 = vpack.c.bf16 %v3775_v33, %v3775_v33 }
0x1b1a   : > { %v6937_v43 = vpop.f32.mrf.mxu0 }
0x1b1b   : > { %6947 = vmatmul.mubr.msk.bf16.vlgmr.msra.gmra.mxu1 %vm3816_vm7, %v3784_v38  ;;  %v7432_v38 = vld [vmem:[%s9046_s29] ss:$0 sm:$0xff] }
0x1b1c   : > { %6967 = vmatpush3.bf16.msra.mxu1 %v7426_v44  ;;  %6970 = vmatprep.mubr.msk.bf16.mxu1 %vm7551_vm0, %v7550_v1 }
0x1b1d   : > { %6968 = vmatprep.subr.bf16.mxu1 %v7550_v1 }
0x1b20   : > { %6969 = vmatpush3.bf16.msra.mxu1 %v7427_v45 }
0x1b21   : > { %6980 = vmatprep.subr.bf16.mxu1 %v7550_v1 }
0x1bdb   : > { %v3854_v47 = vpop.f32.mrf.mxu1 }
0x1bdc   : > { %v3855_v49 = vadd.f32 %v6301_v46, %v3854_v47 }
0x1bdd   : > { %v6948_v50 = vpop.f32.mrf.mxu1 }
0x1bde   : > { %v3860_v54 = vadd.f32 %v3855_v49, %v3707_v18 }
0x1bdf   : > { %v3857_v55 = vpop.f32.mrf.mxu1 }
0x1be0   : > { %v3861_v56 = vsel %vm811_vm1, %v3860_v54, 0.0  ;;  %v7434_v55 = vld [vmem:[%s9043_s1 + $0x10] sm:$0xff]  }
0x1be1   : > { %3862 = vadd.xlane.f32.xlu0 %v3861_v56  ;;  %v6949_v57 = vpop.f32.mrf.mxu1  ;;  %v7435_v56 = vld [vmem:[%s9043_s1 + $0x98] sm:$0xff]  }
0x1be2   : > { %v7436_v57 = vld [vmem:[%s9043_s1 + $0x90] sm:$0xff]  }
0x1c6a   : > { %v3863_v7 = vpop.xlane.xlu0 %3862 }
0x1c6b   : > { %v3864_v58 = vmul.f32 0.03125, %v3863_v7 }
0x1c6d   : > { %v3865_v59 = vsub.f32 %v3860_v54, %v3864_v58  ;;  %v7433_v54 = vld [vmem:[%s9043_s1 + $0x18] sm:$0xff]  }
0x1c6f   : > { %v3866_v60 = vmul.f32 %v3865_v59, %v3865_v59 }
0x1c71   : > { %v3867_v61 = vsel %vm811_vm1, %v3866_v60, 0.0 }
0x1c72   : > { %3868 = vadd.xlane.f32.xlu1 %v3867_v61 }
0x1cfb   : > { %v3869_v62 = vpop.xlane.xlu1 %3868 }
0x1cfc   : > { %v3870_v21 = vmul.f32 0.03125, %v3869_v62 }
0x1cfe   : > { %v3871_v2 = vadd.f32 1e-05, %v3870_v21 }
0x1d00   : > { %7384 = vrsqrt.f32 %v3871_v2 }
0x1d0d   : > { %v7385_v63 = vpop.eup %7384 }
0x1d0e   : > { %v3873_v15 = vmul.f32 %v7385_v63, %v3865_v59 }
0x1d10   : > { %v3881_v6 = vmul.f32 %v6307_v51, %v3873_v15 }
0x1d12   : > { %v8462_v8 = vadd.f32 %v6308_v4, %v3881_v6  ;;  %v7437_v4 = vld [vmem:[%s9046_s29 + $0x9] ss:$0 sm:$0xff] }
0x1d14   : > { %v8466_v10 = vpack.c.bf16 %v8462_v8, %v8462_v8 }
0x1d16   : > { %6955 = vmatmul.mubr.msk.bf16.vlgmr.msra.gmra.mxu0 %vm811_vm1, %v8466_v10  ;;  %6971 = vmatmul.mubr.msk.bf16.vlgmr.msra.gmra.mxu1 %vm811_vm1, %v8466_v10 }
0x1d17   : > { %6959 = vmatpush3.bf16.msra.mxu0 %v7428_v12  ;;  %6962 = vmatprep.mubr.msk.bf16.mxu0 %vm7551_vm0, %v7550_v1 }
0x1d18   : > { %6960 = vmatprep.subr.bf16.mxu0 %v7550_v1  ;;  %6982 = vmatprep.mubr.msk.bf16.mxu1 %vm7551_vm0, %v7550_v1 }
0x1d1b   : > { %6961 = vmatpush3.bf16.msra.mxu0 %v7429_v52 }
0x1d1c   : > { %6974 = vmatprep.subr.bf16.mxu0 %v7550_v1 }
0x1d1e   : > { %6963 = vmatmul.mubr.msk.bf16.vlgmr.msra.gmra.mxu0 %vm811_vm1, %v8466_v10 }
0x1d1f   : > { %6976 = vmatprep.mubr.msk.bf16.mxu0 %vm7551_vm0, %v7550_v1 }
0x1dd6   : > { %v3928_v3 = vpop.f32.mrf.mxu0  ;;  %v4008_v13 = vpop.f32.mrf.mxu1 }
0x1dd7   : > { %v4009_v17 = vadd.f32 %v7430_v14, %v4008_v13  ;;  %v3929_v43 = vadd.f32 %v7432_v38, %v3928_v3  ;;  %v7440_v38 = vld [vmem:[%s9046_s29 + $0x5] ss:$0 sm:$0xff] }
0x1dd8   : > { %v6956_v18 = vpop.f32.mrf.mxu0  ;;  %v6972_v19 = vpop.f32.mrf.mxu1 }
0x1dd9   : > { %v4074_v20 = vpack.c.bf16 %v4009_v17, %v4009_v17  ;;  %v4014_v49 = vmul.f32 0.17677669, %v3929_v43 }
0x1dda   : > { %v3931_v26 = vpop.f32.mrf.mxu0  ;;  %v4011_v27 = vpop.f32.mrf.mxu1 }
0x1ddb   : > { %v4079_v28 = vsel %vm1051_vm4, %v4074_v20, 0  ;;  %v4015_v50 = vpack.c.bf16 %v4014_v49, %v4014_v49 }
0x1ddc   : > { %v6957_v29 = vpop.f32.mrf.mxu0  ;;  %v6973_v16 = vpop.f32.mrf.mxu1  ;;  %6981 = vmatpush3.bf16.msra.mxu1 %v4079_v28  ;;  %v7438_v28 = vld [vmem:[%s9043_s1 + $0x58] sm:$0xff]  }
0x1ddd   : > { %6994 = vmatprep.subr.bf16.mxu1 %v7550_v1  ;;  %v7439_v29 = vld [vmem:[%s9043_s1 + $0x50] sm:$0xff]  }
0x1dde   : > { %v3968_v30 = vpop.f32.mrf.mxu0 }
0x1ddf   : > { %v3969_v33 = vadd.f32 %v7431_v32, %v3968_v30 }
0x1de0   : > { %v6964_v37 = vpop.f32.mrf.mxu0 }
0x1de1   : > { %v4016_v44 = vpack.c.bf16 %v3969_v33, %v3969_v33 }
0x1de2   : > { %v3971_v45 = vpop.f32.mrf.mxu0 }
0x1de3   : > { %v4021_v46 = vsel %vm988_vm2, %v4016_v44, 0  ;;  %v7441_v45 = vld [vmem:[%s9046_s29 + $0x1] ss:$0 sm:$0xff] }
0x1de4   : > { %v6965_v47 = vpop.f32.mrf.mxu0  ;;  %6975 = vmatpush3.bf16.xpose.msra.mxu0 %v4021_v46 }
0x1de5   : > { %6986 = vmatprep.subr.bf16.mxu0 %v7550_v1 }
0x1deb   : > { %6977 = vmatmul.mubr.msk.bf16.vlgmr.msra.gmra.mxu0 %vm988_vm2, %v4015_v50 }
0x1dec   : > { %6987 = vmatpush3.bf16.msra.mxu0 %v7433_v54  ;;  %6990 = vmatprep.mubr.msk.bf16.mxu0 %vm7551_vm0, %v7550_v1 }
0x1ded   : > { %6988 = vmatprep.subr.bf16.mxu0 %v7550_v1 }
0x1df0   : > { %6989 = vmatpush3.bf16.msra.mxu0 %v7434_v55 }
0x1df1   : > { %7002 = vmatprep.subr.bf16.mxu0 %v7550_v1 }
0x1df3   : > { %6991 = vmatmul.mubr.msk.bf16.vlgmr.msra.gmra.mxu0 %vm811_vm1, %v8466_v10 }
0x1df4   : > { %7003 = vmatpush3.bf16.msra.mxu0 %v7435_v56  ;;  %7006 = vmatprep.mubr.msk.bf16.mxu0 %vm7551_vm0, %v7550_v1 }
0x1df5   : > { %7004 = vmatprep.subr.bf16.mxu0 %v7550_v1 }
0x1df8   : > { %7005 = vmatpush3.bf16.msra.mxu0 %v7436_v57 }
0x1df9   : > { %7016 = vmatprep.subr.bf16.mxu0 %v7550_v1 }
0x1dfb   : > { %7007 = vmatmul.mubr.msk.bf16.vlgmr.msra.gmra.mxu0 %vm811_vm1, %v8466_v10 }
0x1dfc   : > { %7018 = vmatprep.mubr.msk.bf16.mxu0 %vm7551_vm0, %v7550_v1 }
0x1eab   : > { %v4057_v7 = vpop.f32.mrf.mxu0 }
0x1eac   : > { %v4063_v58 = vsel %vm1035_vm3, -1e+20, %v4057_v7 }
0x1ead   : > { %v6978_v59 = vpop.f32.mrf.mxu0  ;;  %v4064_v60 = vsel %vm988_vm2, %v4063_v58, -inf }
0x1eae   : > { %4065 = vmax.xlane.f32.xlu0 %v4064_v60 }
0x1eaf   : > { %v4060_v61 = vpop.f32.mrf.mxu0 }
0x1eb1   : > { %v6979_v62 = vpop.f32.mrf.mxu0 }
0x1eb3   : > { %v4158_v21 = vpop.f32.mrf.mxu0 }
0x1eb4   : > { %v4159_v46 = vadd.f32 %v7441_v45, %v4158_v21  ;;  %v7448_v45 = vld [vmem:[%s9043_s1 + $0xa0] sm:$0xff]  }
0x1eb5   : > { %v6992_v2 = vpop.f32.mrf.mxu0 }
0x1eb6   : > { %v4244_v55 = vmul.f32 0.17677669, %v4159_v46 }
0x1eb7   : > { %v4161_v63 = vpop.f32.mrf.mxu0 }
0x1eb8   : > { %v4245_v56 = vpack.c.bf16 %v4244_v55, %v4244_v55 }
0x1eb9   : > { %v6993_v51 = vpop.f32.mrf.mxu0 }
0x1ebb   : > { %v4238_v15 = vpop.f32.mrf.mxu0 }
0x1ebc   : > { %v4239_v6 = vadd.f32 %v7437_v4, %v4238_v15 }
0x1ebd   : > { %v7008_v12 = vpop.f32.mrf.mxu0 }
0x1ebe   : > { %v4304_v52 = vpack.c.bf16 %v4239_v6, %v4239_v6 }
0x1ebf   : > { %v4241_v3 = vpop.f32.mrf.mxu0 }
0x1ec0   : > { %v4309_v13 = vsel %vm1051_vm4, %v4304_v52, 0  ;;  %v7442_v52 = vld [vmem:[%s9043_s1 + $0x68] sm:$0xff]  }
0x1ec1   : > { %v7009_v14 = vpop.f32.mrf.mxu0  ;;  %7017 = vmatpush3.bf16.msra.mxu0 %v4309_v13 }
0x1ec2   : > { %7028 = vmatprep.subr.bf16.mxu0 %v7550_v1 }
0x1f37   : > { %v4066_v17 = vpop.xlane.xlu0 %4065 }
0x1f38   : > { %v4067_v18 = vsub.f32 %v4063_v58, %v4066_v17 }
0x1f3a   : > { %v4068_v19 = vmul.f32 1.442695, %v4067_v18 }
0x1f3c   : > { %7386 = vpow2.f32 %v4068_v19 }
0x1f49   : > { %v7387_v20 = vpop.eup %7386 }
0x1f4a   : > { %v4070_v26 = vsel %vm988_vm2, %v7387_v20, 0.0  ;;  %v4073_v27 = vpack.c.bf16 %v7387_v20, %v7387_v20 }
0x1f4b   : > { %4071 = vadd.xlane.f32.xlu0 %v4070_v26 }
0x1f4c   : > { %6983 = vmatmul.mubr.msk.bf16.vlgmr.msra.gmra.mxu1 %vm988_vm2, %v4073_v27  ;;  %v7444_v27 = vld [vmem:[%s9043_s1 + $0x28] sm:$0xff]  }
0x1f4d   : > { %6995 = vmatpush3.bf16.msra.mxu1 %v7438_v28  ;;  %6998 = vmatprep.mubr.msk.bf16.mxu1 %vm7551_vm0, %v7550_v1 }
0x1f4e   : > { %6996 = vmatprep.subr.bf16.mxu1 %v7550_v1 }
0x1f51   : > { %6997 = vmatpush3.bf16.msra.mxu1 %v7439_v29 }
0x1f52   : > { %7010 = vmatprep.subr.bf16.mxu1 %v7550_v1 }
0x1f54   : > { %6999 = vmatmul.mubr.msk.bf16.vlgmr.msra.gmra.mxu1 %vm811_vm1, %v8466_v10 }
0x1f55   : > { %7012 = vmatprep.mubr.msk.bf16.mxu1 %vm7551_vm0, %v7550_v1 }
0x200c   : > { %v4115_v16 = vpop.f32.mrf.mxu1 }
0x200e   : > { %v6984_v30 = vpop.f32.mrf.mxu1 }
0x2010   : > { %v4118_v32 = vpop.f32.mrf.mxu1 }
0x2012   : > { %v6985_v33 = vpop.f32.mrf.mxu1 }
0x2013   : > { %v7446_v33 = vld [vmem:[%s9043_s1 + $0xa8] sm:$0xff]  }
0x2014   : > { %v4198_v37 = vpop.f32.mrf.mxu1 }
0x2015   : > { %v4199_v43 = vadd.f32 %v7440_v38, %v4198_v37  ;;  %v7447_v38 = vld [vmem:[%s9046_s29 + $0x6] ss:$0 sm:$0xff] }
0x2016   : > { %v7000_v44 = vpop.f32.mrf.mxu1 }
0x2017   : > { %v4246_v47 = vpack.c.bf16 %v4199_v43, %v4199_v43 }
0x2018   : > { %v4201_v49 = vpop.f32.mrf.mxu1 }
0x2019   : > { %v4251_v50 = vsel %vm988_vm2, %v4246_v47, 0 }
0x201a   : > { %v7001_v54 = vpop.f32.mrf.mxu1  ;;  %7011 = vmatpush3.bf16.xpose.msra.mxu1 %v4251_v50 }
0x201b   : > { %7022 = vmatprep.subr.bf16.mxu1 %v7550_v1 }
0x2021   : > { %7013 = vmatmul.mubr.msk.bf16.vlgmr.msra.gmra.mxu1 %vm988_vm2, %v4245_v56 }
0x2022   : > { %7023 = vmatpush3.bf16.msra.mxu1 %v7893_v40  ;;  %7024 = vmatprep.mubr.msk.bf16.mxu1 %vm7551_vm0, %v7550_v1  ;;  %v4072_v40 = vpop.xlane.xlu0 %4071 }
0x2023   : > { %7034 = vmatprep.subr.bf16.mxu1 %v7550_v1 }
0x20e1   : > { %v4287_v57 = vpop.f32.mrf.mxu1 }
0x20e2   : > { %v4293_v7 = vsel %vm1035_vm3, -1e+20, %v4287_v57 }
0x20e3   : > { %v7014_v58 = vpop.f32.mrf.mxu1  ;;  %v4294_v59 = vsel %vm988_vm2, %v4293_v7, -inf }
0x20e4   : > { %4295 = vmax.xlane.f32.xlu1 %v4294_v59  ;;  %v7449_v58 = vld [vmem:[%s9046_s29 + $0x2] ss:$0 sm:$0xff] }
0x20e5   : > { %v4290_v60 = vpop.f32.mrf.mxu1 }
0x20e7   : > { %v7015_v61 = vpop.f32.mrf.mxu1 }
0x216d   : > { %v4296_v62 = vpop.xlane.xlu1 %4295 }
0x216e   : > { %v4297_v21 = vsub.f32 %v4293_v7, %v4296_v62 }
0x2170   : > { %v4298_v2 = vmul.f32 1.442695, %v4297_v21 }
0x2172   : > { %7388 = vpow2.f32 %v4298_v2 }
0x2173   : > { %7390 = vrcp.f32 %v4072_v40 }
0x217f   : > { %v7389_v63 = vpop.eup %7388 }
0x2180   : > { %v4303_v51 = vpack.c.bf16 %v7389_v63, %v7389_v63  ;;  %v4300_v15 = vsel %vm988_vm2, %v7389_v63, 0.0  ;;  %v7391_v4 = vpop.eup %7390  ;;  %v7450_v63 = vld [vmem:[%s9046_s29 + $0xa] ss:$0 sm:$0xff] }
0x2181   : > { %4301 = vadd.xlane.f32.xlu1 %v4300_v15  ;;  %v4122_v6 = vmul.f32 %v7391_v4, %v4115_v16  ;;  %v7445_v16 = vld [vmem:[%s9043_s1 + $0x20] sm:$0xff]  }
0x2182   : > { %7019 = vmatmul.mubr.msk.bf16.vlgmr.msra.gmra.mxu0 %vm988_vm2, %v4303_v51 }
0x2183   : > { %7029 = vmatpush3.bf16.msra.mxu0 %v7876_v34  ;;  %7030 = vmatprep.mubr.msk.bf16.mxu0 %vm7551_vm0, %v7550_v1  ;;  %v4123_v12 = vpack.c.bf16 %v4122_v6, %v4122_v6  ;;  %v7443_v34 = vld [vmem:[%s9043_s1 + $0x60] sm:$0xff]  }
0x2184   : > { %7042 = vmatprep.subr.bf16.mxu0 %v7550_v1 }
0x218a   : > { %7031 = vmatmul.mubr.msk.bf16.vlgmr.msra.gmra.mxu0 %vm988_vm2, %v4123_v12 }
0x218b   : > { %7043 = vmatpush3.bf16.msra.mxu0 %v7442_v52  ;;  %7046 = vmatprep.mubr.msk.bf16.mxu0 %vm7551_vm0, %v7550_v1 }
0x218c   : > { %7044 = vmatprep.subr.bf16.mxu0 %v7550_v1 }
0x218f   : > { %7045 = vmatpush3.bf16.msra.mxu0 %v7443_v34 }
0x2190   : > { %7058 = vmatprep.subr.bf16.mxu0 %v7550_v1 }
0x2192   : > { %7047 = vmatmul.mubr.msk.bf16.vlgmr.msra.gmra.mxu0 %vm811_vm1, %v8466_v10 }
0x2193   : > { %7060 = vmatprep.mubr.msk.bf16.mxu0 %vm7551_vm0, %v7550_v1 }
0x220a   : > { %v4302_v3 = vpop.xlane.xlu1 %4301 }
0x220b   : > { %7392 = vrcp.f32 %v4302_v3 }
0x2218   : > { %v7393_v13 = vpop.eup %7392 }
0x2242   : > { %v4345_v14 = vpop.f32.mrf.mxu0 }
0x2243   : > { %v4352_v17 = vmul.f32 %v7393_v13, %v4345_v14 }
0x2244   : > { %v7020_v18 = vpop.f32.mrf.mxu0 }
0x2245   : > { %v4353_v19 = vpack.c.bf16 %v4352_v17, %v4352_v17 }
0x2246   : > { %v4348_v20 = vpop.f32.mrf.mxu0 }
0x2247   : > { %7025 = vmatmul.mubr.msk.bf16.vlgmr.msra.gmra.mxu1 %vm988_vm2, %v4353_v19 }
0x2248   : > { %v7021_v26 = vpop.f32.mrf.mxu0  ;;  %7035 = vmatpush3.bf16.msra.mxu1 %v7444_v27  ;;  %7038 = vmatprep.mubr.msk.bf16.mxu1 %vm7551_vm0, %v7550_v1 }
0x2249   : > { %7036 = vmatprep.subr.bf16.mxu1 %v7550_v1 }
0x224a   : > { %v8596_v28 = vpop.f32.mrf.mxu0 }
0x224c   : > { %v7032_v29 = vpop.f32.mrf.mxu0  ;;  %7037 = vmatpush3.bf16.msra.mxu1 %v7445_v16  ;;  %v7451_v16 = vld [vmem:[%s9043_s1 + $0x38] sm:$0xff]  }
0x224d   : > { %7050 = vmatprep.subr.bf16.mxu1 %v7550_v1 }
0x224e   : > { %v4437_v30 = vpop.f32.mrf.mxu0 }
0x224f   : > { %7039 = vmatmul.mubr.msk.bf16.vlgmr.msra.gmra.mxu1 %vm811_vm1, %v8466_v10  ;;  %v7452_v30 = vld [vmem:[%s9043_s1 + $0x30] sm:$0xff]  }
0x2250   : > { %v7033_v32 = vpop.f32.mrf.mxu0  ;;  %7051 = vmatpush3.bf16.msra.mxu1 %v7446_v33  ;;  %7054 = vmatprep.mubr.msk.bf16.mxu1 %vm7551_vm0, %v7550_v1  ;;  %v7454_v33 = vld [vmem:[%s9043_s1 + $0xb0] sm:$0xff]  }
0x2251   : > { %7052 = vmatprep.subr.bf16.mxu1 %v7550_v1  ;;  %v7453_v32 = vld [vmem:[%s9043_s1 + $0xb8] sm:$0xff]  }
0x2252   : > { %v4514_v37 = vpop.f32.mrf.mxu0 }
0x2253   : > { %v4515_v43 = vadd.f32 %v7447_v38, %v4514_v37 }
0x2254   : > { %v7048_v44 = vpop.f32.mrf.mxu0  ;;  %7053 = vmatpush3.bf16.msra.mxu1 %v7448_v45 }
0x2255   : > { %v4562_v46 = vpack.c.bf16 %v4515_v43, %v4515_v43  ;;  %7064 = vmatprep.subr.bf16.mxu1 %v7550_v1 }
0x2256   : > { %v4517_v47 = vpop.f32.mrf.mxu0 }
0x2257   : > { %v4567_v49 = vsel %vm988_vm2, %v4562_v46, 0  ;;  %7055 = vmatmul.mubr.msk.bf16.vlgmr.msra.gmra.mxu1 %vm811_vm1, %v8466_v10 }
0x2258   : > { %v7049_v50 = vpop.f32.mrf.mxu0  ;;  %7059 = vmatpush3.bf16.xpose.msra.mxu0 %v4567_v49  ;;  %7066 = vmatprep.mubr.msk.bf16.mxu1 %vm7551_vm0, %v7550_v1 }
0x2259   : > { %7070 = vmatprep.subr.bf16.mxu0 %v7550_v1  ;;  %v7455_v50 = vld [vmem:[%s9043_s1 + $0x78] sm:$0xff]  }
0x2307   : > { %v8623_v54 = vpop.f32.mrf.mxu1 }
0x2309   : > { %v7026_v55 = vpop.f32.mrf.mxu1 }
0x230b   : > { %v4394_v56 = vpop.f32.mrf.mxu1 }
0x230d   : > { %v7027_v57 = vpop.f32.mrf.mxu1 }
0x230e   : > { %v7456_v57 = vld [vmem:[%s9043_s1 + $0x70] sm:$0xff]   ;;  %s765_s1 = scalar_lea.vmem [#allocation2], %s6051_s0  ;;  %s7492_s0 = sshll.u32 %s7553_s6, 4  ;;  %s7493_s0 = int_to_ptr.vmem [resolvable:$false] %s7492_s0 }
0x230f   : > { %v4474_v7 = vpop.f32.mrf.mxu1  ;;  %s5955_s27 = sshll.u32 %s765_s1, 4  ;;  %s8945_s27 = int_to_ptr.vmem [resolvable:$true] %s5955_s27 }
0x2310   : > { %v4475_v59 = vadd.f32 %v7449_v58, %v4474_v7  ;;  %s7488_s24 = scalar_lea.vmem %s8945_s27, 128  ;;  %p7495_p0 = scmp.lt.s32.totalorder %s8945_s27, %s7493_s0 }
0x2311   : > { %v7040_v60 = vpop.f32.mrf.mxu1  ;;  %p7489_p11 = scmp.ne.s32.totalorder %s8945_s27, %s7488_s24 }
0x2312   : > { %v4560_v61 = vmul.f32 0.17677669, %v4475_v59  ;;  %v7457_v60 = vld [vmem:[%s9046_s29 + $0xb] ss:$0 sm:$0xff] }
0x2313   : > { %v4477_v62 = vpop.f32.mrf.mxu1  ;;  %p7490_p12 = pnand %p7489_p11, %p7717_p5 }
0x2314   : > { %v4561_v21 = vpack.c.bf16 %v4560_v61, %v4560_v61 }
0x2315   : > { %v7041_v2 = vpop.f32.mrf.mxu1  ;;  %p7491_p13 = pneg %p7490_p12 }
0x2316   : > { %7061 = vmatmul.mubr.msk.bf16.vlgmr.msra.gmra.mxu0 %vm988_vm2, %v4561_v21 }
0x2317   : > { %v4554_v40 = vpop.f32.mrf.mxu1  ;;  %7071 = vmatpush3.bf16.msra.mxu0 %v7964_v41  ;;  %7072 = vmatprep.mubr.msk.bf16.mxu0 %vm7551_vm0, %v7550_v1 }
0x2318   : > { %v4555_v51 = vadd.f32 %v7450_v63, %v4554_v40  ;;  %7084 = vmatprep.subr.bf16.mxu0 %v7550_v1 }
0x2319   : > { %v7056_v15 = vpop.f32.mrf.mxu1 }
0x231a   : > { %v4620_v4 = vpack.c.bf16 %v4555_v51, %v4555_v51 }
0x231b   : > { %v4557_v6 = vpop.f32.mrf.mxu1 }
0x231c   : > { %v4625_v12 = vsel %vm1051_vm4, %v4620_v4, 0 }
0x231d   : > { %v7057_v52 = vpop.f32.mrf.mxu1  ;;  %7065 = vmatpush3.bf16.msra.mxu1 %v4625_v12 }
0x231e   : > { %7076 = vmatprep.subr.bf16.mxu1 %v7550_v1 }
0x23d6   : > { %v4603_v41 = vpop.f32.mrf.mxu0 }
0x23d7   : > { %v4609_v34 = vsel %vm1035_vm3, -1e+20, %v4603_v41  ;;  %v7458_v41 = vld [vmem:[%s9046_s29 + $0x7] ss:$0 sm:$0xff] }
0x23d8   : > { %v7062_v3 = vpop.f32.mrf.mxu0  ;;  %v4610_v13 = vsel %vm988_vm2, %v4609_v34, -inf }
0x23d9   : > { %4611 = vmax.xlane.f32.xlu0 %v4610_v13  ;;  %v7459_v13 = vld [vmem:[%s9046_s29 + $0x3] ss:$0 sm:$0xff] }
0x23da   : > { %v4606_v14 = vpop.f32.mrf.mxu0 }
0x23dc   : > { %v7063_v17 = vpop.f32.mrf.mxu0 }
0x2462   : > { %v4612_v18 = vpop.xlane.xlu0 %4611 }
0x2463   : > { %v4613_v19 = vsub.f32 %v4609_v34, %v4612_v18 }
0x2465   : > { %v4614_v20 = vmul.f32 1.442695, %v4613_v19 }
0x2467   : > { %7394 = vpow2.f32 %v4614_v20 }
0x2474   : > { %v7395_v26 = vpop.eup %7394 }
0x2475   : > { %v4619_v27 = vpack.c.bf16 %v7395_v26, %v7395_v26  ;;  %v4616_v29 = vsel %vm988_vm2, %v7395_v26, 0.0 }
0x2476   : > { %4617 = vadd.xlane.f32.xlu1 %v4616_v29 }
0x2477   : > { %7067 = vmatmul.mubr.msk.bf16.vlgmr.msra.gmra.mxu1 %vm988_vm2, %v4619_v27 }
0x2478   : > { %7077 = vmatpush3.bf16.msra.mxu1 %v7451_v16  ;;  %7080 = vmatprep.mubr.msk.bf16.mxu1 %vm7551_vm0, %v7550_v1 }
0x2479   : > { %7078 = vmatprep.subr.bf16.mxu1 %v7550_v1 }
0x247c   : > { %7079 = vmatpush3.bf16.msra.mxu1 %v7452_v30 }
0x247d   : > { %7092 = vmatprep.subr.bf16.mxu1 %v7550_v1 }
0x247f   : > { %7081 = vmatmul.mubr.msk.bf16.vlgmr.msra.gmra.mxu1 %vm811_vm1, %v8466_v10 }
0x2480   : > { %7093 = vmatpush3.bf16.msra.mxu1 %v7453_v32  ;;  %7096 = vmatprep.mubr.msk.bf16.mxu1 %vm7551_vm0, %v7550_v1 }
0x2481   : > { %7094 = vmatprep.subr.bf16.mxu1 %v7550_v1 }
0x2484   : > { %7095 = vmatpush3.bf16.msra.mxu1 %v7454_v33 }
0x2485   : > { %7106 = vmatprep.subr.bf16.mxu1 %v7550_v1 }
0x2487   : > { %7097 = vmatmul.mubr.msk.bf16.vlgmr.msra.gmra.mxu1 %vm811_vm1, %v8466_v10 }
0x2488   : > { %7108 = vmatprep.mubr.msk.bf16.mxu1 %vm7551_vm0, %v7550_v1 }
0x24ff   : > { %v4618_v37 = vpop.xlane.xlu1 %4617 }
0x2500   : > { %7396 = vrcp.f32 %v4618_v37 }
0x250d   : > { %v7397_v38 = vpop.eup %7396 }
0x2537   : > { %v4661_v43 = vpop.f32.mrf.mxu1 }
0x2538   : > { %v4668_v44 = vmul.f32 %v7397_v38, %v4661_v43 }
0x2539   : > { %v7068_v45 = vpop.f32.mrf.mxu1 }
0x253a   : > { %v4669_v46 = vpack.c.bf16 %v4668_v44, %v4668_v44  ;;  %v7461_v45 = vld [vmem:[%s9050_s10] sm:$0xff]  }
0x253b   : > { %v4664_v47 = vpop.f32.mrf.mxu1 }
0x253c   : > { %7073 = vmatmul.mubr.msk.bf16.vlgmr.msra.gmra.mxu0 %vm988_vm2, %v4669_v46 }
0x253d   : > { %v7069_v49 = vpop.f32.mrf.mxu1  ;;  %7085 = vmatpush3.bf16.msra.mxu0 %v7455_v50  ;;  %7088 = vmatprep.mubr.msk.bf16.mxu0 %vm7551_vm0, %v7550_v1 }
0x253e   : > { %7086 = vmatprep.subr.bf16.mxu0 %v7550_v1 }
0x253f   : > { %v4748_v55 = vpop.f32.mrf.mxu1 }
0x2540   : > { %v4749_v14 = vadd.f32 %v7459_v13, %v4748_v55  ;;  %v7464_v13 = vld [vmem:[%s9053_s9] ss:$0 sm:$0xff]  ;;  %s7494_s9 = scalar_lea.vmem %s7493_s0, 256 }
0x2541   : > { %v7082_v56 = vpop.f32.mrf.mxu1  ;;  %7087 = vmatpush3.bf16.msra.mxu0 %v7456_v57  ;;  %p7496_p1 = scmp.lt.s32.totalorder %s7494_s9, %s7488_s24 }
0x2542   : > { %7100 = vmatprep.subr.bf16.mxu0 %v7550_v1  ;;  %v4834_v19 = vmul.f32 0.17677669, %v4749_v14 }
0x2543   : > { %v4751_v7 = vpop.f32.mrf.mxu1  ;;  %p7497_p2 = por %p7496_p1, %p7495_p0 }
0x2544   : > { %7089 = vmatmul.mubr.msk.bf16.vlgmr.msra.gmra.mxu0 %vm811_vm1, %v8466_v10  ;;  %v4435_v10 = vadd.f32 %v8596_v28, %v8623_v54  ;;  %v4835_v20 = vpack.c.bf16 %v4834_v19, %v4834_v19 }
0x2545   : > { %v7083_v58 = vpop.f32.mrf.mxu1  ;;  %7102 = vmatprep.mubr.msk.bf16.mxu0 %vm7551_vm0, %v7550_v1  ;;  %p7498_p3 = pnand %p7497_p2, %p7491_p13 }
0x2547   : > { %v4828_v59 = vpop.f32.mrf.mxu1 }
0x2548   : > { %v4829_v61 = vadd.f32 %v7457_v60, %v4828_v59 }
0x2549   : > { %v7098_v62 = vpop.f32.mrf.mxu1 }
0x254a   : > { %v4894_v21 = vpack.c.bf16 %v4829_v61, %v4829_v61  ;;  %v7462_v61 = vld [vmem:[%s9049_s25] ss:$0 sm:$0xff] }
0x254b   : > { %v4831_v2 = vpop.f32.mrf.mxu1 }
0x254c   : > { %v4899_v40 = vsel %vm1051_vm4, %v4894_v21, 0 }
0x254d   : > { %v7099_v63 = vpop.f32.mrf.mxu1  ;;  %7107 = vmatpush3.bf16.msra.mxu1 %v4899_v40 }
0x254e   : > { %7118 = vmatprep.subr.bf16.mxu1 %v7550_v1 }
0x25fc   : > { %v4707_v51 = vpop.f32.mrf.mxu0 }
0x25fd   : > { %v4713_v15 = vadd.f32 %v4707_v51, %v4435_v10 }
0x25fe   : > { %v7074_v4 = vpop.f32.mrf.mxu0 }
0x2600   : > { %v4710_v6 = vpop.f32.mrf.mxu0 }
0x2602   : > { %v7075_v12 = vpop.f32.mrf.mxu0 }
0x2604   : > { %v4788_v52 = vpop.f32.mrf.mxu0 }
0x2605   : > { %v4789_v34 = vadd.f32 %v7458_v41, %v4788_v52 }
0x2606   : > { %v7090_v3 = vpop.f32.mrf.mxu0 }
0x2607   : > { %v4836_v17 = vpack.c.bf16 %v4789_v34, %v4789_v34 }
0x2608   : > { %v4791_v18 = vpop.f32.mrf.mxu0 }
0x2609   : > { %v4841_v28 = vsel %vm988_vm2, %v4836_v17, 0 }
0x260a   : > { %v7091_v54 = vpop.f32.mrf.mxu0  ;;  %7101 = vmatpush3.bf16.xpose.msra.mxu0 %v4841_v28  ;;  %v7465_v28 = vld [vmem:[%s8995_s11] ss:$0 sm:$0xff] }
0x260b   : > { %7112 = vmatprep.subr.bf16.mxu0 %v7550_v1 }
0x2611   : > { %7103 = vmatmul.mubr.msk.bf16.vlgmr.msra.gmra.mxu0 %vm988_vm2, %v4835_v20 }
0x2612   : > { %7113 = vmatpush3.bf16.msra.mxu0 %v8038_v39  ;;  %7114 = vmatprep.mubr.msk.bf16.mxu0 %vm7551_vm0, %v7550_v1 }
0x2613   : > { %7126 = vmatprep.subr.bf16.mxu0 %v7550_v1 }
0x26d1   : > { %v4877_v26 = vpop.f32.mrf.mxu0 }
0x26d2   : > { %v4883_v27 = vsel %vm1035_vm3, -1e+20, %v4877_v26 }
0x26d3   : > { %v7104_v29 = vpop.f32.mrf.mxu0  ;;  %v4884_v16 = vsel %vm988_vm2, %v4883_v27, -inf }
0x26d4   : > { %4885 = vmax.xlane.f32.xlu0 %v4884_v16  ;;  %v7467_v16 = vld [vmem:[%s9050_s10 + $0x10] sm:$0xff]  }
0x26d5   : > { %v4880_v30 = vpop.f32.mrf.mxu0 }
0x26d7   : > { %v7105_v32 = vpop.f32.mrf.mxu0 }
0x275d   : > { %v4886_v33 = vpop.xlane.xlu0 %4885 }
0x275e   : > { %v4887_v37 = vsub.f32 %v4883_v27, %v4886_v33 }
0x2760   : > { %v4888_v38 = vmul.f32 1.442695, %v4887_v37 }
0x2762   : > { %7398 = vpow2.f32 %v4888_v38 }
0x276f   : > { %v7399_v39 = vpop.eup %7398 }
0x2770   : > { %v4893_v43 = vpack.c.bf16 %v7399_v39, %v7399_v39  ;;  %v4890_v44 = vsel %vm988_vm2, %v7399_v39, 0.0 }
0x2771   : > { %4891 = vadd.xlane.f32.xlu1 %v4890_v44 }
0x2772   : > { %7109 = vmatmul.mubr.msk.bf16.vlgmr.msra.gmra.mxu1 %vm988_vm2, %v4893_v43 }
0x2773   : > { %7119 = vmatpush3.bf16.msra.mxu1 %v7460_v25  ;;  %7122 = vmatprep.mubr.msk.bf16.mxu1 %vm7551_vm0, %v7550_v1 }
0x2774   : > { %7120 = vmatprep.subr.bf16.mxu1 %v7550_v1 }
0x2777   : > { %7121 = vmatpush3.bf16.msra.mxu1 %v7461_v45 }
0x2778   : > { %7132 = vmatprep.subr.bf16.mxu1 %v7550_v1 }
0x27fa   : > { %v4892_v46 = vpop.xlane.xlu1 %4891 }
0x27fb   : > { %7400 = vrcp.f32 %v4892_v46 }
0x2808   : > { %v7401_v47 = vpop.eup %7400 }
0x2832   : > { %v4935_v49 = vpop.f32.mrf.mxu1 }
0x2833   : > { %v4942_v50 = vmul.f32 %v7401_v47, %v4935_v49 }
0x2834   : > { %v7110_v55 = vpop.f32.mrf.mxu1 }
0x2835   : > { %v4943_v56 = vpack.c.bf16 %v4942_v50, %v4942_v50  ;;  %v7468_v50 = vld [vmem:[%s8995_s11 + $0x1] ss:$0 sm:$0xff] }
0x2836   : > { %v4938_v57 = vpop.f32.mrf.mxu1 }
0x2837   : > { %7115 = vmatmul.mubr.msk.bf16.vlgmr.msra.gmra.mxu0 %vm988_vm2, %v4943_v56 }
0x2838   : > { %7127 = vmatpush3.bf16.xpose.msra.mxu0 %v8098_v23  ;;  %v7111_v7 = vpop.f32.mrf.mxu1  ;;  %7128 = vmatprep.mubr.msk.bf16.mxu0 %vm7551_vm0, %v7550_v1 }
0x2839   : > { %7138 = vmatprep.subr.bf16.mxu0 %v7550_v1 }
0x28f7   : > { %v4981_v58 = vpop.f32.mrf.mxu0 }
0x28f8   : > { %v4987_v59 = vadd.f32 %v4981_v58, %v4713_v15 }
0x28f9   : > { %v7116_v60 = vpop.f32.mrf.mxu0 }
0x28fa   : > { %v4988_v62 = vadd.f32 %v7462_v61, %v4987_v59 }
0x28fb   : > { %v4984_v21 = vpop.f32.mrf.mxu0 }
0x28fc   : > { %v4989_v2 = vadd.f32 %v4988_v62, %v8462_v8  ;;  %v7463_v8 = vld [vmem:[%s9052_s30] ss:$0 sm:$0xff] }
0x28fd   : > { %v7117_v40 = vpop.f32.mrf.mxu0 }
0x28fe   : > { %v4990_v23 = vsel %vm811_vm1, %v4989_v2, 0.0 }
0x28ff   : > { %4991 = vadd.xlane.f32.xlu0 %v4990_v23 }
0x2988   : > { %v4992_v63 = vpop.xlane.xlu0 %4991 }
0x2989   : > { %v4993_v10 = vmul.f32 0.03125, %v4992_v63 }
0x298b   : > { %v4994_v51 = vsub.f32 %v4989_v2, %v4993_v10 }
0x298d   : > { %v4995_v4 = vmul.f32 %v4994_v51, %v4994_v51 }
0x298f   : > { %v4996_v6 = vsel %vm811_vm1, %v4995_v4, 0.0 }
0x2990   : > { %4997 = vadd.xlane.f32.xlu1 %v4996_v6 }
0x2a19   : > { %v4998_v15 = vpop.xlane.xlu1 %4997 }
0x2a1a   : > { %v4999_v12 = vmul.f32 0.03125, %v4998_v15 }
0x2a1c   : > { %v5000_v52 = vadd.f32 1e-05, %v4999_v12 }
0x2a1e   : > { %7402 = vrsqrt.f32 %v5000_v52 }
0x2a2b   : > { %v7403_v41 = vpop.eup %7402 }
0x2a2c   : > { %v5002_v34 = vmul.f32 %v7403_v41, %v4994_v51 }
0x2a2e   : > { %v5003_v3 = vmul.f32 %v7463_v8, %v5002_v34 }
0x2a30   : > { %v8736_v14 = vadd.f32 %v7464_v13, %v5003_v3 }
0x2a32   : > { %v8740_v17 = vpack.c.bf16 %v8736_v14, %v8736_v14 }
0x2a34   : > { %7123 = vmatmul.mubr.msk.bf16.vlgmr.msra.gmra.mxu1 %vm811_vm1, %v8740_v17 }
0x2a35   : > { %7133 = vmatpush3.bf16.msra.mxu1 %v8146_v5  ;;  %7134 = vmatprep.mubr.msk.bf16.mxu1 %vm7551_vm0, %v7550_v1  ;;  %v7466_v5 = vld [vmem:[%s9050_s10 + $0x18] sm:$0xff]  }
0x2a36   : > { %7146 = vmatprep.subr.bf16.mxu1 %v7550_v1 }
0x2af4   : > { %v5043_v18 = vpop.f32.mrf.mxu1 }
0x2af5   : > { %v5044_v54 = vadd.f32 %v7465_v28, %v5043_v18 }
0x2af6   : > { %v7124_v19 = vpop.f32.mrf.mxu1 }
0x2af7   : > { %v5049_v20 = vmul.f32 0.17677669, %v5044_v54  ;;  %v7469_v19 = vld [vmem:[%s9050_s10 + $0x28] sm:$0xff]  }
0x2af8   : > { %v5046_v26 = vpop.f32.mrf.mxu1 }
0x2af9   : > { %v5050_v27 = vpack.c.bf16 %v5049_v20, %v5049_v20  ;;  %v7470_v26 = vld [vmem:[%s9050_s10 + $0x20] sm:$0xff]  }
0x2afa   : > { %v7125_v29 = vpop.f32.mrf.mxu1 }
0x2afb   : > { %7129 = vmatmul.mubr.msk.bf16.vlgmr.msra.gmra.mxu0 %vm988_vm2, %v5050_v27 }
0x2afc   : > { %7139 = vmatpush3.bf16.msra.mxu0 %v7466_v5  ;;  %7142 = vmatprep.mubr.msk.bf16.mxu0 %vm7551_vm0, %v7550_v1 }
0x2afd   : > { %7140 = vmatprep.subr.bf16.mxu0 %v7550_v1 }
0x2b00   : > { %7141 = vmatpush3.bf16.msra.mxu0 %v7467_v16 }
0x2b01   : > { %7152 = vmatprep.subr.bf16.mxu0 %v7550_v1 }
0x2b03   : > { %7143 = vmatmul.mubr.msk.bf16.vlgmr.msra.gmra.mxu0 %vm811_vm1, %v8740_v17 }
0x2b04   : > { %7153 = vmatpush3.bf16.msra.mxu0 %v8199_v53  ;;  %7154 = vmatprep.mubr.msk.bf16.mxu0 %vm7551_vm0, %v7550_v1 }
0x2b05   : > { %7164 = vmatprep.subr.bf16.mxu0 %v7550_v1 }
0x2bbb   : > { %v5088_v30 = vpop.f32.mrf.mxu0 }
0x2bbc   : > { %v5094_v32 = vsel %vm2500_vm6, -1e+20, %v5088_v30 }
0x2bbd   : > { %v7130_v33 = vpop.f32.mrf.mxu0  ;;  %v5095_v37 = vsel %vm988_vm2, %v5094_v32, -inf }
0x2bbe   : > { %5096 = vmax.xlane.f32.xlu0 %v5095_v37 }
0x2bbf   : > { %v5091_v38 = vpop.f32.mrf.mxu0 }
0x2bc0   : > { %v7471_v38 = vld [vmem:[%s8995_s11 + $0x2] ss:$0 sm:$0xff] }
0x2bc1   : > { %v7131_v39 = vpop.f32.mrf.mxu0 }
0x2bc3   : > { %v5185_v43 = vpop.f32.mrf.mxu0 }
0x2bc4   : > { %v5186_v55 = vadd.f32 %v7468_v50, %v5185_v43 }
0x2bc5   : > { %v7144_v44 = vpop.f32.mrf.mxu0 }
0x2bc6   : > { %v5191_v57 = vmul.f32 0.17677669, %v5186_v55 }
0x2bc7   : > { %v5188_v25 = vpop.f32.mrf.mxu0 }
0x2bc8   : > { %v5192_v7 = vpack.c.bf16 %v5191_v57, %v5191_v57 }
0x2bc9   : > { %v7145_v45 = vpop.f32.mrf.mxu0 }
0x2c47   : > { %v5097_v53 = vpop.xlane.xlu0 %5096 }
0x2c48   : > { %v5098_v46 = vsub.f32 %v5094_v32, %v5097_v53 }
0x2c4a   : > { %v5099_v47 = vmul.f32 1.442695, %v5098_v46 }
0x2c4c   : > { %7404 = vpow2.f32 %v5099_v47 }
0x2c59   : > { %v7405_v49 = vpop.eup %7404 }
0x2c5a   : > { %v5104_v56 = vpack.c.bf16 %v7405_v49, %v7405_v49 }
0x2c5c   : > { %7135 = vmatmul.mubr.msk.bf16.vlgmr.msra.gmra.mxu1 %vm988_vm2, %v5104_v56 }
0x2c5d   : > { %7147 = vmatpush3.bf16.xpose.msra.mxu1 %v8185_v31  ;;  %7148 = vmatprep.mubr.msk.bf16.mxu1 %vm7551_vm0, %v7550_v1 }
0x2c5e   : > { %7158 = vmatprep.subr.bf16.mxu1 %v7550_v1 }
0x2c64   : > { %7149 = vmatmul.mubr.msk.bf16.vlgmr.msra.gmra.mxu1 %vm988_vm2, %v5192_v7 }
0x2c65   : > { %7159 = vmatpush3.bf16.msra.mxu1 %v8225_v9  ;;  %7160 = vmatprep.mubr.msk.bf16.mxu1 %vm7551_vm0, %v7550_v1  ;;  %v5101_v9 = vsel %vm988_vm2, %v7405_v49, 0.0 }
0x2c66   : > { %7170 = vmatprep.subr.bf16.mxu1 %v7550_v1 }
0x2d1c   : > { %v5142_v58 = vpop.f32.mrf.mxu1 }
0x2d1e   : > { %v7136_v59 = vpop.f32.mrf.mxu1 }
0x2d20   : > { %v5145_v60 = vpop.f32.mrf.mxu1 }
0x2d21   : > { %v7472_v60 = vld [vmem:[%s9050_s10 + $0x38] sm:$0xff]  }
0x2d22   : > { %v7137_v31 = vpop.f32.mrf.mxu1 }
0x2d23   : > { %v7473_v31 = vld [vmem:[%s9050_s10 + $0x30] sm:$0xff]  }
0x2d24   : > { %v5230_v61 = vpop.f32.mrf.mxu1 }
0x2d25   : > { %v5236_v62 = vsel %vm2500_vm6, -1e+20, %v5230_v61 }
0x2d26   : > { %v7150_v21 = vpop.f32.mrf.mxu1  ;;  %v5237_v2 = vsel %vm988_vm2, %v5236_v62, -inf }
0x2d27   : > { %5238 = vmax.xlane.f32.xlu1 %v5237_v2 }
0x2d28   : > { %v5233_v40 = vpop.f32.mrf.mxu1 }
0x2d2a   : > { %v7151_v23 = vpop.f32.mrf.mxu1 }
0x2d2b   : > { %5102 = vadd.xlane.f32.xlu1 %v5101_v9 }
0x2db0   : > { %v5239_v63 = vpop.xlane.xlu1 %5238 }
0x2db1   : > { %v5240_v10 = vsub.f32 %v5236_v62, %v5239_v63  ;;  %v7474_v63 = vld [vmem:[%s8995_s11 + $0x3] ss:$0 sm:$0xff] }
0x2db3   : > { %v5241_v51 = vmul.f32 1.442695, %v5240_v10 }
0x2db4   : > { %v5103_v4 = vpop.xlane.xlu1 %5102 }
0x2db5   : > { %7406 = vpow2.f32 %v5241_v51 }
0x2db6   : > { %7408 = vrcp.f32 %v5103_v4 }
0x2dc2   : > { %v7407_v6 = vpop.eup %7406 }
0x2dc3   : > { %v5246_v15 = vpack.c.bf16 %v7407_v6, %v7407_v6  ;;  %v5243_v12 = vsel %vm988_vm2, %v7407_v6, 0.0  ;;  %v7409_v52 = vpop.eup %7408 }
0x2dc4   : > { %5244 = vadd.xlane.f32.xlu0 %v5243_v12  ;;  %v5149_v41 = vmul.f32 %v7409_v52, %v5142_v58 }
0x2dc5   : > { %7155 = vmatmul.mubr.msk.bf16.vlgmr.msra.gmra.mxu0 %vm988_vm2, %v5246_v15 }
0x2dc6   : > { %7165 = vmatpush3.bf16.msra.mxu0 %v8208_v0  ;;  %7166 = vmatprep.mubr.msk.bf16.mxu0 %vm7551_vm0, %v7550_v1  ;;  %v5150_v34 = vpack.c.bf16 %v5149_v41, %v5149_v41 }
0x2dc7   : > { %7178 = vmatprep.subr.bf16.mxu0 %v7550_v1 }
0x2dcd   : > { %7167 = vmatmul.mubr.msk.bf16.vlgmr.msra.gmra.mxu0 %vm988_vm2, %v5150_v34 }
0x2dce   : > { %7179 = vmatpush3.bf16.xpose.msra.mxu0 %v8259_v35  ;;  %7180 = vmatprep.mubr.msk.bf16.mxu0 %vm7551_vm0, %v7550_v1 }
0x2dcf   : > { %7190 = vmatprep.subr.bf16.mxu0 %v7550_v1 }
0x2e4d   : > { %v5245_v8 = vpop.xlane.xlu0 %5244 }
0x2e4e   : > { %7410 = vrcp.f32 %v5245_v8 }
0x2e5b   : > { %v7411_v3 = vpop.eup %7410 }
0x2e85   : > { %v5284_v0 = vpop.f32.mrf.mxu0 }
0x2e86   : > { %v5291_v13 = vmul.f32 %v7411_v3, %v5284_v0 }
0x2e87   : > { %v7156_v18 = vpop.f32.mrf.mxu0 }
0x2e88   : > { %v5292_v28 = vpack.c.bf16 %v5291_v13, %v5291_v13 }
0x2e89   : > { %v5287_v54 = vpop.f32.mrf.mxu0 }
0x2e8a   : > { %7161 = vmatmul.mubr.msk.bf16.vlgmr.msra.gmra.mxu1 %vm988_vm2, %v5292_v28 }
0x2e8b   : > { %7171 = vmatpush3.bf16.msra.mxu1 %v7469_v19  ;;  %v7157_v35 = vpop.f32.mrf.mxu0  ;;  %7174 = vmatprep.mubr.msk.bf16.mxu1 %vm7551_vm0, %v7550_v1 }
0x2e8c   : > { %7172 = vmatprep.subr.bf16.mxu1 %v7550_v1 }
0x2e8d   : > { %v8806_v20 = vpop.f32.mrf.mxu0 }
0x2e8f   : > { %7173 = vmatpush3.bf16.msra.mxu1 %v7470_v26  ;;  %v7168_v27 = vpop.f32.mrf.mxu0 }
0x2e90   : > { %7184 = vmatprep.subr.bf16.mxu1 %v7550_v1 }
0x2e91   : > { %v5376_v29 = vpop.f32.mrf.mxu0 }
0x2e92   : > { %7175 = vmatmul.mubr.msk.bf16.vlgmr.msra.gmra.mxu1 %vm811_vm1, %v8740_v17 }
0x2e93   : > { %7185 = vmatpush3.bf16.msra.mxu1 %v8290_v11  ;;  %v7169_v5 = vpop.f32.mrf.mxu0  ;;  %7186 = vmatprep.mubr.msk.bf16.mxu1 %vm7551_vm0, %v7550_v1 }
0x2e94   : > { %7196 = vmatprep.subr.bf16.mxu1 %v7550_v1  ;;  %v7476_v5 = vld [vmem:[%s9000_s16] sm:$0xff]  }
0x2f4a   : > { %v8818_v16 = vpop.f32.mrf.mxu1 }
0x2f4c   : > { %v7162_v30 = vpop.f32.mrf.mxu1 }
0x2f4e   : > { %v5333_v32 = vpop.f32.mrf.mxu1 }
0x2f50   : > { %v7163_v33 = vpop.f32.mrf.mxu1 }
0x2f52   : > { %v5413_v37 = vpop.f32.mrf.mxu1 }
0x2f53   : > { %v5414_v39 = vadd.f32 %v7471_v38, %v5413_v37 }
0x2f54   : > { %v7176_v43 = vpop.f32.mrf.mxu1 }
0x2f55   : > { %v5419_v44 = vmul.f32 0.17677669, %v5414_v39 }
0x2f56   : > { %v5416_v11 = vpop.f32.mrf.mxu1 }
0x2f57   : > { %v5420_v25 = vpack.c.bf16 %v5419_v44, %v5419_v44  ;;  %v7477_v44 = vld [vmem:[%s9002_s18 + $0x18] sm:$0xff]   ;;  %v7478_v11 = vld [vmem:[%s9002_s18 + $0x10] sm:$0xff]  }
0x2f58   : > { %v7177_v45 = vpop.f32.mrf.mxu1 }
0x2f59   : > { %7181 = vmatmul.mubr.msk.bf16.vlgmr.msra.gmra.mxu0 %vm988_vm2, %v5420_v25  ;;  %v7479_v25 = vld [vmem:[%s9002_s18 + $0x8] sm:$0xff]   ;;  %v7480_v45 = vld [vmem:[%s9002_s18] sm:$0xff]  }
0x2f5a   : > { %7191 = vmatpush3.bf16.msra.mxu0 %v8314_v24  ;;  %7192 = vmatprep.mubr.msk.bf16.mxu0 %vm7551_vm0, %v7550_v1 }
0x2f5b   : > { %7204 = vmatprep.subr.bf16.mxu0 %v7550_v1 }
0x3019   : > { %v5458_v53 = vpop.f32.mrf.mxu0 }
0x301a   : > { %v5464_v46 = vsel %vm2500_vm6, -1e+20, %v5458_v53 }
0x301b   : > { %v7182_v47 = vpop.f32.mrf.mxu0  ;;  %v5465_v49 = vsel %vm988_vm2, %v5464_v46, -inf }
0x301c   : > { %5466 = vmax.xlane.f32.xlu0 %v5465_v49  ;;  %v7481_v49 = vld [vmem:[%s8997_s13] ss:$0 sm:$0xff] }
0x301d   : > { %v5461_v50 = vpop.f32.mrf.mxu0 }
0x301f   : > { %v7183_v55 = vpop.f32.mrf.mxu0 }
0x30a5   : > { %v5467_v56 = vpop.xlane.xlu0 %5466 }
0x30a6   : > { %v5468_v57 = vsub.f32 %v5464_v46, %v5467_v56 }
0x30a8   : > { %v5469_v7 = vmul.f32 1.442695, %v5468_v57 }
0x30aa   : > { %7412 = vpow2.f32 %v5469_v7 }
0x30b7   : > { %v7413_v24 = vpop.eup %7412 }
0x30b8   : > { %v5474_v58 = vpack.c.bf16 %v7413_v24, %v7413_v24  ;;  %v5471_v59 = vsel %vm988_vm2, %v7413_v24, 0.0 }
0x30b9   : > { %5472 = vadd.xlane.f32.xlu1 %v5471_v59 }
0x30ba   : > { %7187 = vmatmul.mubr.msk.bf16.vlgmr.msra.gmra.mxu1 %vm988_vm2, %v5474_v58 }
0x30bb   : > { %7197 = vmatpush3.bf16.msra.mxu1 %v7472_v60  ;;  %7200 = vmatprep.mubr.msk.bf16.mxu1 %vm7551_vm0, %v7550_v1 }
0x30bc   : > { %7198 = vmatprep.subr.bf16.mxu1 %v7550_v1 }
0x30bf   : > { %7199 = vmatpush3.bf16.msra.mxu1 %v7473_v31 }
0x30c0   : > { %7210 = vmatprep.subr.bf16.mxu1 %v7550_v1 }
0x30c2   : > { %7201 = vmatmul.mubr.msk.bf16.vlgmr.msra.gmra.mxu1 %vm811_vm1, %v8740_v17 }
0x30c3   : > { %7211 = vmatpush3.bf16.msra.mxu1 %v8370_v22  ;;  %7212 = vmatprep.mubr.msk.bf16.mxu1 %vm7551_vm0, %v7550_v1 }
0x30c4   : > { %7222 = vmatprep.subr.bf16.mxu1 %v7550_v1 }
0x3142   : > { %v5473_v61 = vpop.xlane.xlu1 %5472 }
0x3143   : > { %7414 = vrcp.f32 %v5473_v61 }
0x3150   : > { %v7415_v62 = vpop.eup %7414 }
0x317a   : > { %v5512_v21 = vpop.f32.mrf.mxu1 }
0x317b   : > { %v5519_v2 = vmul.f32 %v7415_v62, %v5512_v21 }
0x317c   : > { %v7188_v40 = vpop.f32.mrf.mxu1 }
0x317d   : > { %v5520_v23 = vpack.c.bf16 %v5519_v2, %v5519_v2 }
0x317e   : > { %v5515_v9 = vpop.f32.mrf.mxu1 }
0x317f   : > { %7193 = vmatmul.mubr.msk.bf16.vlgmr.msra.gmra.mxu0 %vm988_vm2, %v5520_v23  ;;  %v7483_v9 = vld [vmem:[%s8999_s15] ss:$0 sm:$0xff] }
0x3180   : > { %7205 = vmatpush3.bf16.xpose.msra.mxu0 %v8356_v42  ;;  %v7189_v17 = vpop.f32.mrf.mxu1  ;;  %7206 = vmatprep.mubr.msk.bf16.mxu0 %vm7551_vm0, %v7550_v1  ;;  %v5374_v42 = vadd.f32 %v8806_v20, %v8818_v16 }
0x3181   : > { %7216 = vmatprep.subr.bf16.mxu0 %v7550_v1 }
0x3182   : > { %v5599_v22 = vpop.f32.mrf.mxu1 }
0x3183   : > { %v5600_v10 = vadd.f32 %v7474_v63, %v5599_v22 }
0x3184   : > { %v7202_v51 = vpop.f32.mrf.mxu1 }
0x3185   : > { %v5605_v4 = vmul.f32 0.17677669, %v5600_v10  ;;  %v7484_v10 = vld [vmem:[%s9001_s17] ss:$0 sm:$0xff] }
0x3186   : > { %v5602_v6 = vpop.f32.mrf.mxu1 }
0x3187   : > { %v5606_v15 = vpack.c.bf16 %v5605_v4, %v5605_v4 }
0x3188   : > { %v7203_v12 = vpop.f32.mrf.mxu1 }
0x3189   : > { %7207 = vmatmul.mubr.msk.bf16.vlgmr.msra.gmra.mxu0 %vm988_vm2, %v5606_v15 }
0x318a   : > { %7217 = vmatpush3.bf16.msra.mxu0 %v8382_v36  ;;  %7218 = vmatprep.mubr.msk.bf16.mxu0 %vm7551_vm0, %v7550_v1 }
0x318b   : > { %7230 = vmatprep.subr.bf16.mxu0 %v7550_v1 }
0x323f   : > { %v5558_v52 = vpop.f32.mrf.mxu0 }
0x3240   : > { %v5564_v41 = vadd.f32 %v5558_v52, %v5374_v42 }
0x3241   : > { %v7194_v34 = vpop.f32.mrf.mxu0 }
0x3243   : > { %v5561_v8 = vpop.f32.mrf.mxu0 }
0x3245   : > { %v7195_v3 = vpop.f32.mrf.mxu0 }
0x3249   : > { %v5644_v0 = vpop.f32.mrf.mxu0 }
0x324a   : > { %v5650_v13 = vsel %vm2500_vm6, -1e+20, %v5644_v0 }
0x324b   : > { %v7208_v18 = vpop.f32.mrf.mxu0  ;;  %v5651_v36 = vsel %vm988_vm2, %v5650_v13, -inf }
0x324c   : > { %5652 = vmax.xlane.f32.xlu0 %v5651_v36 }
0x324d   : > { %v5647_v28 = vpop.f32.mrf.mxu0 }
0x324f   : > { %v7209_v54 = vpop.f32.mrf.mxu0 }
0x32d5   : > { %v5653_v19 = vpop.xlane.xlu0 %5652 }
0x32d6   : > { %v5654_v35 = vsub.f32 %v5650_v13, %v5653_v19 }
0x32d8   : > { %v5655_v26 = vmul.f32 1.442695, %v5654_v35 }
0x32da   : > { %7416 = vpow2.f32 %v5655_v26  ;;  %v7346_v26 = vld [vmem:[%s9006_s22 + $0x8] sm:$0xff]  }
0x32e7   : > { %v7417_v20 = vpop.eup %7416 }
0x32e8   : > { %v5660_v27 = vpack.c.bf16 %v7417_v20, %v7417_v20  ;;  %v5657_v29 = vsel %vm988_vm2, %v7417_v20, 0.0  ;;  %v7347_v20 = vld [vmem:[%s9006_s22] sm:$0xff]  }
0x32e9   : > { %5658 = vadd.xlane.f32.xlu1 %v5657_v29 }
0x32ea   : > { %7213 = vmatmul.mubr.msk.bf16.vlgmr.msra.gmra.mxu1 %vm988_vm2, %v5660_v27 }
0x32eb   : > { %7223 = vmatpush3.bf16.msra.mxu1 %v7475_v48  ;;  %7226 = vmatprep.mubr.msk.bf16.mxu1 %vm7551_vm0, %v7550_v1 }
0x32ec   : > { %7224 = vmatprep.subr.bf16.mxu1 %v7550_v1 }
0x32ef   : > { %7225 = vmatpush3.bf16.msra.mxu1 %v7476_v5 }
0x32f0   : > { %7242 = vmatprep.subr.bf16.mxu1 %v7550_v1 }
0x3372   : > { %v5659_v16 = vpop.xlane.xlu1 %5658 }
0x3373   : > { %7418 = vrcp.f32 %v5659_v16 }
0x3380   : > { %v7419_v30 = vpop.eup %7418 }
0x33aa   : > { %v5698_v32 = vpop.f32.mrf.mxu1 }
0x33ab   : > { %v5705_v33 = vmul.f32 %v7419_v30, %v5698_v32  ;;  %v7486_v30 = vld [vmem:[%s9004_s20] ss:$0 sm:$0xff] }
0x33ac   : > { %v7214_v37 = vpop.f32.mrf.mxu1 }
0x33ad   : > { %v5706_v38 = vpack.c.bf16 %v5705_v33, %v5705_v33  ;;  %v7487_v33 = vld [vmem:[%s9005_s21] ss:$0 sm:$0xff] }
0x33ae   : > { %v5701_v39 = vpop.f32.mrf.mxu1 }
0x33af   : > { %7219 = vmatmul.mubr.msk.bf16.vlgmr.msra.gmra.mxu0 %vm988_vm2, %v5706_v38 }
0x33b0   : > { %v7215_v43 = vpop.f32.mrf.mxu1  ;;  %7231 = vmatpush3.bf16.msra.mxu0 %v7477_v44  ;;  %7238 = vmatprep.mubr.msk.bf16.mxu0 %vm7551_vm0, %v7550_v1 }
0x33b1   : > { %7232 = vmatprep.subr.bf16.mxu0 %v7550_v1 }
0x33b4   : > { %7233 = vmatpush3.bf16.msra.mxu0 %v7478_v11 }
0x33b5   : > { %7234 = vmatprep.subr.bf16.mxu0 %v7550_v1 }
0x33b8   : > { %7235 = vmatpush3.bf16.msra.mxu0 %v7479_v25 }
0x33b9   : > { %7236 = vmatprep.subr.bf16.mxu0 %v7550_v1 }
0x33bc   : > { %7237 = vmatpush3.bf16.msra.mxu0 %v7480_v45 }
0x346f   : > { %v5744_v53 = vpop.f32.mrf.mxu0 }
0x3470   : > { %v5750_v46 = vadd.f32 %v5744_v53, %v5564_v41  ;;  %v7485_v41 = vld [vmem:[%s9003_s19] ss:$0 sm:$0xff] }
0x3471   : > { %v7220_v47 = vpop.f32.mrf.mxu0 }
0x3472   : > { %v5751_v50 = vadd.f32 %v7481_v49, %v5750_v46 }
0x3473   : > { %v5747_v55 = vpop.f32.mrf.mxu0 }
0x3474   : > { %v5752_v56 = vadd.f32 %v5751_v50, %v8736_v14  ;;  %v7482_v14 = vld [vmem:[%s8998_s14] ss:$0 sm:$0xff] }
0x3475   : > { %v7221_v57 = vpop.f32.mrf.mxu0 }
0x3476   : > { %v5753_v7 = vsel %vm811_vm1, %v5752_v56, 0.0 }
0x3477   : > { %5754 = vadd.xlane.f32.xlu0 %v5753_v7 }
0x3500   : > { %v5755_v24 = vpop.xlane.xlu0 %5754 }
0x3501   : > { %v5756_v58 = vmul.f32 0.03125, %v5755_v24 }
0x3503   : > { %v5757_v59 = vsub.f32 %v5752_v56, %v5756_v58 }
0x3505   : > { %v5758_v60 = vmul.f32 %v5757_v59, %v5757_v59 }
0x3507   : > { %v5759_v31 = vsel %vm811_vm1, %v5758_v60, 0.0 }
0x3508   : > { %5760 = vadd.xlane.f32.xlu1 %v5759_v31 }
0x3591   : > { %v5761_v61 = vpop.xlane.xlu1 %5760 }
0x3592   : > { %v5762_v62 = vmul.f32 0.03125, %v5761_v61 }
0x3594   : > { %v5763_v21 = vadd.f32 1e-05, %v5762_v62 }
0x3596   : > { %7420 = vrsqrt.f32 %v5763_v21 }
0x35a3   : > { %v7421_v2 = vpop.eup %7420 }
0x35a4   : > { %v5765_v40 = vmul.f32 %v7421_v2, %v5757_v59 }
0x35a6   : > { %v5766_v23 = vmul.f32 %v7482_v14, %v5765_v40 }
0x35a8   : > { %v5767_v17 = vadd.f32 %v7483_v9, %v5766_v23 }
0x35aa   : > { %v5768_v22 = vpack.c.bf16 %v5767_v17, %v5767_v17 }
0x35ac   : > { %7227 = vmatmul.mubr.msk.bf16.vlgmr.msra.gmra.mxu1 %vm811_vm1, %v5768_v22 }
0x35ad   : > { %7246 = vmatprep.mubr.msk.bf16.mxu1 %vm7551_vm0, %v7550_v1  ;;  %7243 = vmatpush3.bf16.msra.mxu1 %v7346_v26 }
0x35ae   : > { %7244 = vmatprep.subr.bf16.mxu1 %v7550_v1  ;;  %v6351_v1 = vld [vmem:[%s9007_s23] ss:$0 sm:$0xff] }
0x35b1   : > { %7245 = vmatpush3.bf16.msra.mxu1 %v7347_v20 }
0x366c   : > { %v5806_v63 = vpop.f32.mrf.mxu1 }
0x366d   : > { %v5807_v51 = vadd.f32 %v7484_v10, %v5806_v63 }
0x366e   : > { %v7228_v4 = vpop.f32.mrf.mxu1 }
0x366f   : > { %v5812_v6 = vmax.f32 %v5807_v51, 0.0 }
0x3670   : > { %v5809_v15 = vpop.f32.mrf.mxu1 }
0x3671   : > { %v5813_v12 = vpack.c.bf16 %v5812_v6, %v5812_v6 }
0x3672   : > { %v7229_v42 = vpop.f32.mrf.mxu1 }
0x3673   : > { %7239 = vmatmul.mubr.msk.bf16.vlgmr.msra.gmra.mxu0 %vm3816_vm7, %v5813_v12 }
0x3733   : > { %v5851_v52 = vpop.f32.mrf.mxu0 }
0x3734   : > { %v5852_v34 = vadd.f32 %v7485_v41, %v5851_v52 }
0x3735   : > { %v7240_v8 = vpop.f32.mrf.mxu0 }
0x3736   : > { %v5857_v3 = vadd.f32 %v5852_v34, %v5767_v17 }
0x3737   : > { %v5854_v0 = vpop.f32.mrf.mxu0 }
0x3738   : > { %v5858_v13 = vsel %vm811_vm1, %v5857_v3, 0.0 }
0x3739   : > { %5859 = vadd.xlane.f32.xlu0 %v5858_v13  ;;  %v7241_v18 = vpop.f32.mrf.mxu0 }
0x37c2   : > { %v5860_v36 = vpop.xlane.xlu0 %5859 }
0x37c3   : > { %v5861_v28 = vmul.f32 0.03125, %v5860_v36 }
0x37c5   : > { %v5862_v54 = vsub.f32 %v5857_v3, %v5861_v28 }
0x37c7   : > { %v5863_v19 = vmul.f32 %v5862_v54, %v5862_v54 }
0x37c9   : > { %v5864_v35 = vsel %vm811_vm1, %v5863_v19, 0.0 }
0x37ca   : > { %5865 = vadd.xlane.f32.xlu1 %v5864_v35 }
0x3853   : > { %v5866_v27 = vpop.xlane.xlu1 %5865 }
0x3854   : > { %v5867_v29 = vmul.f32 0.03125, %v5866_v27 }
0x3856   : > { %v5868_v48 = vadd.f32 1e-05, %v5867_v29 }
0x3858   : > { %7422 = vrsqrt.f32 %v5868_v48 }
0x3865   : > { %v7423_v5 = vpop.eup %7422 }
0x3866   : > { %v5870_v16 = vmul.f32 %v7423_v5, %v5862_v54 }
0x3868   : > { %v5871_v32 = vmul.f32 %v7486_v30, %v5870_v16 }
0x386a   : > { %v5872_v37 = vadd.f32 %v7487_v33, %v5871_v32 }
0x386c   : > { %v5877_v38 = vpack.c.bf16 %v5872_v37, %v5872_v37 }
0x386e   : > { %7247 = vmatmul.mubr.msk.bf16.vlgmr.msra.gmra.mxu1 %vm811_vm1, %v5877_v38 }
0x392e   : > { %v5934_v39 = vpop.f32.mrf.mxu1 }
0x392f   : > { %v5935_v43 = vadd.f32 %v6351_v1, %v5934_v39 }
0x3930   : > { %v7248_v44 = vpop.f32.mrf.mxu1 }
0x3931   : > { %5940 = vst [vmem:[%s765_s1] sm:$0xff] %v5935_v43 }
0x3932   : > { %v5937_v11 = vpop.f32.mrf.mxu1 }
0x3933   : > { %7501 = shalt.err (!%p7498_p3)
}
0x3934   : > { %s7502_s1 = scalar_lea.hbm %s8943_s8, 128  ;;  %s7506_s5 = scalar_lea.hbm %s9055_s2, 256 }
0x3935   : > { %p7503_p4 = scmp.ne.s32.totalorder %s8943_s8, %s7502_s1  ;;  %p7507_p9 = scmp.lt.s32.totalorder %s8943_s8, %s9055_s2 }
0x3936   : > { %p7508_p10 = scmp.lt.s32.totalorder %s7506_s5, %s7502_s1 }
0x3937   : > { %p7504_p7 = pnand %p7503_p4, %p7717_p5 }
0x3938   : > { %p7509_p11 = por %p7508_p10, %p7507_p9 }
0x3939   : > { %p7505_p8 = pneg %p7504_p7 }
0x393b   : > { %p7510_p12 = pnand %p7509_p11, %p7505_p8 }
0x393d   : > { %7513 = shalt.err (!%p7510_p12)
}
0x393e   : > { %7250 = dma.vmem_to_hbm [thread:$0]  (%p7717_p5), %s8945_s27, 128, %s8943_s8, %s5942_s7   ;;  %v7249_v25 = vpop.f32.mrf.mxu1 }
0x393f PF: > { %s9056_s24 = sld [smem:[#allocation7_spill]] }
0x3940   : > { %s9057_s0 = sld [smem:[#allocation5_spill]] }
0x3945   : > { %p7256_p13 = scmp.ge.s32.totalorder %s9056_s24, 2 }
0x3946   : > { %s5967_s4 = sand.u32 1, %s9057_s0  }
0x3947   : > { %p7253_p0 = pnand %p7256_p13, %p7721_p6  ;;  %s5968_s10 = scalar_lea.sflag [#allocation3], %s5967_s4 }
0x3949   : > { %p7254_p1 = pneg %p7253_p0 }
0x394b   : > { %7531 = dma.done.wait (%p7254_p1), %s5968_s10, 128  }
0x394c   : > { %7533 = vsyncadd (%p7254_p1), %s5968_s10, 4294967168  ;;  %s9059_s28 = sld [smem:[#allocation8_spill]]  ;;  %s9062_s5 = smov %s7540_s26 }
0x394d   : > { %s9060_s1 = sld [smem:[#allocation6_spill]] }
0x394e   : > { %s9061_s27 = sld [smem:[#allocation9_spill]] }
0x3952   : > { %p34_p2 = scmp.ge.s32.totalorder %s9059_s28, 4  }
0x3953   : > { %s9063_s26 = smov %s9060_s1 }
0x3954   :  { %36 = sbr.rel (!%p34_p2) target bundleno = 16 (0x10), region = 210 }
0x3959   :  { %5973 = vsyncpa [#allocation3], 1 }
0x395a   :  { %5975 = vsyncpa [#allocation3 + $0x1], 1 }

</bundles_post_ra>
